<compile_context>
chip_gen: v7x
topology: tpu7x:2x2x1
jax: 0.10.0
libtpu: 0.0.40
codegen_flags: <defaults>
</compile_context>

<pallas_src>
import jax
import jax.numpy as jnp
from jax.experimental import pallas as pl
from jax.experimental.pallas import tpu as pltpu

H1 = 128      # lstm1 hidden size
H2 = 64       # lstm2 hidden size (NOT padded: 4*H2 = 256 gate columns)
D_IN = 2
TB = 8        # batch tile (sublane multiple); grid axis runs over batch tiles


def _leaky_relu(x, slope=0.01):
    return jnp.where(x > 0, x, slope * x)


def _lstm_cell(gates, c, H):
    # PyTorch gate order (i, f, g, o).
    i = jax.nn.sigmoid(gates[:, 0 * H:1 * H])
    f = jax.nn.sigmoid(gates[:, 1 * H:2 * H])
    g = jnp.tanh(gates[:, 2 * H:3 * H])
    o = jax.nn.sigmoid(gates[:, 3 * H:4 * H])
    c_new = f * c + i * g
    h_new = o * jnp.tanh(c_new)
    return h_new, c_new


# ---------------------------------------------------------------------------
# Fused kernel: (lstm1 + leaky_relu + lstm2) recurrence + last-step fc+sigmoid
# ---------------------------------------------------------------------------
def fused_lstm_kernel(x_ref, wih1_ref, b1_ref, whh1_ref,
                      wih2_ref, b2_ref, whh2_ref,
                      wfc_ref, bfc_ref, out_ref):
    # x_ref:    (T, TB, 2)   f32  time-major batch tile
    # wih1_ref: (2, 512)     f32      b1_ref: (1, 512) f32
    # whh1_ref: (128, 512)   bf16
    # wih2_ref: (128, 256)   bf16     b2_ref: (1, 256) f32
    # whh2_ref: (64, 256)    bf16
    # wfc_ref:  (1, 64)      f32      bfc_ref: (1, 1) f32
    # out_ref:  (TB, 1)      f32
    T = x_ref.shape[0]
    tb = x_ref.shape[1]

    # Loop-invariant broadcasts hoisted out of the recurrence (JAX does not
    # CSE broadcast_in_dim; these live in vregs across the loop).
    w1_r0 = jnp.broadcast_to(wih1_ref[0:1, :], (tb, 4 * H1))
    w1_r1 = jnp.broadcast_to(wih1_ref[1:2, :], (tb, 4 * H1))
    b1b = jnp.broadcast_to(b1_ref[...], (tb, 4 * H1))
    b2b = jnp.broadcast_to(b2_ref[...], (tb, 4 * H2))

    def step(t, carry):
        h1, c1, h2, c2 = carry
        x_t = x_ref[t]                                        # (tb, 2) f32

        # ---- layer-1: K=2 input projection as two VPU broadcast-FMAs ----
        gx1 = x_t[:, 0:1] * w1_r0 + x_t[:, 1:2] * w1_r1 + b1b
        g1 = gx1 + jnp.dot(h1.astype(jnp.bfloat16), whh1_ref[...],
                           preferred_element_type=jnp.float32)
        h1n, c1n = _lstm_cell(g1, c1, H1)
        a1 = _leaky_relu(h1n).astype(jnp.bfloat16)            # (tb, 128)

        # ---- layer-2, fused in the same step (its input act1[t] is ready) --
        g2 = (b2b
              + jnp.dot(a1, wih2_ref[...], preferred_element_type=jnp.float32)
              + jnp.dot(h2.astype(jnp.bfloat16), whh2_ref[...],
                        preferred_element_type=jnp.float32))
        h2n, c2n = _lstm_cell(g2, c2, H2)
        return h1n, c1n, h2n, c2n

    carry0 = (jnp.zeros((tb, H1), jnp.float32),
              jnp.zeros((tb, H1), jnp.float32),
              jnp.zeros((tb, H2), jnp.float32),
              jnp.zeros((tb, H2), jnp.float32))
    _, _, h2, _ = jax.lax.fori_loop(0, T, step, carry0, unroll=min(T, 8))

    # ---- fused fc + sigmoid epilogue: VPU multiply + lane reduction ----
    h2a = _leaky_relu(h2)                                     # (tb, 64)
    logits = jnp.sum(h2a * wfc_ref[...], axis=-1, keepdims=True) + bfc_ref[...]
    out_ref[...] = jax.nn.sigmoid(logits)


# ---------------------------------------------------------------------------
# Wrapper: parameter layout plumbing (plain JAX glue) + pallas_call
# ---------------------------------------------------------------------------
def lstm_model_forward(x, params):
    """x: (B, T, 2) float32 -> (B, 1) float32, matching LSTMModel.forward."""
    B, T, _ = x.shape
    Bp = ((B + TB - 1) // TB) * TB
    nb = Bp // TB

    w_ih1, w_hh1, b_ih1, b_hh1 = params["lstm1"]
    w_ih2, w_hh2, b_ih2, b_hh2 = params["lstm2"]

    # Layer 1 (gates are 128-lane aligned by construction).
    wih1 = jnp.transpose(w_ih1).astype(jnp.float32)                  # (2, 512)
    b1 = (b_ih1 + b_hh1).reshape(1, 4 * H1).astype(jnp.float32)      # (1, 512)
    whh1 = jnp.transpose(w_hh1).astype(jnp.bfloat16)                 # (128, 512)

    # Layer 2: no gate padding; 4*H2 = 256 columns, 64 recurrent rows.
    wih2 = jnp.transpose(w_ih2).astype(jnp.bfloat16)                 # (128, 256)
    b2 = (b_ih2 + b_hh2).reshape(1, 4 * H2).astype(jnp.float32)      # (1, 256)
    whh2 = jnp.transpose(w_hh2).astype(jnp.bfloat16)                 # (64, 256)

    wfc = params["fc_w"].astype(jnp.float32)                         # (1, 64)
    bfc = params["fc_b"].reshape(1, 1).astype(jnp.float32)           # (1, 1)

    # (B, T, 2) -> time-major, batch padded to a multiple of TB.
    # (Padded batch rows cost a little wasted compute; out[:B] drops them.)
    x_t = jnp.transpose(x, (1, 0, 2)).astype(jnp.float32)            # (T, B, 2)
    x_t = jnp.pad(x_t, ((0, 0), (0, Bp - B), (0, 0)))                # (T, Bp, 2)
    # NOTE: for very long sequences, chunk T through the grid instead of
    # passing a full (T, TB, 2) block (x is the only T-scaling VMEM user now).

    out = pl.pallas_call(
        fused_lstm_kernel,
        out_shape=jax.ShapeDtypeStruct((Bp, 1), jnp.float32),
        grid=(nb,),
        in_specs=[
            pl.BlockSpec((T, TB, D_IN), lambda b: (0, b, 0)),    # x tile
            pl.BlockSpec((D_IN, 4 * H1), lambda b: (0, 0)),      # wih1
            pl.BlockSpec((1, 4 * H1), lambda b: (0, 0)),         # b1
            pl.BlockSpec((H1, 4 * H1), lambda b: (0, 0)),        # whh1
            pl.BlockSpec((H1, 4 * H2), lambda b: (0, 0)),        # wih2
            pl.BlockSpec((1, 4 * H2), lambda b: (0, 0)),         # b2
            pl.BlockSpec((H2, 4 * H2), lambda b: (0, 0)),        # whh2
            pl.BlockSpec((1, H2), lambda b: (0, 0)),             # fc weight
            pl.BlockSpec((1, 1), lambda b: (0, 0)),              # fc bias
        ],
        out_specs=pl.BlockSpec((TB, 1), lambda b: (b, 0)),
        compiler_params=pltpu.CompilerParams(
            dimension_semantics=("parallel",)),                  # v7x megacore
    )(x_t, wih1, b1, whh1, wih2, b2, whh2, wfc, bfc)

    return out[:B]


# ---------------------------------------------------------------------------
# Pure-JAX reference (f32 everywhere) for a loose numerical sanity check.
# ---------------------------------------------------------------------------
def _lstm_ref(x_tbd, w_ih, w_hh, b_ih, b_hh):
    T, B, _ = x_tbd.shape
    H = w_hh.shape[1]
    h = jnp.zeros((B, H), jnp.float32)
    c = jnp.zeros((B, H), jnp.float32)
    b = b_ih + b_hh
    outs = []
    for t in range(T):
        gates = x_tbd[t] @ w_ih.T + h @ w_hh.T + b
        i = jax.nn.sigmoid(gates[:, 0:H])
        f = jax.nn.sigmoid(gates[:, H:2 * H])
        g = jnp.tanh(gates[:, 2 * H:3 * H])
        o = jax.nn.sigmoid(gates[:, 3 * H:4 * H])
        c = f * c + i * g
        h = o * jnp.tanh(c)
        outs.append(h)
    return jnp.stack(outs)


def _model_ref(x, params):
    x_t = jnp.transpose(x, (1, 0, 2)).astype(jnp.float32)
    h1 = _leaky_relu(_lstm_ref(x_t, *params["lstm1"]))
    h2 = _leaky_relu(_lstm_ref(h1, *params["lstm2"]))
    last = h2[-1]
    return jax.nn.sigmoid(last @ params["fc_w"].T + params["fc_b"])


def init_params(key):
    """Deterministic parameter init matching nn.LSTM / nn.Linear shapes."""
    def u(key, shape, scale):
        return jax.random.uniform(key, shape, jnp.float32, -scale, scale)

    ks = jax.random.split(key, 11)
    h1, h2 = 128, 64
    s1, s2 = 1.0 / jnp.sqrt(h1), 1.0 / jnp.sqrt(h2)
    sfc = 1.0 / jnp.sqrt(64.0)
    return {
        "lstm1": (
            u(ks[0], (4 * h1, 2), s1),     # weight_ih_l0
            u(ks[1], (4 * h1, h1), s1),    # weight_hh_l0
            u(ks[2], (4 * h1,), s1),       # bias_ih_l0
            u(ks[3], (4 * h1,), s1),       # bias_hh_l0
        ),
        "lstm2": (
            u(ks[4], (4 * h2, h1), s2),
            u(ks[5], (4 * h2, h2), s2),
            u(ks[6], (4 * h2,), s2),
            u(ks[7], (4 * h2,), s2),
        ),
        "fc_w": u(ks[8], (1, 64), sfc),    # nn.Linear(64, 1).weight
        "fc_b": u(ks[9], (1,), sfc),       # nn.Linear(64, 1).bias
    }


if __name__ == "__main__":
    key = jax.random.PRNGKey(0)
    k_param, k_x = jax.random.split(key)
    params = init_params(k_param)

    B, T = 2, 8
    x = jax.random.normal(k_x, (B, T, 2), jnp.float32)

    fwd = jax.jit(lambda xx: lstm_model_forward(xx, params))
    out = jax.block_until_ready(fwd(x))
    assert out.shape == (B, 1) and out.dtype == jnp.float32
    assert bool(jnp.all(jnp.isfinite(out)))

    # Loose check vs. f32 reference (kernel uses bf16 weights, f32 accumulation).
    ref = _model_ref(x, params)
    assert jnp.allclose(out, ref, atol=5e-2, rtol=5e-2), (out, ref)

    print("KERNEL_OK")
</pallas_src>

<mosaic_0001>
module attributes {stable_mosaic.version = 11 : i64} {
  func.func @fused_lstm_kernel(%arg0: i32, %arg1: memref<8x8x2xf32, #tpu.memory_space<vmem>>, %arg2: memref<2x512xf32, #tpu.memory_space<vmem>>, %arg3: memref<1x512xf32, #tpu.memory_space<vmem>>, %arg4: memref<128x512xbf16, #tpu.memory_space<vmem>>, %arg5: memref<128x256xbf16, #tpu.memory_space<vmem>>, %arg6: memref<1x256xf32, #tpu.memory_space<vmem>>, %arg7: memref<64x256xbf16, #tpu.memory_space<vmem>>, %arg8: memref<1x64xf32, #tpu.memory_space<vmem>>, %arg9: memref<1x1xf32, #tpu.memory_space<vmem>>, %arg10: memref<8x1xf32, #tpu.memory_space<vmem>>) attributes {dimension_semantics = [#tpu.dimension_semantics<parallel>], iteration_bounds = array<i64: 1>, scalar_prefetch = 0 : i64, scratch_operands = 0 : i64, tpu.core_type = #tpu.core_type<tc>, window_params = [{transform_indices = @transform_0, window_bounds = array<i64: 8, 8, 2>}, {pipeline_mode = #tpu.pipeline_mode<synchronous>, transform_indices = @transform_1, window_bounds = array<i64: 2, 512>}, {pipeline_mode = #tpu.pipeline_mode<synchronous>, transform_indices = @transform_2, window_bounds = array<i64: 1, 512>}, {pipeline_mode = #tpu.pipeline_mode<synchronous>, transform_indices = @transform_3, window_bounds = array<i64: 128, 512>}, {pipeline_mode = #tpu.pipeline_mode<synchronous>, transform_indices = @transform_4, window_bounds = array<i64: 128, 256>}, {pipeline_mode = #tpu.pipeline_mode<synchronous>, transform_indices = @transform_5, window_bounds = array<i64: 1, 256>}, {pipeline_mode = #tpu.pipeline_mode<synchronous>, transform_indices = @transform_6, window_bounds = array<i64: 64, 256>}, {pipeline_mode = #tpu.pipeline_mode<synchronous>, transform_indices = @transform_7, window_bounds = array<i64: 1, 64>}, {pipeline_mode = #tpu.pipeline_mode<synchronous>, transform_indices = @transform_8, window_bounds = array<i64: 1, 1>}, {transform_indices = @transform_9, window_bounds = array<i64: 8, 1>}]} {
    %c0 = arith.constant 0 : index
    %c0_0 = arith.constant 0 : index
    %0 = vector.load %arg2[%c0, %c0_0] : memref<2x512xf32, #tpu.memory_space<vmem>>, vector<1x512xf32>
    %1 = vector.shape_cast %0 : vector<1x512xf32> to vector<1x512xf32>
    %2 = vector.broadcast %1 : vector<1x512xf32> to vector<8x512xf32>
    %c1 = arith.constant 1 : index
    %c0_1 = arith.constant 0 : index
    %3 = vector.load %arg2[%c1, %c0_1] : memref<2x512xf32, #tpu.memory_space<vmem>>, vector<1x512xf32>
    %4 = vector.shape_cast %3 : vector<1x512xf32> to vector<1x512xf32>
    %5 = vector.broadcast %4 : vector<1x512xf32> to vector<8x512xf32>
    %c0_2 = arith.constant 0 : index
    %c0_3 = arith.constant 0 : index
    %6 = vector.load %arg3[%c0_2, %c0_3] : memref<1x512xf32, #tpu.memory_space<vmem>>, vector<1x512xf32>
    %7 = vector.shape_cast %6 : vector<1x512xf32> to vector<1x512xf32>
    %8 = vector.broadcast %7 : vector<1x512xf32> to vector<8x512xf32>
    %c0_4 = arith.constant 0 : index
    %c0_5 = arith.constant 0 : index
    %9 = vector.load %arg6[%c0_4, %c0_5] : memref<1x256xf32, #tpu.memory_space<vmem>>, vector<1x256xf32>
    %10 = vector.shape_cast %9 : vector<1x256xf32> to vector<1x256xf32>
    %11 = vector.broadcast %10 : vector<1x256xf32> to vector<8x256xf32>
    %cst = arith.constant 0.000000e+00 : f32
    %12 = vector.broadcast %cst : f32 to vector<8x128xf32>
    %cst_6 = arith.constant 0.000000e+00 : f32
    %13 = vector.broadcast %cst_6 : f32 to vector<8x128xf32>
    %cst_7 = arith.constant 0.000000e+00 : f32
    %14 = vector.broadcast %cst_7 : f32 to vector<8x64xf32>
    %cst_8 = arith.constant 0.000000e+00 : f32
    %15 = vector.broadcast %cst_8 : f32 to vector<8x64xf32>
    %c0_i32 = arith.constant 0 : i32
    %16 = arith.index_cast %c0_i32 : i32 to index
    %c0_9 = arith.constant 0 : index
    %c0_10 = arith.constant 0 : index
    %17 = vector.load %arg1[%16, %c0_9, %c0_10] : memref<8x8x2xf32, #tpu.memory_space<vmem>>, vector<1x8x2xf32>
    %18 = vector.shape_cast %17 : vector<1x8x2xf32> to vector<8x2xf32>
    %19 = vector.extract_strided_slice %18 {offsets = [0, 0], sizes = [8, 1], strides = [1, 1]} : vector<8x2xf32> to vector<8x1xf32>
    %20 = vector.broadcast %19 : vector<8x1xf32> to vector<8x512xf32>
    %21 = arith.mulf %20, %2 : vector<8x512xf32>
    %22 = vector.extract_strided_slice %18 {offsets = [0, 1], sizes = [8, 1], strides = [1, 1]} : vector<8x2xf32> to vector<8x1xf32>
    %23 = vector.broadcast %22 : vector<8x1xf32> to vector<8x512xf32>
    %24 = arith.mulf %23, %5 : vector<8x512xf32>
    %25 = arith.addf %21, %24 : vector<8x512xf32>
    %26 = arith.addf %25, %8 : vector<8x512xf32>
    %27 = arith.truncf %12 : vector<8x128xf32> to vector<8x128xbf16>
    %c0_11 = arith.constant 0 : index
    %c0_12 = arith.constant 0 : index
    %28 = vector.load %arg4[%c0_11, %c0_12] : memref<128x512xbf16, #tpu.memory_space<vmem>>, vector<128x512xbf16>
    %cst_13 = arith.constant dense<0.000000e+00> : vector<8x512xf32>
    %29 = tpu.matmul %27, %28, %cst_13 {dimension_numbers = #tpu.dot_dimension_numbers<[1], [0], [0], [1], [0, 0, 1, 1], [], []>} : vector<8x128xbf16>, vector<128x512xbf16>, vector<8x512xf32> -> vector<8x512xf32>
    %30 = arith.addf %26, %29 : vector<8x512xf32>
    %31 = vector.extract_strided_slice %30 {offsets = [0, 0], sizes = [8, 128], strides = [1, 1]} : vector<8x512xf32> to vector<8x128xf32>
    %32 = arith.negf %31 : vector<8x128xf32>
    %33 = math.exp %32 : vector<8x128xf32>
    %cst_14 = arith.constant 1.000000e+00 : f32
    %34 = vector.broadcast %cst_14 : f32 to vector<8x128xf32>
    %35 = arith.addf %34, %33 : vector<8x128xf32>
    %36 = arith.divf %34, %35 : vector<8x128xf32>
    %37 = vector.extract_strided_slice %30 {offsets = [0, 128], sizes = [8, 128], strides = [1, 1]} : vector<8x512xf32> to vector<8x128xf32>
    %38 = arith.negf %37 : vector<8x128xf32>
    %39 = math.exp %38 : vector<8x128xf32>
    %cst_15 = arith.constant 1.000000e+00 : f32
    %40 = vector.broadcast %cst_15 : f32 to vector<8x128xf32>
    %41 = arith.addf %40, %39 : vector<8x128xf32>
    %42 = arith.divf %40, %41 : vector<8x128xf32>
    %43 = vector.extract_strided_slice %30 {offsets = [0, 256], sizes = [8, 128], strides = [1, 1]} : vector<8x512xf32> to vector<8x128xf32>
    %44 = math.tanh %43 : vector<8x128xf32>
    %45 = vector.extract_strided_slice %30 {offsets = [0, 384], sizes = [8, 128], strides = [1, 1]} : vector<8x512xf32> to vector<8x128xf32>
    %46 = arith.negf %45 : vector<8x128xf32>
    %47 = math.exp %46 : vector<8x128xf32>
    %cst_16 = arith.constant 1.000000e+00 : f32
    %48 = vector.broadcast %cst_16 : f32 to vector<8x128xf32>
    %49 = arith.addf %48, %47 : vector<8x128xf32>
    %50 = arith.divf %48, %49 : vector<8x128xf32>
    %51 = arith.mulf %42, %13 : vector<8x128xf32>
    %52 = arith.mulf %36, %44 : vector<8x128xf32>
    %53 = arith.addf %51, %52 : vector<8x128xf32>
    %54 = math.tanh %53 : vector<8x128xf32>
    %55 = arith.mulf %50, %54 : vector<8x128xf32>
    %cst_17 = arith.constant 0.000000e+00 : f32
    %56 = vector.broadcast %cst_17 : f32 to vector<8x128xf32>
    %57 = arith.cmpf ogt, %55, %56 : vector<8x128xf32>
    %cst_18 = arith.constant 0.00999999977 : f32
    %58 = vector.broadcast %cst_18 : f32 to vector<8x128xf32>
    %59 = arith.mulf %58, %55 : vector<8x128xf32>
    %60 = arith.select %57, %55, %59 : vector<8x128xi1>, vector<8x128xf32>
    %61 = arith.truncf %60 : vector<8x128xf32> to vector<8x128xbf16>
    %c0_19 = arith.constant 0 : index
    %c0_20 = arith.constant 0 : index
    %62 = vector.load %arg5[%c0_19, %c0_20] : memref<128x256xbf16, #tpu.memory_space<vmem>>, vector<128x256xbf16>
    %cst_21 = arith.constant dense<0.000000e+00> : vector<8x256xf32>
    %63 = tpu.matmul %61, %62, %cst_21 {dimension_numbers = #tpu.dot_dimension_numbers<[1], [0], [0], [1], [0, 0, 1, 1], [], []>} : vector<8x128xbf16>, vector<128x256xbf16>, vector<8x256xf32> -> vector<8x256xf32>
    %64 = arith.addf %11, %63 : vector<8x256xf32>
    %65 = arith.truncf %14 : vector<8x64xf32> to vector<8x64xbf16>
    %c0_22 = arith.constant 0 : index
    %c0_23 = arith.constant 0 : index
    %66 = vector.load %arg7[%c0_22, %c0_23] : memref<64x256xbf16, #tpu.memory_space<vmem>>, vector<64x256xbf16>
    %cst_24 = arith.constant dense<0.000000e+00> : vector<8x256xf32>
    %67 = tpu.matmul %65, %66, %cst_24 {dimension_numbers = #tpu.dot_dimension_numbers<[1], [0], [0], [1], [0, 0, 1, 1], [], []>} : vector<8x64xbf16>, vector<64x256xbf16>, vector<8x256xf32> -> vector<8x256xf32>
    %68 = arith.addf %64, %67 : vector<8x256xf32>
    %69 = vector.extract_strided_slice %68 {offsets = [0, 0], sizes = [8, 64], strides = [1, 1]} : vector<8x256xf32> to vector<8x64xf32>
    %70 = arith.negf %69 : vector<8x64xf32>
    %71 = math.exp %70 : vector<8x64xf32>
    %cst_25 = arith.constant 1.000000e+00 : f32
    %72 = vector.broadcast %cst_25 : f32 to vector<8x64xf32>
    %73 = arith.addf %72, %71 : vector<8x64xf32>
    %74 = arith.divf %72, %73 : vector<8x64xf32>
    %75 = vector.extract_strided_slice %68 {offsets = [0, 64], sizes = [8, 64], strides = [1, 1]} : vector<8x256xf32> to vector<8x64xf32>
    %76 = arith.negf %75 : vector<8x64xf32>
    %77 = math.exp %76 : vector<8x64xf32>
    %cst_26 = arith.constant 1.000000e+00 : f32
    %78 = vector.broadcast %cst_26 : f32 to vector<8x64xf32>
    %79 = arith.addf %78, %77 : vector<8x64xf32>
    %80 = arith.divf %78, %79 : vector<8x64xf32>
    %81 = vector.extract_strided_slice %68 {offsets = [0, 128], sizes = [8, 64], strides = [1, 1]} : vector<8x256xf32> to vector<8x64xf32>
    %82 = math.tanh %81 : vector<8x64xf32>
    %83 = vector.extract_strided_slice %68 {offsets = [0, 192], sizes = [8, 64], strides = [1, 1]} : vector<8x256xf32> to vector<8x64xf32>
    %84 = arith.negf %83 : vector<8x64xf32>
    %85 = math.exp %84 : vector<8x64xf32>
    %cst_27 = arith.constant 1.000000e+00 : f32
    %86 = vector.broadcast %cst_27 : f32 to vector<8x64xf32>
    %87 = arith.addf %86, %85 : vector<8x64xf32>
    %88 = arith.divf %86, %87 : vector<8x64xf32>
    %89 = arith.mulf %80, %15 : vector<8x64xf32>
    %90 = arith.mulf %74, %82 : vector<8x64xf32>
    %91 = arith.addf %89, %90 : vector<8x64xf32>
    %92 = math.tanh %91 : vector<8x64xf32>
    %93 = arith.mulf %88, %92 : vector<8x64xf32>
    %c1_i32 = arith.constant 1 : i32
    %94 = arith.index_cast %c1_i32 : i32 to index
    %c0_28 = arith.constant 0 : index
    %c0_29 = arith.constant 0 : index
    %95 = vector.load %arg1[%94, %c0_28, %c0_29] : memref<8x8x2xf32, #tpu.memory_space<vmem>>, vector<1x8x2xf32>
    %96 = vector.shape_cast %95 : vector<1x8x2xf32> to vector<8x2xf32>
    %97 = vector.extract_strided_slice %96 {offsets = [0, 0], sizes = [8, 1], strides = [1, 1]} : vector<8x2xf32> to vector<8x1xf32>
    %98 = vector.broadcast %97 : vector<8x1xf32> to vector<8x512xf32>
    %99 = arith.mulf %98, %2 : vector<8x512xf32>
    %100 = vector.extract_strided_slice %96 {offsets = [0, 1], sizes = [8, 1], strides = [1, 1]} : vector<8x2xf32> to vector<8x1xf32>
    %101 = vector.broadcast %100 : vector<8x1xf32> to vector<8x512xf32>
    %102 = arith.mulf %101, %5 : vector<8x512xf32>
    %103 = arith.addf %99, %102 : vector<8x512xf32>
    %104 = arith.addf %103, %8 : vector<8x512xf32>
    %105 = arith.truncf %55 : vector<8x128xf32> to vector<8x128xbf16>
    %c0_30 = arith.constant 0 : index
    %c0_31 = arith.constant 0 : index
    %106 = vector.load %arg4[%c0_30, %c0_31] : memref<128x512xbf16, #tpu.memory_space<vmem>>, vector<128x512xbf16>
    %cst_32 = arith.constant dense<0.000000e+00> : vector<8x512xf32>
    %107 = tpu.matmul %105, %106, %cst_32 {dimension_numbers = #tpu.dot_dimension_numbers<[1], [0], [0], [1], [0, 0, 1, 1], [], []>} : vector<8x128xbf16>, vector<128x512xbf16>, vector<8x512xf32> -> vector<8x512xf32>
    %108 = arith.addf %104, %107 : vector<8x512xf32>
    %109 = vector.extract_strided_slice %108 {offsets = [0, 0], sizes = [8, 128], strides = [1, 1]} : vector<8x512xf32> to vector<8x128xf32>
    %110 = arith.negf %109 : vector<8x128xf32>
    %111 = math.exp %110 : vector<8x128xf32>
    %cst_33 = arith.constant 1.000000e+00 : f32
    %112 = vector.broadcast %cst_33 : f32 to vector<8x128xf32>
    %113 = arith.addf %112, %111 : vector<8x128xf32>
    %114 = arith.divf %112, %113 : vector<8x128xf32>
    %115 = vector.extract_strided_slice %108 {offsets = [0, 128], sizes = [8, 128], strides = [1, 1]} : vector<8x512xf32> to vector<8x128xf32>
    %116 = arith.negf %115 : vector<8x128xf32>
    %117 = math.exp %116 : vector<8x128xf32>
    %cst_34 = arith.constant 1.000000e+00 : f32
    %118 = vector.broadcast %cst_34 : f32 to vector<8x128xf32>
    %119 = arith.addf %118, %117 : vector<8x128xf32>
    %120 = arith.divf %118, %119 : vector<8x128xf32>
    %121 = vector.extract_strided_slice %108 {offsets = [0, 256], sizes = [8, 128], strides = [1, 1]} : vector<8x512xf32> to vector<8x128xf32>
    %122 = math.tanh %121 : vector<8x128xf32>
    %123 = vector.extract_strided_slice %108 {offsets = [0, 384], sizes = [8, 128], strides = [1, 1]} : vector<8x512xf32> to vector<8x128xf32>
    %124 = arith.negf %123 : vector<8x128xf32>
    %125 = math.exp %124 : vector<8x128xf32>
    %cst_35 = arith.constant 1.000000e+00 : f32
    %126 = vector.broadcast %cst_35 : f32 to vector<8x128xf32>
    %127 = arith.addf %126, %125 : vector<8x128xf32>
    %128 = arith.divf %126, %127 : vector<8x128xf32>
    %129 = arith.mulf %120, %53 : vector<8x128xf32>
    %130 = arith.mulf %114, %122 : vector<8x128xf32>
    %131 = arith.addf %129, %130 : vector<8x128xf32>
    %132 = math.tanh %131 : vector<8x128xf32>
    %133 = arith.mulf %128, %132 : vector<8x128xf32>
    %cst_36 = arith.constant 0.000000e+00 : f32
    %134 = vector.broadcast %cst_36 : f32 to vector<8x128xf32>
    %135 = arith.cmpf ogt, %133, %134 : vector<8x128xf32>
    %cst_37 = arith.constant 0.00999999977 : f32
    %136 = vector.broadcast %cst_37 : f32 to vector<8x128xf32>
    %137 = arith.mulf %136, %133 : vector<8x128xf32>
    %138 = arith.select %135, %133, %137 : vector<8x128xi1>, vector<8x128xf32>
    %139 = arith.truncf %138 : vector<8x128xf32> to vector<8x128xbf16>
    %c0_38 = arith.constant 0 : index
    %c0_39 = arith.constant 0 : index
    %140 = vector.load %arg5[%c0_38, %c0_39] : memref<128x256xbf16, #tpu.memory_space<vmem>>, vector<128x256xbf16>
    %cst_40 = arith.constant dense<0.000000e+00> : vector<8x256xf32>
    %141 = tpu.matmul %139, %140, %cst_40 {dimension_numbers = #tpu.dot_dimension_numbers<[1], [0], [0], [1], [0, 0, 1, 1], [], []>} : vector<8x128xbf16>, vector<128x256xbf16>, vector<8x256xf32> -> vector<8x256xf32>
    %142 = arith.addf %11, %141 : vector<8x256xf32>
    %143 = arith.truncf %93 : vector<8x64xf32> to vector<8x64xbf16>
    %c0_41 = arith.constant 0 : index
    %c0_42 = arith.constant 0 : index
    %144 = vector.load %arg7[%c0_41, %c0_42] : memref<64x256xbf16, #tpu.memory_space<vmem>>, vector<64x256xbf16>
    %cst_43 = arith.constant dense<0.000000e+00> : vector<8x256xf32>
    %145 = tpu.matmul %143, %144, %cst_43 {dimension_numbers = #tpu.dot_dimension_numbers<[1], [0], [0], [1], [0, 0, 1, 1], [], []>} : vector<8x64xbf16>, vector<64x256xbf16>, vector<8x256xf32> -> vector<8x256xf32>
    %146 = arith.addf %142, %145 : vector<8x256xf32>
    %147 = vector.extract_strided_slice %146 {offsets = [0, 0], sizes = [8, 64], strides = [1, 1]} : vector<8x256xf32> to vector<8x64xf32>
    %148 = arith.negf %147 : vector<8x64xf32>
    %149 = math.exp %148 : vector<8x64xf32>
    %cst_44 = arith.constant 1.000000e+00 : f32
    %150 = vector.broadcast %cst_44 : f32 to vector<8x64xf32>
    %151 = arith.addf %150, %149 : vector<8x64xf32>
    %152 = arith.divf %150, %151 : vector<8x64xf32>
    %153 = vector.extract_strided_slice %146 {offsets = [0, 64], sizes = [8, 64], strides = [1, 1]} : vector<8x256xf32> to vector<8x64xf32>
    %154 = arith.negf %153 : vector<8x64xf32>
    %155 = math.exp %154 : vector<8x64xf32>
    %cst_45 = arith.constant 1.000000e+00 : f32
    %156 = vector.broadcast %cst_45 : f32 to vector<8x64xf32>
    %157 = arith.addf %156, %155 : vector<8x64xf32>
    %158 = arith.divf %156, %157 : vector<8x64xf32>
    %159 = vector.extract_strided_slice %146 {offsets = [0, 128], sizes = [8, 64], strides = [1, 1]} : vector<8x256xf32> to vector<8x64xf32>
    %160 = math.tanh %159 : vector<8x64xf32>
    %161 = vector.extract_strided_slice %146 {offsets = [0, 192], sizes = [8, 64], strides = [1, 1]} : vector<8x256xf32> to vector<8x64xf32>
    %162 = arith.negf %161 : vector<8x64xf32>
    %163 = math.exp %162 : vector<8x64xf32>
    %cst_46 = arith.constant 1.000000e+00 : f32
    %164 = vector.broadcast %cst_46 : f32 to vector<8x64xf32>
    %165 = arith.addf %164, %163 : vector<8x64xf32>
    %166 = arith.divf %164, %165 : vector<8x64xf32>
    %167 = arith.mulf %158, %91 : vector<8x64xf32>
    %168 = arith.mulf %152, %160 : vector<8x64xf32>
    %169 = arith.addf %167, %168 : vector<8x64xf32>
    %170 = math.tanh %169 : vector<8x64xf32>
    %171 = arith.mulf %166, %170 : vector<8x64xf32>
    %c2_i32 = arith.constant 2 : i32
    %172 = arith.index_cast %c2_i32 : i32 to index
    %c0_47 = arith.constant 0 : index
    %c0_48 = arith.constant 0 : index
    %173 = vector.load %arg1[%172, %c0_47, %c0_48] : memref<8x8x2xf32, #tpu.memory_space<vmem>>, vector<1x8x2xf32>
    %174 = vector.shape_cast %173 : vector<1x8x2xf32> to vector<8x2xf32>
    %175 = vector.extract_strided_slice %174 {offsets = [0, 0], sizes = [8, 1], strides = [1, 1]} : vector<8x2xf32> to vector<8x1xf32>
    %176 = vector.broadcast %175 : vector<8x1xf32> to vector<8x512xf32>
    %177 = arith.mulf %176, %2 : vector<8x512xf32>
    %178 = vector.extract_strided_slice %174 {offsets = [0, 1], sizes = [8, 1], strides = [1, 1]} : vector<8x2xf32> to vector<8x1xf32>
    %179 = vector.broadcast %178 : vector<8x1xf32> to vector<8x512xf32>
    %180 = arith.mulf %179, %5 : vector<8x512xf32>
    %181 = arith.addf %177, %180 : vector<8x512xf32>
    %182 = arith.addf %181, %8 : vector<8x512xf32>
    %183 = arith.truncf %133 : vector<8x128xf32> to vector<8x128xbf16>
    %c0_49 = arith.constant 0 : index
    %c0_50 = arith.constant 0 : index
    %184 = vector.load %arg4[%c0_49, %c0_50] : memref<128x512xbf16, #tpu.memory_space<vmem>>, vector<128x512xbf16>
    %cst_51 = arith.constant dense<0.000000e+00> : vector<8x512xf32>
    %185 = tpu.matmul %183, %184, %cst_51 {dimension_numbers = #tpu.dot_dimension_numbers<[1], [0], [0], [1], [0, 0, 1, 1], [], []>} : vector<8x128xbf16>, vector<128x512xbf16>, vector<8x512xf32> -> vector<8x512xf32>
    %186 = arith.addf %182, %185 : vector<8x512xf32>
    %187 = vector.extract_strided_slice %186 {offsets = [0, 0], sizes = [8, 128], strides = [1, 1]} : vector<8x512xf32> to vector<8x128xf32>
    %188 = arith.negf %187 : vector<8x128xf32>
    %189 = math.exp %188 : vector<8x128xf32>
    %cst_52 = arith.constant 1.000000e+00 : f32
    %190 = vector.broadcast %cst_52 : f32 to vector<8x128xf32>
    %191 = arith.addf %190, %189 : vector<8x128xf32>
    %192 = arith.divf %190, %191 : vector<8x128xf32>
    %193 = vector.extract_strided_slice %186 {offsets = [0, 128], sizes = [8, 128], strides = [1, 1]} : vector<8x512xf32> to vector<8x128xf32>
    %194 = arith.negf %193 : vector<8x128xf32>
    %195 = math.exp %194 : vector<8x128xf32>
    %cst_53 = arith.constant 1.000000e+00 : f32
    %196 = vector.broadcast %cst_53 : f32 to vector<8x128xf32>
    %197 = arith.addf %196, %195 : vector<8x128xf32>
    %198 = arith.divf %196, %197 : vector<8x128xf32>
    %199 = vector.extract_strided_slice %186 {offsets = [0, 256], sizes = [8, 128], strides = [1, 1]} : vector<8x512xf32> to vector<8x128xf32>
    %200 = math.tanh %199 : vector<8x128xf32>
    %201 = vector.extract_strided_slice %186 {offsets = [0, 384], sizes = [8, 128], strides = [1, 1]} : vector<8x512xf32> to vector<8x128xf32>
    %202 = arith.negf %201 : vector<8x128xf32>
    %203 = math.exp %202 : vector<8x128xf32>
    %cst_54 = arith.constant 1.000000e+00 : f32
    %204 = vector.broadcast %cst_54 : f32 to vector<8x128xf32>
    %205 = arith.addf %204, %203 : vector<8x128xf32>
    %206 = arith.divf %204, %205 : vector<8x128xf32>
    %207 = arith.mulf %198, %131 : vector<8x128xf32>
    %208 = arith.mulf %192, %200 : vector<8x128xf32>
    %209 = arith.addf %207, %208 : vector<8x128xf32>
    %210 = math.tanh %209 : vector<8x128xf32>
    %211 = arith.mulf %206, %210 : vector<8x128xf32>
    %cst_55 = arith.constant 0.000000e+00 : f32
    %212 = vector.broadcast %cst_55 : f32 to vector<8x128xf32>
    %213 = arith.cmpf ogt, %211, %212 : vector<8x128xf32>
    %cst_56 = arith.constant 0.00999999977 : f32
    %214 = vector.broadcast %cst_56 : f32 to vector<8x128xf32>
    %215 = arith.mulf %214, %211 : vector<8x128xf32>
    %216 = arith.select %213, %211, %215 : vector<8x128xi1>, vector<8x128xf32>
    %217 = arith.truncf %216 : vector<8x128xf32> to vector<8x128xbf16>
    %c0_57 = arith.constant 0 : index
    %c0_58 = arith.constant 0 : index
    %218 = vector.load %arg5[%c0_57, %c0_58] : memref<128x256xbf16, #tpu.memory_space<vmem>>, vector<128x256xbf16>
    %cst_59 = arith.constant dense<0.000000e+00> : vector<8x256xf32>
    %219 = tpu.matmul %217, %218, %cst_59 {dimension_numbers = #tpu.dot_dimension_numbers<[1], [0], [0], [1], [0, 0, 1, 1], [], []>} : vector<8x128xbf16>, vector<128x256xbf16>, vector<8x256xf32> -> vector<8x256xf32>
    %220 = arith.addf %11, %219 : vector<8x256xf32>
    %221 = arith.truncf %171 : vector<8x64xf32> to vector<8x64xbf16>
    %c0_60 = arith.constant 0 : index
    %c0_61 = arith.constant 0 : index
    %222 = vector.load %arg7[%c0_60, %c0_61] : memref<64x256xbf16, #tpu.memory_space<vmem>>, vector<64x256xbf16>
    %cst_62 = arith.constant dense<0.000000e+00> : vector<8x256xf32>
    %223 = tpu.matmul %221, %222, %cst_62 {dimension_numbers = #tpu.dot_dimension_numbers<[1], [0], [0], [1], [0, 0, 1, 1], [], []>} : vector<8x64xbf16>, vector<64x256xbf16>, vector<8x256xf32> -> vector<8x256xf32>
    %224 = arith.addf %220, %223 : vector<8x256xf32>
    %225 = vector.extract_strided_slice %224 {offsets = [0, 0], sizes = [8, 64], strides = [1, 1]} : vector<8x256xf32> to vector<8x64xf32>
    %226 = arith.negf %225 : vector<8x64xf32>
    %227 = math.exp %226 : vector<8x64xf32>
    %cst_63 = arith.constant 1.000000e+00 : f32
    %228 = vector.broadcast %cst_63 : f32 to vector<8x64xf32>
    %229 = arith.addf %228, %227 : vector<8x64xf32>
    %230 = arith.divf %228, %229 : vector<8x64xf32>
    %231 = vector.extract_strided_slice %224 {offsets = [0, 64], sizes = [8, 64], strides = [1, 1]} : vector<8x256xf32> to vector<8x64xf32>
    %232 = arith.negf %231 : vector<8x64xf32>
    %233 = math.exp %232 : vector<8x64xf32>
    %cst_64 = arith.constant 1.000000e+00 : f32
    %234 = vector.broadcast %cst_64 : f32 to vector<8x64xf32>
    %235 = arith.addf %234, %233 : vector<8x64xf32>
    %236 = arith.divf %234, %235 : vector<8x64xf32>
    %237 = vector.extract_strided_slice %224 {offsets = [0, 128], sizes = [8, 64], strides = [1, 1]} : vector<8x256xf32> to vector<8x64xf32>
    %238 = math.tanh %237 : vector<8x64xf32>
    %239 = vector.extract_strided_slice %224 {offsets = [0, 192], sizes = [8, 64], strides = [1, 1]} : vector<8x256xf32> to vector<8x64xf32>
    %240 = arith.negf %239 : vector<8x64xf32>
    %241 = math.exp %240 : vector<8x64xf32>
    %cst_65 = arith.constant 1.000000e+00 : f32
    %242 = vector.broadcast %cst_65 : f32 to vector<8x64xf32>
    %243 = arith.addf %242, %241 : vector<8x64xf32>
    %244 = arith.divf %242, %243 : vector<8x64xf32>
    %245 = arith.mulf %236, %169 : vector<8x64xf32>
    %246 = arith.mulf %230, %238 : vector<8x64xf32>
    %247 = arith.addf %245, %246 : vector<8x64xf32>
    %248 = math.tanh %247 : vector<8x64xf32>
    %249 = arith.mulf %244, %248 : vector<8x64xf32>
    %c3_i32 = arith.constant 3 : i32
    %250 = arith.index_cast %c3_i32 : i32 to index
    %c0_66 = arith.constant 0 : index
    %c0_67 = arith.constant 0 : index
    %251 = vector.load %arg1[%250, %c0_66, %c0_67] : memref<8x8x2xf32, #tpu.memory_space<vmem>>, vector<1x8x2xf32>
    %252 = vector.shape_cast %251 : vector<1x8x2xf32> to vector<8x2xf32>
    %253 = vector.extract_strided_slice %252 {offsets = [0, 0], sizes = [8, 1], strides = [1, 1]} : vector<8x2xf32> to vector<8x1xf32>
    %254 = vector.broadcast %253 : vector<8x1xf32> to vector<8x512xf32>
    %255 = arith.mulf %254, %2 : vector<8x512xf32>
    %256 = vector.extract_strided_slice %252 {offsets = [0, 1], sizes = [8, 1], strides = [1, 1]} : vector<8x2xf32> to vector<8x1xf32>
    %257 = vector.broadcast %256 : vector<8x1xf32> to vector<8x512xf32>
    %258 = arith.mulf %257, %5 : vector<8x512xf32>
    %259 = arith.addf %255, %258 : vector<8x512xf32>
    %260 = arith.addf %259, %8 : vector<8x512xf32>
    %261 = arith.truncf %211 : vector<8x128xf32> to vector<8x128xbf16>
    %c0_68 = arith.constant 0 : index
    %c0_69 = arith.constant 0 : index
    %262 = vector.load %arg4[%c0_68, %c0_69] : memref<128x512xbf16, #tpu.memory_space<vmem>>, vector<128x512xbf16>
    %cst_70 = arith.constant dense<0.000000e+00> : vector<8x512xf32>
    %263 = tpu.matmul %261, %262, %cst_70 {dimension_numbers = #tpu.dot_dimension_numbers<[1], [0], [0], [1], [0, 0, 1, 1], [], []>} : vector<8x128xbf16>, vector<128x512xbf16>, vector<8x512xf32> -> vector<8x512xf32>
    %264 = arith.addf %260, %263 : vector<8x512xf32>
    %265 = vector.extract_strided_slice %264 {offsets = [0, 0], sizes = [8, 128], strides = [1, 1]} : vector<8x512xf32> to vector<8x128xf32>
    %266 = arith.negf %265 : vector<8x128xf32>
    %267 = math.exp %266 : vector<8x128xf32>
    %cst_71 = arith.constant 1.000000e+00 : f32
    %268 = vector.broadcast %cst_71 : f32 to vector<8x128xf32>
    %269 = arith.addf %268, %267 : vector<8x128xf32>
    %270 = arith.divf %268, %269 : vector<8x128xf32>
    %271 = vector.extract_strided_slice %264 {offsets = [0, 128], sizes = [8, 128], strides = [1, 1]} : vector<8x512xf32> to vector<8x128xf32>
    %272 = arith.negf %271 : vector<8x128xf32>
    %273 = math.exp %272 : vector<8x128xf32>
    %cst_72 = arith.constant 1.000000e+00 : f32
    %274 = vector.broadcast %cst_72 : f32 to vector<8x128xf32>
    %275 = arith.addf %274, %273 : vector<8x128xf32>
    %276 = arith.divf %274, %275 : vector<8x128xf32>
    %277 = vector.extract_strided_slice %264 {offsets = [0, 256], sizes = [8, 128], strides = [1, 1]} : vector<8x512xf32> to vector<8x128xf32>
    %278 = math.tanh %277 : vector<8x128xf32>
    %279 = vector.extract_strided_slice %264 {offsets = [0, 384], sizes = [8, 128], strides = [1, 1]} : vector<8x512xf32> to vector<8x128xf32>
    %280 = arith.negf %279 : vector<8x128xf32>
    %281 = math.exp %280 : vector<8x128xf32>
    %cst_73 = arith.constant 1.000000e+00 : f32
    %282 = vector.broadcast %cst_73 : f32 to vector<8x128xf32>
    %283 = arith.addf %282, %281 : vector<8x128xf32>
    %284 = arith.divf %282, %283 : vector<8x128xf32>
    %285 = arith.mulf %276, %209 : vector<8x128xf32>
    %286 = arith.mulf %270, %278 : vector<8x128xf32>
    %287 = arith.addf %285, %286 : vector<8x128xf32>
    %288 = math.tanh %287 : vector<8x128xf32>
    %289 = arith.mulf %284, %288 : vector<8x128xf32>
    %cst_74 = arith.constant 0.000000e+00 : f32
    %290 = vector.broadcast %cst_74 : f32 to vector<8x128xf32>
    %291 = arith.cmpf ogt, %289, %290 : vector<8x128xf32>
    %cst_75 = arith.constant 0.00999999977 : f32
    %292 = vector.broadcast %cst_75 : f32 to vector<8x128xf32>
    %293 = arith.mulf %292, %289 : vector<8x128xf32>
    %294 = arith.select %291, %289, %293 : vector<8x128xi1>, vector<8x128xf32>
    %295 = arith.truncf %294 : vector<8x128xf32> to vector<8x128xbf16>
    %c0_76 = arith.constant 0 : index
    %c0_77 = arith.constant 0 : index
    %296 = vector.load %arg5[%c0_76, %c0_77] : memref<128x256xbf16, #tpu.memory_space<vmem>>, vector<128x256xbf16>
    %cst_78 = arith.constant dense<0.000000e+00> : vector<8x256xf32>
    %297 = tpu.matmul %295, %296, %cst_78 {dimension_numbers = #tpu.dot_dimension_numbers<[1], [0], [0], [1], [0, 0, 1, 1], [], []>} : vector<8x128xbf16>, vector<128x256xbf16>, vector<8x256xf32> -> vector<8x256xf32>
    %298 = arith.addf %11, %297 : vector<8x256xf32>
    %299 = arith.truncf %249 : vector<8x64xf32> to vector<8x64xbf16>
    %c0_79 = arith.constant 0 : index
    %c0_80 = arith.constant 0 : index
    %300 = vector.load %arg7[%c0_79, %c0_80] : memref<64x256xbf16, #tpu.memory_space<vmem>>, vector<64x256xbf16>
    %cst_81 = arith.constant dense<0.000000e+00> : vector<8x256xf32>
    %301 = tpu.matmul %299, %300, %cst_81 {dimension_numbers = #tpu.dot_dimension_numbers<[1], [0], [0], [1], [0, 0, 1, 1], [], []>} : vector<8x64xbf16>, vector<64x256xbf16>, vector<8x256xf32> -> vector<8x256xf32>
    %302 = arith.addf %298, %301 : vector<8x256xf32>
    %303 = vector.extract_strided_slice %302 {offsets = [0, 0], sizes = [8, 64], strides = [1, 1]} : vector<8x256xf32> to vector<8x64xf32>
    %304 = arith.negf %303 : vector<8x64xf32>
    %305 = math.exp %304 : vector<8x64xf32>
    %cst_82 = arith.constant 1.000000e+00 : f32
    %306 = vector.broadcast %cst_82 : f32 to vector<8x64xf32>
    %307 = arith.addf %306, %305 : vector<8x64xf32>
    %308 = arith.divf %306, %307 : vector<8x64xf32>
    %309 = vector.extract_strided_slice %302 {offsets = [0, 64], sizes = [8, 64], strides = [1, 1]} : vector<8x256xf32> to vector<8x64xf32>
    %310 = arith.negf %309 : vector<8x64xf32>
    %311 = math.exp %310 : vector<8x64xf32>
    %cst_83 = arith.constant 1.000000e+00 : f32
    %312 = vector.broadcast %cst_83 : f32 to vector<8x64xf32>
    %313 = arith.addf %312, %311 : vector<8x64xf32>
    %314 = arith.divf %312, %313 : vector<8x64xf32>
    %315 = vector.extract_strided_slice %302 {offsets = [0, 128], sizes = [8, 64], strides = [1, 1]} : vector<8x256xf32> to vector<8x64xf32>
    %316 = math.tanh %315 : vector<8x64xf32>
    %317 = vector.extract_strided_slice %302 {offsets = [0, 192], sizes = [8, 64], strides = [1, 1]} : vector<8x256xf32> to vector<8x64xf32>
    %318 = arith.negf %317 : vector<8x64xf32>
    %319 = math.exp %318 : vector<8x64xf32>
    %cst_84 = arith.constant 1.000000e+00 : f32
    %320 = vector.broadcast %cst_84 : f32 to vector<8x64xf32>
    %321 = arith.addf %320, %319 : vector<8x64xf32>
    %322 = arith.divf %320, %321 : vector<8x64xf32>
    %323 = arith.mulf %314, %247 : vector<8x64xf32>
    %324 = arith.mulf %308, %316 : vector<8x64xf32>
    %325 = arith.addf %323, %324 : vector<8x64xf32>
    %326 = math.tanh %325 : vector<8x64xf32>
    %327 = arith.mulf %322, %326 : vector<8x64xf32>
    %c4_i32 = arith.constant 4 : i32
    %328 = arith.index_cast %c4_i32 : i32 to index
    %c0_85 = arith.constant 0 : index
    %c0_86 = arith.constant 0 : index
    %329 = vector.load %arg1[%328, %c0_85, %c0_86] : memref<8x8x2xf32, #tpu.memory_space<vmem>>, vector<1x8x2xf32>
    %330 = vector.shape_cast %329 : vector<1x8x2xf32> to vector<8x2xf32>
    %331 = vector.extract_strided_slice %330 {offsets = [0, 0], sizes = [8, 1], strides = [1, 1]} : vector<8x2xf32> to vector<8x1xf32>
    %332 = vector.broadcast %331 : vector<8x1xf32> to vector<8x512xf32>
    %333 = arith.mulf %332, %2 : vector<8x512xf32>
    %334 = vector.extract_strided_slice %330 {offsets = [0, 1], sizes = [8, 1], strides = [1, 1]} : vector<8x2xf32> to vector<8x1xf32>
    %335 = vector.broadcast %334 : vector<8x1xf32> to vector<8x512xf32>
    %336 = arith.mulf %335, %5 : vector<8x512xf32>
    %337 = arith.addf %333, %336 : vector<8x512xf32>
    %338 = arith.addf %337, %8 : vector<8x512xf32>
    %339 = arith.truncf %289 : vector<8x128xf32> to vector<8x128xbf16>
    %c0_87 = arith.constant 0 : index
    %c0_88 = arith.constant 0 : index
    %340 = vector.load %arg4[%c0_87, %c0_88] : memref<128x512xbf16, #tpu.memory_space<vmem>>, vector<128x512xbf16>
    %cst_89 = arith.constant dense<0.000000e+00> : vector<8x512xf32>
    %341 = tpu.matmul %339, %340, %cst_89 {dimension_numbers = #tpu.dot_dimension_numbers<[1], [0], [0], [1], [0, 0, 1, 1], [], []>} : vector<8x128xbf16>, vector<128x512xbf16>, vector<8x512xf32> -> vector<8x512xf32>
    %342 = arith.addf %338, %341 : vector<8x512xf32>
    %343 = vector.extract_strided_slice %342 {offsets = [0, 0], sizes = [8, 128], strides = [1, 1]} : vector<8x512xf32> to vector<8x128xf32>
    %344 = arith.negf %343 : vector<8x128xf32>
    %345 = math.exp %344 : vector<8x128xf32>
    %cst_90 = arith.constant 1.000000e+00 : f32
    %346 = vector.broadcast %cst_90 : f32 to vector<8x128xf32>
    %347 = arith.addf %346, %345 : vector<8x128xf32>
    %348 = arith.divf %346, %347 : vector<8x128xf32>
    %349 = vector.extract_strided_slice %342 {offsets = [0, 128], sizes = [8, 128], strides = [1, 1]} : vector<8x512xf32> to vector<8x128xf32>
    %350 = arith.negf %349 : vector<8x128xf32>
    %351 = math.exp %350 : vector<8x128xf32>
    %cst_91 = arith.constant 1.000000e+00 : f32
    %352 = vector.broadcast %cst_91 : f32 to vector<8x128xf32>
    %353 = arith.addf %352, %351 : vector<8x128xf32>
    %354 = arith.divf %352, %353 : vector<8x128xf32>
    %355 = vector.extract_strided_slice %342 {offsets = [0, 256], sizes = [8, 128], strides = [1, 1]} : vector<8x512xf32> to vector<8x128xf32>
    %356 = math.tanh %355 : vector<8x128xf32>
    %357 = vector.extract_strided_slice %342 {offsets = [0, 384], sizes = [8, 128], strides = [1, 1]} : vector<8x512xf32> to vector<8x128xf32>
    %358 = arith.negf %357 : vector<8x128xf32>
    %359 = math.exp %358 : vector<8x128xf32>
    %cst_92 = arith.constant 1.000000e+00 : f32
    %360 = vector.broadcast %cst_92 : f32 to vector<8x128xf32>
    %361 = arith.addf %360, %359 : vector<8x128xf32>
    %362 = arith.divf %360, %361 : vector<8x128xf32>
    %363 = arith.mulf %354, %287 : vector<8x128xf32>
    %364 = arith.mulf %348, %356 : vector<8x128xf32>
    %365 = arith.addf %363, %364 : vector<8x128xf32>
    %366 = math.tanh %365 : vector<8x128xf32>
    %367 = arith.mulf %362, %366 : vector<8x128xf32>
    %cst_93 = arith.constant 0.000000e+00 : f32
    %368 = vector.broadcast %cst_93 : f32 to vector<8x128xf32>
    %369 = arith.cmpf ogt, %367, %368 : vector<8x128xf32>
    %cst_94 = arith.constant 0.00999999977 : f32
    %370 = vector.broadcast %cst_94 : f32 to vector<8x128xf32>
    %371 = arith.mulf %370, %367 : vector<8x128xf32>
    %372 = arith.select %369, %367, %371 : vector<8x128xi1>, vector<8x128xf32>
    %373 = arith.truncf %372 : vector<8x128xf32> to vector<8x128xbf16>
    %c0_95 = arith.constant 0 : index
    %c0_96 = arith.constant 0 : index
    %374 = vector.load %arg5[%c0_95, %c0_96] : memref<128x256xbf16, #tpu.memory_space<vmem>>, vector<128x256xbf16>
    %cst_97 = arith.constant dense<0.000000e+00> : vector<8x256xf32>
    %375 = tpu.matmul %373, %374, %cst_97 {dimension_numbers = #tpu.dot_dimension_numbers<[1], [0], [0], [1], [0, 0, 1, 1], [], []>} : vector<8x128xbf16>, vector<128x256xbf16>, vector<8x256xf32> -> vector<8x256xf32>
    %376 = arith.addf %11, %375 : vector<8x256xf32>
    %377 = arith.truncf %327 : vector<8x64xf32> to vector<8x64xbf16>
    %c0_98 = arith.constant 0 : index
    %c0_99 = arith.constant 0 : index
    %378 = vector.load %arg7[%c0_98, %c0_99] : memref<64x256xbf16, #tpu.memory_space<vmem>>, vector<64x256xbf16>
    %cst_100 = arith.constant dense<0.000000e+00> : vector<8x256xf32>
    %379 = tpu.matmul %377, %378, %cst_100 {dimension_numbers = #tpu.dot_dimension_numbers<[1], [0], [0], [1], [0, 0, 1, 1], [], []>} : vector<8x64xbf16>, vector<64x256xbf16>, vector<8x256xf32> -> vector<8x256xf32>
    %380 = arith.addf %376, %379 : vector<8x256xf32>
    %381 = vector.extract_strided_slice %380 {offsets = [0, 0], sizes = [8, 64], strides = [1, 1]} : vector<8x256xf32> to vector<8x64xf32>
    %382 = arith.negf %381 : vector<8x64xf32>
    %383 = math.exp %382 : vector<8x64xf32>
    %cst_101 = arith.constant 1.000000e+00 : f32
    %384 = vector.broadcast %cst_101 : f32 to vector<8x64xf32>
    %385 = arith.addf %384, %383 : vector<8x64xf32>
    %386 = arith.divf %384, %385 : vector<8x64xf32>
    %387 = vector.extract_strided_slice %380 {offsets = [0, 64], sizes = [8, 64], strides = [1, 1]} : vector<8x256xf32> to vector<8x64xf32>
    %388 = arith.negf %387 : vector<8x64xf32>
    %389 = math.exp %388 : vector<8x64xf32>
    %cst_102 = arith.constant 1.000000e+00 : f32
    %390 = vector.broadcast %cst_102 : f32 to vector<8x64xf32>
    %391 = arith.addf %390, %389 : vector<8x64xf32>
    %392 = arith.divf %390, %391 : vector<8x64xf32>
    %393 = vector.extract_strided_slice %380 {offsets = [0, 128], sizes = [8, 64], strides = [1, 1]} : vector<8x256xf32> to vector<8x64xf32>
    %394 = math.tanh %393 : vector<8x64xf32>
    %395 = vector.extract_strided_slice %380 {offsets = [0, 192], sizes = [8, 64], strides = [1, 1]} : vector<8x256xf32> to vector<8x64xf32>
    %396 = arith.negf %395 : vector<8x64xf32>
    %397 = math.exp %396 : vector<8x64xf32>
    %cst_103 = arith.constant 1.000000e+00 : f32
    %398 = vector.broadcast %cst_103 : f32 to vector<8x64xf32>
    %399 = arith.addf %398, %397 : vector<8x64xf32>
    %400 = arith.divf %398, %399 : vector<8x64xf32>
    %401 = arith.mulf %392, %325 : vector<8x64xf32>
    %402 = arith.mulf %386, %394 : vector<8x64xf32>
    %403 = arith.addf %401, %402 : vector<8x64xf32>
    %404 = math.tanh %403 : vector<8x64xf32>
    %405 = arith.mulf %400, %404 : vector<8x64xf32>
    %c5_i32 = arith.constant 5 : i32
    %406 = arith.index_cast %c5_i32 : i32 to index
    %c0_104 = arith.constant 0 : index
    %c0_105 = arith.constant 0 : index
    %407 = vector.load %arg1[%406, %c0_104, %c0_105] : memref<8x8x2xf32, #tpu.memory_space<vmem>>, vector<1x8x2xf32>
    %408 = vector.shape_cast %407 : vector<1x8x2xf32> to vector<8x2xf32>
    %409 = vector.extract_strided_slice %408 {offsets = [0, 0], sizes = [8, 1], strides = [1, 1]} : vector<8x2xf32> to vector<8x1xf32>
    %410 = vector.broadcast %409 : vector<8x1xf32> to vector<8x512xf32>
    %411 = arith.mulf %410, %2 : vector<8x512xf32>
    %412 = vector.extract_strided_slice %408 {offsets = [0, 1], sizes = [8, 1], strides = [1, 1]} : vector<8x2xf32> to vector<8x1xf32>
    %413 = vector.broadcast %412 : vector<8x1xf32> to vector<8x512xf32>
    %414 = arith.mulf %413, %5 : vector<8x512xf32>
    %415 = arith.addf %411, %414 : vector<8x512xf32>
    %416 = arith.addf %415, %8 : vector<8x512xf32>
    %417 = arith.truncf %367 : vector<8x128xf32> to vector<8x128xbf16>
    %c0_106 = arith.constant 0 : index
    %c0_107 = arith.constant 0 : index
    %418 = vector.load %arg4[%c0_106, %c0_107] : memref<128x512xbf16, #tpu.memory_space<vmem>>, vector<128x512xbf16>
    %cst_108 = arith.constant dense<0.000000e+00> : vector<8x512xf32>
    %419 = tpu.matmul %417, %418, %cst_108 {dimension_numbers = #tpu.dot_dimension_numbers<[1], [0], [0], [1], [0, 0, 1, 1], [], []>} : vector<8x128xbf16>, vector<128x512xbf16>, vector<8x512xf32> -> vector<8x512xf32>
    %420 = arith.addf %416, %419 : vector<8x512xf32>
    %421 = vector.extract_strided_slice %420 {offsets = [0, 0], sizes = [8, 128], strides = [1, 1]} : vector<8x512xf32> to vector<8x128xf32>
    %422 = arith.negf %421 : vector<8x128xf32>
    %423 = math.exp %422 : vector<8x128xf32>
    %cst_109 = arith.constant 1.000000e+00 : f32
    %424 = vector.broadcast %cst_109 : f32 to vector<8x128xf32>
    %425 = arith.addf %424, %423 : vector<8x128xf32>
    %426 = arith.divf %424, %425 : vector<8x128xf32>
    %427 = vector.extract_strided_slice %420 {offsets = [0, 128], sizes = [8, 128], strides = [1, 1]} : vector<8x512xf32> to vector<8x128xf32>
    %428 = arith.negf %427 : vector<8x128xf32>
    %429 = math.exp %428 : vector<8x128xf32>
    %cst_110 = arith.constant 1.000000e+00 : f32
    %430 = vector.broadcast %cst_110 : f32 to vector<8x128xf32>
    %431 = arith.addf %430, %429 : vector<8x128xf32>
    %432 = arith.divf %430, %431 : vector<8x128xf32>
    %433 = vector.extract_strided_slice %420 {offsets = [0, 256], sizes = [8, 128], strides = [1, 1]} : vector<8x512xf32> to vector<8x128xf32>
    %434 = math.tanh %433 : vector<8x128xf32>
    %435 = vector.extract_strided_slice %420 {offsets = [0, 384], sizes = [8, 128], strides = [1, 1]} : vector<8x512xf32> to vector<8x128xf32>
    %436 = arith.negf %435 : vector<8x128xf32>
    %437 = math.exp %436 : vector<8x128xf32>
    %cst_111 = arith.constant 1.000000e+00 : f32
    %438 = vector.broadcast %cst_111 : f32 to vector<8x128xf32>
    %439 = arith.addf %438, %437 : vector<8x128xf32>
    %440 = arith.divf %438, %439 : vector<8x128xf32>
    %441 = arith.mulf %432, %365 : vector<8x128xf32>
    %442 = arith.mulf %426, %434 : vector<8x128xf32>
    %443 = arith.addf %441, %442 : vector<8x128xf32>
    %444 = math.tanh %443 : vector<8x128xf32>
    %445 = arith.mulf %440, %444 : vector<8x128xf32>
    %cst_112 = arith.constant 0.000000e+00 : f32
    %446 = vector.broadcast %cst_112 : f32 to vector<8x128xf32>
    %447 = arith.cmpf ogt, %445, %446 : vector<8x128xf32>
    %cst_113 = arith.constant 0.00999999977 : f32
    %448 = vector.broadcast %cst_113 : f32 to vector<8x128xf32>
    %449 = arith.mulf %448, %445 : vector<8x128xf32>
    %450 = arith.select %447, %445, %449 : vector<8x128xi1>, vector<8x128xf32>
    %451 = arith.truncf %450 : vector<8x128xf32> to vector<8x128xbf16>
    %c0_114 = arith.constant 0 : index
    %c0_115 = arith.constant 0 : index
    %452 = vector.load %arg5[%c0_114, %c0_115] : memref<128x256xbf16, #tpu.memory_space<vmem>>, vector<128x256xbf16>
    %cst_116 = arith.constant dense<0.000000e+00> : vector<8x256xf32>
    %453 = tpu.matmul %451, %452, %cst_116 {dimension_numbers = #tpu.dot_dimension_numbers<[1], [0], [0], [1], [0, 0, 1, 1], [], []>} : vector<8x128xbf16>, vector<128x256xbf16>, vector<8x256xf32> -> vector<8x256xf32>
    %454 = arith.addf %11, %453 : vector<8x256xf32>
    %455 = arith.truncf %405 : vector<8x64xf32> to vector<8x64xbf16>
    %c0_117 = arith.constant 0 : index
    %c0_118 = arith.constant 0 : index
    %456 = vector.load %arg7[%c0_117, %c0_118] : memref<64x256xbf16, #tpu.memory_space<vmem>>, vector<64x256xbf16>
    %cst_119 = arith.constant dense<0.000000e+00> : vector<8x256xf32>
    %457 = tpu.matmul %455, %456, %cst_119 {dimension_numbers = #tpu.dot_dimension_numbers<[1], [0], [0], [1], [0, 0, 1, 1], [], []>} : vector<8x64xbf16>, vector<64x256xbf16>, vector<8x256xf32> -> vector<8x256xf32>
    %458 = arith.addf %454, %457 : vector<8x256xf32>
    %459 = vector.extract_strided_slice %458 {offsets = [0, 0], sizes = [8, 64], strides = [1, 1]} : vector<8x256xf32> to vector<8x64xf32>
    %460 = arith.negf %459 : vector<8x64xf32>
    %461 = math.exp %460 : vector<8x64xf32>
    %cst_120 = arith.constant 1.000000e+00 : f32
    %462 = vector.broadcast %cst_120 : f32 to vector<8x64xf32>
    %463 = arith.addf %462, %461 : vector<8x64xf32>
    %464 = arith.divf %462, %463 : vector<8x64xf32>
    %465 = vector.extract_strided_slice %458 {offsets = [0, 64], sizes = [8, 64], strides = [1, 1]} : vector<8x256xf32> to vector<8x64xf32>
    %466 = arith.negf %465 : vector<8x64xf32>
    %467 = math.exp %466 : vector<8x64xf32>
    %cst_121 = arith.constant 1.000000e+00 : f32
    %468 = vector.broadcast %cst_121 : f32 to vector<8x64xf32>
    %469 = arith.addf %468, %467 : vector<8x64xf32>
    %470 = arith.divf %468, %469 : vector<8x64xf32>
    %471 = vector.extract_strided_slice %458 {offsets = [0, 128], sizes = [8, 64], strides = [1, 1]} : vector<8x256xf32> to vector<8x64xf32>
    %472 = math.tanh %471 : vector<8x64xf32>
    %473 = vector.extract_strided_slice %458 {offsets = [0, 192], sizes = [8, 64], strides = [1, 1]} : vector<8x256xf32> to vector<8x64xf32>
    %474 = arith.negf %473 : vector<8x64xf32>
    %475 = math.exp %474 : vector<8x64xf32>
    %cst_122 = arith.constant 1.000000e+00 : f32
    %476 = vector.broadcast %cst_122 : f32 to vector<8x64xf32>
    %477 = arith.addf %476, %475 : vector<8x64xf32>
    %478 = arith.divf %476, %477 : vector<8x64xf32>
    %479 = arith.mulf %470, %403 : vector<8x64xf32>
    %480 = arith.mulf %464, %472 : vector<8x64xf32>
    %481 = arith.addf %479, %480 : vector<8x64xf32>
    %482 = math.tanh %481 : vector<8x64xf32>
    %483 = arith.mulf %478, %482 : vector<8x64xf32>
    %c6_i32 = arith.constant 6 : i32
    %484 = arith.index_cast %c6_i32 : i32 to index
    %c0_123 = arith.constant 0 : index
    %c0_124 = arith.constant 0 : index
    %485 = vector.load %arg1[%484, %c0_123, %c0_124] : memref<8x8x2xf32, #tpu.memory_space<vmem>>, vector<1x8x2xf32>
    %486 = vector.shape_cast %485 : vector<1x8x2xf32> to vector<8x2xf32>
    %487 = vector.extract_strided_slice %486 {offsets = [0, 0], sizes = [8, 1], strides = [1, 1]} : vector<8x2xf32> to vector<8x1xf32>
    %488 = vector.broadcast %487 : vector<8x1xf32> to vector<8x512xf32>
    %489 = arith.mulf %488, %2 : vector<8x512xf32>
    %490 = vector.extract_strided_slice %486 {offsets = [0, 1], sizes = [8, 1], strides = [1, 1]} : vector<8x2xf32> to vector<8x1xf32>
    %491 = vector.broadcast %490 : vector<8x1xf32> to vector<8x512xf32>
    %492 = arith.mulf %491, %5 : vector<8x512xf32>
    %493 = arith.addf %489, %492 : vector<8x512xf32>
    %494 = arith.addf %493, %8 : vector<8x512xf32>
    %495 = arith.truncf %445 : vector<8x128xf32> to vector<8x128xbf16>
    %c0_125 = arith.constant 0 : index
    %c0_126 = arith.constant 0 : index
    %496 = vector.load %arg4[%c0_125, %c0_126] : memref<128x512xbf16, #tpu.memory_space<vmem>>, vector<128x512xbf16>
    %cst_127 = arith.constant dense<0.000000e+00> : vector<8x512xf32>
    %497 = tpu.matmul %495, %496, %cst_127 {dimension_numbers = #tpu.dot_dimension_numbers<[1], [0], [0], [1], [0, 0, 1, 1], [], []>} : vector<8x128xbf16>, vector<128x512xbf16>, vector<8x512xf32> -> vector<8x512xf32>
    %498 = arith.addf %494, %497 : vector<8x512xf32>
    %499 = vector.extract_strided_slice %498 {offsets = [0, 0], sizes = [8, 128], strides = [1, 1]} : vector<8x512xf32> to vector<8x128xf32>
    %500 = arith.negf %499 : vector<8x128xf32>
    %501 = math.exp %500 : vector<8x128xf32>
    %cst_128 = arith.constant 1.000000e+00 : f32
    %502 = vector.broadcast %cst_128 : f32 to vector<8x128xf32>
    %503 = arith.addf %502, %501 : vector<8x128xf32>
    %504 = arith.divf %502, %503 : vector<8x128xf32>
    %505 = vector.extract_strided_slice %498 {offsets = [0, 128], sizes = [8, 128], strides = [1, 1]} : vector<8x512xf32> to vector<8x128xf32>
    %506 = arith.negf %505 : vector<8x128xf32>
    %507 = math.exp %506 : vector<8x128xf32>
    %cst_129 = arith.constant 1.000000e+00 : f32
    %508 = vector.broadcast %cst_129 : f32 to vector<8x128xf32>
    %509 = arith.addf %508, %507 : vector<8x128xf32>
    %510 = arith.divf %508, %509 : vector<8x128xf32>
    %511 = vector.extract_strided_slice %498 {offsets = [0, 256], sizes = [8, 128], strides = [1, 1]} : vector<8x512xf32> to vector<8x128xf32>
    %512 = math.tanh %511 : vector<8x128xf32>
    %513 = vector.extract_strided_slice %498 {offsets = [0, 384], sizes = [8, 128], strides = [1, 1]} : vector<8x512xf32> to vector<8x128xf32>
    %514 = arith.negf %513 : vector<8x128xf32>
    %515 = math.exp %514 : vector<8x128xf32>
    %cst_130 = arith.constant 1.000000e+00 : f32
    %516 = vector.broadcast %cst_130 : f32 to vector<8x128xf32>
    %517 = arith.addf %516, %515 : vector<8x128xf32>
    %518 = arith.divf %516, %517 : vector<8x128xf32>
    %519 = arith.mulf %510, %443 : vector<8x128xf32>
    %520 = arith.mulf %504, %512 : vector<8x128xf32>
    %521 = arith.addf %519, %520 : vector<8x128xf32>
    %522 = math.tanh %521 : vector<8x128xf32>
    %523 = arith.mulf %518, %522 : vector<8x128xf32>
    %cst_131 = arith.constant 0.000000e+00 : f32
    %524 = vector.broadcast %cst_131 : f32 to vector<8x128xf32>
    %525 = arith.cmpf ogt, %523, %524 : vector<8x128xf32>
    %cst_132 = arith.constant 0.00999999977 : f32
    %526 = vector.broadcast %cst_132 : f32 to vector<8x128xf32>
    %527 = arith.mulf %526, %523 : vector<8x128xf32>
    %528 = arith.select %525, %523, %527 : vector<8x128xi1>, vector<8x128xf32>
    %529 = arith.truncf %528 : vector<8x128xf32> to vector<8x128xbf16>
    %c0_133 = arith.constant 0 : index
    %c0_134 = arith.constant 0 : index
    %530 = vector.load %arg5[%c0_133, %c0_134] : memref<128x256xbf16, #tpu.memory_space<vmem>>, vector<128x256xbf16>
    %cst_135 = arith.constant dense<0.000000e+00> : vector<8x256xf32>
    %531 = tpu.matmul %529, %530, %cst_135 {dimension_numbers = #tpu.dot_dimension_numbers<[1], [0], [0], [1], [0, 0, 1, 1], [], []>} : vector<8x128xbf16>, vector<128x256xbf16>, vector<8x256xf32> -> vector<8x256xf32>
    %532 = arith.addf %11, %531 : vector<8x256xf32>
    %533 = arith.truncf %483 : vector<8x64xf32> to vector<8x64xbf16>
    %c0_136 = arith.constant 0 : index
    %c0_137 = arith.constant 0 : index
    %534 = vector.load %arg7[%c0_136, %c0_137] : memref<64x256xbf16, #tpu.memory_space<vmem>>, vector<64x256xbf16>
    %cst_138 = arith.constant dense<0.000000e+00> : vector<8x256xf32>
    %535 = tpu.matmul %533, %534, %cst_138 {dimension_numbers = #tpu.dot_dimension_numbers<[1], [0], [0], [1], [0, 0, 1, 1], [], []>} : vector<8x64xbf16>, vector<64x256xbf16>, vector<8x256xf32> -> vector<8x256xf32>
    %536 = arith.addf %532, %535 : vector<8x256xf32>
    %537 = vector.extract_strided_slice %536 {offsets = [0, 0], sizes = [8, 64], strides = [1, 1]} : vector<8x256xf32> to vector<8x64xf32>
    %538 = arith.negf %537 : vector<8x64xf32>
    %539 = math.exp %538 : vector<8x64xf32>
    %cst_139 = arith.constant 1.000000e+00 : f32
    %540 = vector.broadcast %cst_139 : f32 to vector<8x64xf32>
    %541 = arith.addf %540, %539 : vector<8x64xf32>
    %542 = arith.divf %540, %541 : vector<8x64xf32>
    %543 = vector.extract_strided_slice %536 {offsets = [0, 64], sizes = [8, 64], strides = [1, 1]} : vector<8x256xf32> to vector<8x64xf32>
    %544 = arith.negf %543 : vector<8x64xf32>
    %545 = math.exp %544 : vector<8x64xf32>
    %cst_140 = arith.constant 1.000000e+00 : f32
    %546 = vector.broadcast %cst_140 : f32 to vector<8x64xf32>
    %547 = arith.addf %546, %545 : vector<8x64xf32>
    %548 = arith.divf %546, %547 : vector<8x64xf32>
    %549 = vector.extract_strided_slice %536 {offsets = [0, 128], sizes = [8, 64], strides = [1, 1]} : vector<8x256xf32> to vector<8x64xf32>
    %550 = math.tanh %549 : vector<8x64xf32>
    %551 = vector.extract_strided_slice %536 {offsets = [0, 192], sizes = [8, 64], strides = [1, 1]} : vector<8x256xf32> to vector<8x64xf32>
    %552 = arith.negf %551 : vector<8x64xf32>
    %553 = math.exp %552 : vector<8x64xf32>
    %cst_141 = arith.constant 1.000000e+00 : f32
    %554 = vector.broadcast %cst_141 : f32 to vector<8x64xf32>
    %555 = arith.addf %554, %553 : vector<8x64xf32>
    %556 = arith.divf %554, %555 : vector<8x64xf32>
    %557 = arith.mulf %548, %481 : vector<8x64xf32>
    %558 = arith.mulf %542, %550 : vector<8x64xf32>
    %559 = arith.addf %557, %558 : vector<8x64xf32>
    %560 = math.tanh %559 : vector<8x64xf32>
    %561 = arith.mulf %556, %560 : vector<8x64xf32>
    %c7_i32 = arith.constant 7 : i32
    %562 = arith.index_cast %c7_i32 : i32 to index
    %c0_142 = arith.constant 0 : index
    %c0_143 = arith.constant 0 : index
    %563 = vector.load %arg1[%562, %c0_142, %c0_143] : memref<8x8x2xf32, #tpu.memory_space<vmem>>, vector<1x8x2xf32>
    %564 = vector.shape_cast %563 : vector<1x8x2xf32> to vector<8x2xf32>
    %565 = vector.extract_strided_slice %564 {offsets = [0, 0], sizes = [8, 1], strides = [1, 1]} : vector<8x2xf32> to vector<8x1xf32>
    %566 = vector.broadcast %565 : vector<8x1xf32> to vector<8x512xf32>
    %567 = arith.mulf %566, %2 : vector<8x512xf32>
    %568 = vector.extract_strided_slice %564 {offsets = [0, 1], sizes = [8, 1], strides = [1, 1]} : vector<8x2xf32> to vector<8x1xf32>
    %569 = vector.broadcast %568 : vector<8x1xf32> to vector<8x512xf32>
    %570 = arith.mulf %569, %5 : vector<8x512xf32>
    %571 = arith.addf %567, %570 : vector<8x512xf32>
    %572 = arith.addf %571, %8 : vector<8x512xf32>
    %573 = arith.truncf %523 : vector<8x128xf32> to vector<8x128xbf16>
    %c0_144 = arith.constant 0 : index
    %c0_145 = arith.constant 0 : index
    %574 = vector.load %arg4[%c0_144, %c0_145] : memref<128x512xbf16, #tpu.memory_space<vmem>>, vector<128x512xbf16>
    %cst_146 = arith.constant dense<0.000000e+00> : vector<8x512xf32>
    %575 = tpu.matmul %573, %574, %cst_146 {dimension_numbers = #tpu.dot_dimension_numbers<[1], [0], [0], [1], [0, 0, 1, 1], [], []>} : vector<8x128xbf16>, vector<128x512xbf16>, vector<8x512xf32> -> vector<8x512xf32>
    %576 = arith.addf %572, %575 : vector<8x512xf32>
    %577 = vector.extract_strided_slice %576 {offsets = [0, 0], sizes = [8, 128], strides = [1, 1]} : vector<8x512xf32> to vector<8x128xf32>
    %578 = arith.negf %577 : vector<8x128xf32>
    %579 = math.exp %578 : vector<8x128xf32>
    %cst_147 = arith.constant 1.000000e+00 : f32
    %580 = vector.broadcast %cst_147 : f32 to vector<8x128xf32>
    %581 = arith.addf %580, %579 : vector<8x128xf32>
    %582 = arith.divf %580, %581 : vector<8x128xf32>
    %583 = vector.extract_strided_slice %576 {offsets = [0, 128], sizes = [8, 128], strides = [1, 1]} : vector<8x512xf32> to vector<8x128xf32>
    %584 = arith.negf %583 : vector<8x128xf32>
    %585 = math.exp %584 : vector<8x128xf32>
    %cst_148 = arith.constant 1.000000e+00 : f32
    %586 = vector.broadcast %cst_148 : f32 to vector<8x128xf32>
    %587 = arith.addf %586, %585 : vector<8x128xf32>
    %588 = arith.divf %586, %587 : vector<8x128xf32>
    %589 = vector.extract_strided_slice %576 {offsets = [0, 256], sizes = [8, 128], strides = [1, 1]} : vector<8x512xf32> to vector<8x128xf32>
    %590 = math.tanh %589 : vector<8x128xf32>
    %591 = vector.extract_strided_slice %576 {offsets = [0, 384], sizes = [8, 128], strides = [1, 1]} : vector<8x512xf32> to vector<8x128xf32>
    %592 = arith.negf %591 : vector<8x128xf32>
    %593 = math.exp %592 : vector<8x128xf32>
    %cst_149 = arith.constant 1.000000e+00 : f32
    %594 = vector.broadcast %cst_149 : f32 to vector<8x128xf32>
    %595 = arith.addf %594, %593 : vector<8x128xf32>
    %596 = arith.divf %594, %595 : vector<8x128xf32>
    %597 = arith.mulf %588, %521 : vector<8x128xf32>
    %598 = arith.mulf %582, %590 : vector<8x128xf32>
    %599 = arith.addf %597, %598 : vector<8x128xf32>
    %600 = math.tanh %599 : vector<8x128xf32>
    %601 = arith.mulf %596, %600 : vector<8x128xf32>
    %cst_150 = arith.constant 0.000000e+00 : f32
    %602 = vector.broadcast %cst_150 : f32 to vector<8x128xf32>
    %603 = arith.cmpf ogt, %601, %602 : vector<8x128xf32>
    %cst_151 = arith.constant 0.00999999977 : f32
    %604 = vector.broadcast %cst_151 : f32 to vector<8x128xf32>
    %605 = arith.mulf %604, %601 : vector<8x128xf32>
    %606 = arith.select %603, %601, %605 : vector<8x128xi1>, vector<8x128xf32>
    %607 = arith.truncf %606 : vector<8x128xf32> to vector<8x128xbf16>
    %c0_152 = arith.constant 0 : index
    %c0_153 = arith.constant 0 : index
    %608 = vector.load %arg5[%c0_152, %c0_153] : memref<128x256xbf16, #tpu.memory_space<vmem>>, vector<128x256xbf16>
    %cst_154 = arith.constant dense<0.000000e+00> : vector<8x256xf32>
    %609 = tpu.matmul %607, %608, %cst_154 {dimension_numbers = #tpu.dot_dimension_numbers<[1], [0], [0], [1], [0, 0, 1, 1], [], []>} : vector<8x128xbf16>, vector<128x256xbf16>, vector<8x256xf32> -> vector<8x256xf32>
    %610 = arith.addf %11, %609 : vector<8x256xf32>
    %611 = arith.truncf %561 : vector<8x64xf32> to vector<8x64xbf16>
    %c0_155 = arith.constant 0 : index
    %c0_156 = arith.constant 0 : index
    %612 = vector.load %arg7[%c0_155, %c0_156] : memref<64x256xbf16, #tpu.memory_space<vmem>>, vector<64x256xbf16>
    %cst_157 = arith.constant dense<0.000000e+00> : vector<8x256xf32>
    %613 = tpu.matmul %611, %612, %cst_157 {dimension_numbers = #tpu.dot_dimension_numbers<[1], [0], [0], [1], [0, 0, 1, 1], [], []>} : vector<8x64xbf16>, vector<64x256xbf16>, vector<8x256xf32> -> vector<8x256xf32>
    %614 = arith.addf %610, %613 : vector<8x256xf32>
    %615 = vector.extract_strided_slice %614 {offsets = [0, 0], sizes = [8, 64], strides = [1, 1]} : vector<8x256xf32> to vector<8x64xf32>
    %616 = arith.negf %615 : vector<8x64xf32>
    %617 = math.exp %616 : vector<8x64xf32>
    %cst_158 = arith.constant 1.000000e+00 : f32
    %618 = vector.broadcast %cst_158 : f32 to vector<8x64xf32>
    %619 = arith.addf %618, %617 : vector<8x64xf32>
    %620 = arith.divf %618, %619 : vector<8x64xf32>
    %621 = vector.extract_strided_slice %614 {offsets = [0, 64], sizes = [8, 64], strides = [1, 1]} : vector<8x256xf32> to vector<8x64xf32>
    %622 = arith.negf %621 : vector<8x64xf32>
    %623 = math.exp %622 : vector<8x64xf32>
    %cst_159 = arith.constant 1.000000e+00 : f32
    %624 = vector.broadcast %cst_159 : f32 to vector<8x64xf32>
    %625 = arith.addf %624, %623 : vector<8x64xf32>
    %626 = arith.divf %624, %625 : vector<8x64xf32>
    %627 = vector.extract_strided_slice %614 {offsets = [0, 128], sizes = [8, 64], strides = [1, 1]} : vector<8x256xf32> to vector<8x64xf32>
    %628 = math.tanh %627 : vector<8x64xf32>
    %629 = vector.extract_strided_slice %614 {offsets = [0, 192], sizes = [8, 64], strides = [1, 1]} : vector<8x256xf32> to vector<8x64xf32>
    %630 = arith.negf %629 : vector<8x64xf32>
    %631 = math.exp %630 : vector<8x64xf32>
    %cst_160 = arith.constant 1.000000e+00 : f32
    %632 = vector.broadcast %cst_160 : f32 to vector<8x64xf32>
    %633 = arith.addf %632, %631 : vector<8x64xf32>
    %634 = arith.divf %632, %633 : vector<8x64xf32>
    %635 = arith.mulf %626, %559 : vector<8x64xf32>
    %636 = arith.mulf %620, %628 : vector<8x64xf32>
    %637 = arith.addf %635, %636 : vector<8x64xf32>
    %638 = math.tanh %637 : vector<8x64xf32>
    %639 = arith.mulf %634, %638 : vector<8x64xf32>
    %c8_i32 = arith.constant 8 : i32
    %cst_161 = arith.constant 0.000000e+00 : f32
    %640 = vector.broadcast %cst_161 : f32 to vector<8x64xf32>
    %641 = arith.cmpf ogt, %639, %640 : vector<8x64xf32>
    %cst_162 = arith.constant 0.00999999977 : f32
    %642 = vector.broadcast %cst_162 : f32 to vector<8x64xf32>
    %643 = arith.mulf %642, %639 : vector<8x64xf32>
    %644 = arith.select %641, %639, %643 : vector<8x64xi1>, vector<8x64xf32>
    %c0_163 = arith.constant 0 : index
    %c0_164 = arith.constant 0 : index
    %645 = vector.load %arg8[%c0_163, %c0_164] : memref<1x64xf32, #tpu.memory_space<vmem>>, vector<1x64xf32>
    %646 = vector.broadcast %645 : vector<1x64xf32> to vector<8x64xf32>
    %647 = arith.mulf %644, %646 : vector<8x64xf32>
    %cst_165 = arith.constant dense<0.000000e+00> : vector<8xf32>
    %648 = vector.multi_reduction <add>, %647, %cst_165 [1] : vector<8x64xf32> to vector<8xf32>
    %649 = vector.shape_cast %648 : vector<8xf32> to vector<8x1xf32>
    %c0_166 = arith.constant 0 : index
    %c0_167 = arith.constant 0 : index
    %650 = vector.load %arg9[%c0_166, %c0_167] : memref<1x1xf32, #tpu.memory_space<vmem>>, vector<1x1xf32>
    %651 = vector.broadcast %650 : vector<1x1xf32> to vector<8x1xf32>
    %652 = arith.addf %649, %651 : vector<8x1xf32>
    %653 = arith.negf %652 : vector<8x1xf32>
    %654 = math.exp %653 : vector<8x1xf32>
    %cst_168 = arith.constant 1.000000e+00 : f32
    %655 = vector.broadcast %cst_168 : f32 to vector<8x1xf32>
    %656 = arith.addf %655, %654 : vector<8x1xf32>
    %657 = arith.divf %655, %656 : vector<8x1xf32>
    %c0_169 = arith.constant 0 : index
    %c0_170 = arith.constant 0 : index
    %658 = vector.load %arg10[%c0_169, %c0_170] : memref<8x1xf32, #tpu.memory_space<vmem>>, vector<8x1xf32>
    tpu.vector_store %arg10[%c0_169, %c0_170], %657 {strides = array<i32>} : memref<8x1xf32, #tpu.memory_space<vmem>>, vector<8x1xf32>,
    return
  }
  func.func @transform_0(%arg0: i32) -> (i32, i32, i32) {
    %c0_i32 = arith.constant 0 : i32
    %c0_i32_0 = arith.constant 0 : i32
    %c0_i32_1 = arith.constant 0 : i32
    return %c0_i32, %arg0, %c0_i32_0 : i32, i32, i32
  }
  func.func @transform_1(%arg0: i32) -> (i32, i32) {
    %c0_i32 = arith.constant 0 : i32
    %c0_i32_0 = arith.constant 0 : i32
    %c0_i32_1 = arith.constant 0 : i32
    return %c0_i32, %c0_i32_0 : i32, i32
  }
  func.func @transform_2(%arg0: i32) -> (i32, i32) {
    %c0_i32 = arith.constant 0 : i32
    %c0_i32_0 = arith.constant 0 : i32
    %c0_i32_1 = arith.constant 0 : i32
    return %c0_i32, %c0_i32_0 : i32, i32
  }
  func.func @transform_3(%arg0: i32) -> (i32, i32) {
    %c0_i32 = arith.constant 0 : i32
    %c0_i32_0 = arith.constant 0 : i32
    %c0_i32_1 = arith.constant 0 : i32
    return %c0_i32, %c0_i32_0 : i32, i32
  }
  func.func @transform_4(%arg0: i32) -> (i32, i32) {
    %c0_i32 = arith.constant 0 : i32
    %c0_i32_0 = arith.constant 0 : i32
    %c0_i32_1 = arith.constant 0 : i32
    return %c0_i32, %c0_i32_0 : i32, i32
  }
  func.func @transform_5(%arg0: i32) -> (i32, i32) {
    %c0_i32 = arith.constant 0 : i32
    %c0_i32_0 = arith.constant 0 : i32
    %c0_i32_1 = arith.constant 0 : i32
    return %c0_i32, %c0_i32_0 : i32, i32
  }
  func.func @transform_6(%arg0: i32) -> (i32, i32) {
    %c0_i32 = arith.constant 0 : i32
    %c0_i32_0 = arith.constant 0 : i32
    %c0_i32_1 = arith.constant 0 : i32
    return %c0_i32, %c0_i32_0 : i32, i32
  }
  func.func @transform_7(%arg0: i32) -> (i32, i32) {
    %c0_i32 = arith.constant 0 : i32
    %c0_i32_0 = arith.constant 0 : i32
    %c0_i32_1 = arith.constant 0 : i32
    return %c0_i32, %c0_i32_0 : i32, i32
  }
  func.func @transform_8(%arg0: i32) -> (i32, i32) {
    %c0_i32 = arith.constant 0 : i32
    %c0_i32_0 = arith.constant 0 : i32
    %c0_i32_1 = arith.constant 0 : i32
    return %c0_i32, %c0_i32_0 : i32, i32
  }
  func.func @transform_9(%arg0: i32) -> (i32, i32) {
    %c0_i32 = arith.constant 0 : i32
    %c0_i32_0 = arith.constant 0 : i32
    return %arg0, %c0_i32 : i32, i32
  }
}

</mosaic_0001>

<bundles_post_ra>
// kernel: _lambda_.1
= control target key start
LH: loop header
LB: loop body
LE: loop exit
PB: predicated region body
PF: predicated region fallthrough
CT: control target
= control target key end

     0   :  { %v4636_v1 = vmov 0   ;;  %v3101_v32 = vmov 1   ;;  %v37_v60 = vlaneseq  ;;  %vm633_vm2 = vcmask 523264   ;;  %s4623_s3 = inlined_call_operand.vmem [shape: bf16[128,512], index: 3, kind: input, shape index: {}]   ;;  %s4624_s0 = inlined_call_operand.vmem [shape: f32[8,8,2], index: 0, kind: input, shape index: {}]   ;;  %s4625_s6 = inlined_call_operand.vmem [shape: bf16[64,256], index: 6, kind: input, shape index: {}]   ;;  %s4626_s4 = inlined_call_operand.vmem [shape: bf16[128,256], index: 4, kind: input, shape index: {}]   ;;  %s4627_s1 = inlined_call_operand.vmem [shape: f32[2,512], index: 1, kind: input, shape index: {}]   ;;  %s4628_s2 = inlined_call_operand.vmem [shape: f32[1,512], index: 2, kind: input, shape index: {}]   ;;  %s4629_s5 = inlined_call_operand.vmem [shape: f32[1,256], index: 5, kind: input, shape index: {}]   ;;  %s4630_s7 = inlined_call_operand.vmem [shape: f32[1,64], index: 7, kind: input, shape index: {}]   ;;  %s4631_s8 = inlined_call_operand.<no memory space> [shape: f32[1,1], index: 8, kind: input, shape index: {}]   ;;  %s4632_s9 = inlined_call_operand.vmem [shape: f32[8,1], index: 9, kind: output, shape index: {}]  }
   0x1   :  { %v3156_v0 = vld [vmem:[%s4623_s3 + $0x4] ss:$16 sps:$4 sm:$0xff]   ;;  %364 = vmatprep.mubr.bf16.mxu0 %v4636_v1  ;;  %405 = vmatprep.mubr.bf16.mxu1 %v4636_v1  ;;  %v3163_v2 = vld [vmem:[%s4623_s3 + $0xc] ss:$16 sps:$4 sm:$0xff]   ;;  %v3171_v3 = vld [vmem:[%s4623_s3] ss:$16 sps:$4 sm:$0xff]  }
   0x2   :  { %4768 = vst [vmem:[#allocation3_spill] sm:$0xff] %v3156_v0  ;;  %4769 = vst [vmem:[#allocation4_spill] sm:$0xff] %v3163_v2  ;;  %2704 = vset.pattern.permute.xlu0 %v4636_v1  ;;  %2706 = vset.pattern.permute.xlu1 %v4636_v1  ;;  %v3176_v4 = vld [vmem:[%s4623_s3 + $0x8] ss:$16 sps:$4 sm:$0xff]   ;;  %v3182_v5 = vld [vmem:[%s4623_s3 + $0x24] ss:$16 sps:$4 sm:$0xff]  }
   0x3   :  { %332 = vmatprep.subr.bf16.mxu0 %v3156_v0  ;;  %4770 = vst [vmem:[#allocation5_spill] sm:$0xff] %v3171_v3  ;;  %373 = vmatprep.subr.bf16.mxu1 %v3163_v2  ;;  %4771 = vst [vmem:[#allocation6_spill] sm:$0xff] %v3182_v5  ;;  %v3189_v6 = vld [vmem:[%s4623_s3 + $0x2c] ss:$16 sps:$4 sm:$0xff]   ;;  %v3194_v7 = vld [vmem:[%s4623_s3 + $0x20] ss:$16 sps:$4 sm:$0xff]  }
   0x4   :  { %333 = vmatpush1.bf16.msra.mxu0 %v3171_v3  ;;  %374 = vmatpush1.bf16.msra.mxu1 %v3176_v4  ;;  %4772 = vst [vmem:[#allocation7_spill] sm:$0xff] %v3194_v7  ;;  %v3200_v8 = vld [vmem:[%s4623_s3 + $0x28] ss:$16 sps:$4 sm:$0xff]   ;;  %v3206_v9 = vld [vmem:[%s4623_s3 + $0x44] ss:$16 sps:$4 sm:$0xff]   ;;  %v38_v61 = vshrl.u32 %v37_v60, 7 }
   0x5   :  { %334 = vmatprep.subr.bf16.mxu0 %v3182_v5  ;;  %375 = vmatprep.subr.bf16.mxu1 %v3189_v6  ;;  %4773 = vst [vmem:[#allocation8_spill] sm:$0xff] %v3206_v9  ;;  %v3211_v10 = vld [vmem:[%s4623_s3 + $0x4c] ss:$16 sps:$4 sm:$0xff]   ;;  %v3216_v11 = vld [vmem:[%s4623_s3 + $0x40] ss:$16 sps:$4 sm:$0xff]   ;;  %vm2535_vm10 = vcmask 7168  }
   0x6   :  { %4774 = vst [vmem:[#allocation9_spill] sm:$0xff] %v3216_v11  ;;  %v3221_v12 = vld [vmem:[%s4623_s3 + $0x48] ss:$16 sps:$4 sm:$0xff]   ;;  %v3228_v13 = vld [vmem:[%s4623_s3 + $0x64] ss:$16 sps:$4 sm:$0xff]   ;;  %v3526_v63 = vsub.s32 0, %v38_v61 }
   0x7   :  { %4775 = vst [vmem:[#allocation10_spill] sm:$0xff] %v3228_v13  ;;  %v3235_v14 = vld [vmem:[%s4623_s3 + $0x6c] ss:$16 sps:$4 sm:$0xff]   ;;  %v3240_v15 = vld [vmem:[%s4623_s3 + $0x60] ss:$16 sps:$4 sm:$0xff]  }
   0x8   :  { %335 = vmatpush1.bf16.msra.mxu0 %v3194_v7  ;;  %376 = vmatpush1.bf16.msra.mxu1 %v3200_v8  ;;  %4776 = vst [vmem:[#allocation11_spill] sm:$0xff] %v3240_v15  ;;  %v3247_v16 = vld [vmem:[%s4623_s3 + $0x68] ss:$16 sps:$4 sm:$0xff]   ;;  %v3252_v17 = vld [vmem:[%s4623_s3 + $0x84] ss:$16 sps:$4 sm:$0xff]   ;;  %4794 = vst [vmem:[#allocation29_spill] sm:$0xff] %v3526_v63 }
   0x9   :  { %336 = vmatprep.subr.bf16.mxu0 %v3206_v9  ;;  %377 = vmatprep.subr.bf16.mxu1 %v3211_v10  ;;  %4777 = vst [vmem:[#allocation12_spill] sm:$0xff] %v3252_v17  ;;  %v3259_v18 = vld [vmem:[%s4623_s3 + $0x8c] ss:$16 sps:$4 sm:$0xff]   ;;  %v3264_v19 = vld [vmem:[%s4623_s3 + $0x80] ss:$16 sps:$4 sm:$0xff]  }
   0xa   :  { %4778 = vst [vmem:[#allocation13_spill] sm:$0xff] %v3264_v19  ;;  %v3269_v20 = vld [vmem:[%s4623_s3 + $0x88] ss:$16 sps:$4 sm:$0xff]   ;;  %v3276_v21 = vld [vmem:[%s4623_s3 + $0xa4] ss:$16 sps:$4 sm:$0xff]  }
   0xb   :  { %4779 = vst [vmem:[#allocation14_spill] sm:$0xff] %v3276_v21  ;;  %v3283_v22 = vld [vmem:[%s4623_s3 + $0xac] ss:$16 sps:$4 sm:$0xff]   ;;  %v3290_v23 = vld [vmem:[%s4623_s3 + $0xa0] ss:$16 sps:$4 sm:$0xff]  }
   0xc   :  { %337 = vmatpush1.bf16.msra.mxu0 %v3216_v11  ;;  %378 = vmatpush1.bf16.msra.mxu1 %v3221_v12  ;;  %4780 = vst [vmem:[#allocation15_spill] sm:$0xff] %v3290_v23  ;;  %v3295_v24 = vld [vmem:[%s4623_s3 + $0xa8] ss:$16 sps:$4 sm:$0xff]   ;;  %v3302_v25 = vld [vmem:[%s4623_s3 + $0xc4] ss:$16 sps:$4 sm:$0xff]  }
   0xd   :  { %338 = vmatprep.subr.bf16.mxu0 %v3228_v13  ;;  %379 = vmatprep.subr.bf16.mxu1 %v3235_v14  ;;  %4781 = vst [vmem:[#allocation16_spill] sm:$0xff] %v3302_v25  ;;  %v3307_v26 = vld [vmem:[%s4623_s3 + $0xcc] ss:$16 sps:$4 sm:$0xff]   ;;  %v114_v27 = vld [vmem:[%s4624_s0] sm:$0xff]  ;;  %v3322_v29 = vld [vmem:[%s4623_s3 + $0xc8] ss:$16 sps:$4 sm:$0xff]  }
   0xe   :  { %117 = vperm.xlu0 %2704, %v114_v27   ;;  %v3317_v28 = vld [vmem:[%s4623_s3 + $0xc0] ss:$16 sps:$4 sm:$0xff]   ;;  %v3329_v30 = vld [vmem:[%s4623_s3 + $0xe4] ss:$16 sps:$4 sm:$0xff]   ;;  %v3334_v31 = vld [vmem:[%s4623_s3 + $0xec] ss:$16 sps:$4 sm:$0xff]  }
   0xf   :  { %4782 = vst [vmem:[#allocation17_spill] sm:$0xff] %v3317_v28  ;;  %4783 = vst [vmem:[#allocation18_spill] sm:$0xff] %v3329_v30  ;;  %v3342_v33 = vld [vmem:[%s4623_s3 + $0xe0] ss:$16 sps:$4 sm:$0xff]   ;;  %v3347_v34 = vld [vmem:[%s4623_s3 + $0xe8] ss:$16 sps:$4 sm:$0xff]  }
  0x10   :  { %339 = vmatpush1.bf16.msra.mxu0 %v3240_v15  ;;  %380 = vmatpush1.bf16.msra.mxu1 %v3247_v16  ;;  %4784 = vst [vmem:[#allocation19_spill] sm:$0xff] %v3342_v33  ;;  %v3360_v35 = vld [vmem:[%s4625_s6 + $0x4] ss:$8 sps:$4 sm:$0xff]   ;;  %v3366_v36 = vld [vmem:[%s4625_s6] ss:$8 sps:$4 sm:$0xff]  }
  0x11   :  { %340 = vmatprep.subr.bf16.mxu0 %v3252_v17  ;;  %381 = vmatprep.subr.bf16.mxu1 %v3259_v18  ;;  %4785 = vst [vmem:[#allocation20_spill] sm:$0xff] %v3360_v35  ;;  %4786 = vst [vmem:[#allocation21_spill] sm:$0xff] %v3366_v36  ;;  %v3372_v37 = vld [vmem:[%s4625_s6 + $0x14] ss:$8 sps:$4 sm:$0xff]   ;;  %v3377_v38 = vld [vmem:[%s4625_s6 + $0x10] ss:$8 sps:$4 sm:$0xff]  }
  0x12   :  { %2705 = vset.pattern.permute.xlu0 %v3101_v32  ;;  %4787 = vst [vmem:[#allocation22_spill] sm:$0xff] %v3372_v37  ;;  %4788 = vst [vmem:[#allocation23_spill] sm:$0xff] %v3377_v38  ;;  %v3384_v39 = vld [vmem:[%s4625_s6 + $0x24] ss:$8 sps:$4 sm:$0xff]   ;;  %v3389_v40 = vld [vmem:[%s4625_s6 + $0x20] ss:$8 sps:$4 sm:$0xff]  }
  0x13   :  { %125 = vperm.xlu0 %2705, %v114_v27   ;;  %4789 = vst [vmem:[#allocation24_spill] sm:$0xff] %v3384_v39  ;;  %4790 = vst [vmem:[#allocation25_spill] sm:$0xff] %v3389_v40  ;;  %v3396_v41 = vld [vmem:[%s4625_s6 + $0x34] ss:$8 sps:$4 sm:$0xff]   ;;  %v3401_v42 = vld [vmem:[%s4625_s6 + $0x30] ss:$8 sps:$4 sm:$0xff]  }
  0x14   :  { %341 = vmatpush1.bf16.msra.mxu0 %v3264_v19  ;;  %382 = vmatpush1.bf16.msra.mxu1 %v3269_v20  ;;  %4791 = vst [vmem:[#allocation26_spill] sm:$0xff] %v3396_v41  ;;  %4792 = vst [vmem:[#allocation27_spill] sm:$0xff] %v3401_v42  ;;  %v3412_v43 = vld [vmem:[%s4626_s4 + $0x4] ss:$8 sps:$4 sm:$0xff]   ;;  %v3418_v44 = vld [vmem:[%s4626_s4] ss:$8 sps:$4 sm:$0xff]  }
  0x15   :  { %342 = vmatprep.subr.bf16.mxu0 %v3276_v21  ;;  %383 = vmatprep.subr.bf16.mxu1 %v3283_v22  ;;  %4793 = vst [vmem:[#allocation28_spill] sm:$0xff] %v3412_v43  ;;  %v3426_v45 = vld [vmem:[%s4626_s4 + $0x14] ss:$8 sps:$4 sm:$0xff]   ;;  %v3432_v46 = vld [vmem:[%s4626_s4 + $0x10] ss:$8 sps:$4 sm:$0xff]   ;;  %v2603_v59 = vld [vmem:[%s4624_s0 + $0x8] sm:$0xff] }
  0x16   :  { %v3440_v47 = vld [vmem:[%s4626_s4 + $0x24] ss:$8 sps:$4 sm:$0xff]   ;;  %v3446_v48 = vld [vmem:[%s4626_s4 + $0x20] ss:$8 sps:$4 sm:$0xff]   ;;  %v3454_v49 = vld [vmem:[%s4626_s4 + $0x34] ss:$8 sps:$4 sm:$0xff]   ;;  %706 = vperm.xlu1 %2706, %v2603_v59  }
  0x17   :  { %v3460_v50 = vld [vmem:[%s4626_s4 + $0x30] ss:$8 sps:$4 sm:$0xff]   ;;  %v3468_v51 = vld [vmem:[%s4626_s4 + $0x44] ss:$8 sps:$4 sm:$0xff]   ;;  %v3473_v52 = vld [vmem:[%s4626_s4 + $0x40] ss:$8 sps:$4 sm:$0xff]  }
  0x18   :  { %343 = vmatpush1.bf16.msra.mxu0 %v3290_v23  ;;  %384 = vmatpush1.bf16.msra.mxu1 %v3295_v24  ;;  %v3479_v53 = vld [vmem:[%s4626_s4 + $0x54] ss:$8 sps:$4 sm:$0xff]   ;;  %v3487_v54 = vld [vmem:[%s4626_s4 + $0x50] ss:$8 sps:$4 sm:$0xff]   ;;  %v3493_v55 = vld [vmem:[%s4626_s4 + $0x64] ss:$8 sps:$4 sm:$0xff]  }
  0x19   :  { %344 = vmatprep.subr.bf16.mxu0 %v3302_v25  ;;  %385 = vmatprep.subr.bf16.mxu1 %v3307_v26  ;;  %v3501_v56 = vld [vmem:[%s4626_s4 + $0x60] ss:$8 sps:$4 sm:$0xff]   ;;  %v3508_v57 = vld [vmem:[%s4626_s4 + $0x74] ss:$8 sps:$4 sm:$0xff]   ;;  %v3515_v58 = vld [vmem:[%s4626_s4 + $0x70] ss:$8 sps:$4 sm:$0xff]  }
  0x1a   :  { %2707 = vset.pattern.permute.xlu1 %v3101_v32  ;;  %v3528_v27 = vsub.s32 1, %v38_v61 }
  0x1b   :  { %714 = vperm.xlu1 %2707, %v2603_v59  }
  0x1c   :  { %345 = vmatpush1.bf16.msra.mxu0 %v3317_v28  ;;  %386 = vmatpush1.bf16.msra.mxu1 %v3322_v29  ;;  %4795 = vst [vmem:[#allocation30_spill] sm:$0xff] %v3528_v27 }
  0x1d   :  { %346 = vmatprep.subr.bf16.mxu0 %v3329_v30  ;;  %387 = vmatprep.subr.bf16.mxu1 %v3334_v31 }
  0x1f   :  { %2708 = vset.pattern.permute.xlu1 %v4636_v1 }
  0x20   :  { %347 = vmatpush1.bf16.msra.mxu0 %v3342_v33  ;;  %388 = vmatpush1.bf16.msra.mxu1 %v3347_v34 }
  0x21   :  { %637 = vmatprep.subr.bf16.mxu1 %v3360_v35  ;;  %542 = vmatprep.subr.bf16.mxu0 %v3412_v43 }
  0x23   :  { %365 = vmatmul.mubr.bf16.vlgmr.msra.gmra.mrb[0].mxu0 %v4636_v1  ;;  %406 = vmatmul.mubr.bf16.vlgmr.msra.gmra.mrb[0].mxu1 %v4636_v1 }
  0x24   :  { %669 = vmatprep.mubr.bf16.mxu1 %v4636_v1  ;;  %574 = vmatprep.mubr.bf16.mxu0 %v4636_v1 }
  0x25   :  { %638 = vmatpush1.bf16.msra.mxu1 %v3366_v36  ;;  %543 = vmatpush1.bf16.msra.mxu0 %v3418_v44 }
  0x26   :  { %639 = vmatprep.subr.bf16.mxu1 %v3372_v37  ;;  %544 = vmatprep.subr.bf16.mxu0 %v3426_v45 }
  0x29   :  { %640 = vmatpush1.bf16.msra.mxu1 %v3377_v38  ;;  %545 = vmatpush1.bf16.msra.mxu0 %v3432_v46 }
  0x2a   :  { %641 = vmatprep.subr.bf16.mxu1 %v3384_v39  ;;  %546 = vmatprep.subr.bf16.mxu0 %v3440_v47 }
  0x2d   :  { %642 = vmatpush1.bf16.msra.mxu1 %v3389_v40  ;;  %547 = vmatpush1.bf16.msra.mxu0 %v3446_v48  ;;  %v51_v40 = vsub.s32 3, %v38_v61 }
  0x2e   :  { %643 = vmatprep.subr.bf16.mxu1 %v3396_v41  ;;  %548 = vmatprep.subr.bf16.mxu0 %v3454_v49 }
  0x31   :  { %644 = vmatpush1.bf16.msra.mxu1 %v3401_v42  ;;  %549 = vmatpush1.bf16.msra.mxu0 %v3460_v50  ;;  %v2541_v42 = vld [vmem:[%s4627_s1 + $0x1] ss:$2 sm:$0xf] }
  0x32   :  { %730 = vmatprep.subr.bf16.mxu1 %v3156_v0  ;;  %550 = vmatprep.subr.bf16.mxu0 %v3468_v51  ;;  %v3540_v59 = vrot.slane %v2541_v42, %v3526_v63 }
  0x34   :  { %670 = vmatmul.mubr.bf16.vlgmr.msra.gmra.mrb[4].mxu1 %v4636_v1  ;;  %4797 = vst [vmem:[#allocation32_spill] sm:$0xff] %v3540_v59 }
  0x35   :  { %731 = vmatpush1.bf16.msra.mxu1 %v3171_v3  ;;  %762 = vmatprep.mubr.bf16.mxu1 %v4636_v1  ;;  %v3546_v1 = vrot.slane %v2541_v42, %v3528_v27 }
  0x36   :  { %732 = vmatprep.subr.bf16.mxu1 %v3182_v5  ;;  %551 = vmatpush1.bf16.msra.mxu0 %v3473_v52 }
  0x37   :  { %552 = vmatprep.subr.bf16.mxu0 %v3479_v53  ;;  %4799 = vst [vmem:[#allocation34_spill] sm:$0xff] %v3546_v1 }
  0x39   :  { %733 = vmatpush1.bf16.msra.mxu1 %v3194_v7 }
  0x3a   :  { %734 = vmatprep.subr.bf16.mxu1 %v3206_v9  ;;  %553 = vmatpush1.bf16.msra.mxu0 %v3487_v54 }
  0x3b   :  { %554 = vmatprep.subr.bf16.mxu0 %v3493_v55 }
  0x3d   :  { %735 = vmatpush1.bf16.msra.mxu1 %v3216_v11 }
  0x3e   :  { %736 = vmatprep.subr.bf16.mxu1 %v3228_v13  ;;  %555 = vmatpush1.bf16.msra.mxu0 %v3501_v56 }
  0x3f   :  { %556 = vmatprep.subr.bf16.mxu0 %v3508_v57 }
  0x41   :  { %737 = vmatpush1.bf16.msra.mxu1 %v3240_v15 }
  0x42   :  { %738 = vmatprep.subr.bf16.mxu1 %v3252_v17  ;;  %557 = vmatpush1.bf16.msra.mxu0 %v3515_v58 }
  0x43   :  { %844 = vmatprep.subr.bf16.mxu0 %v3412_v43  ;;  %v80_v43 = vld [vmem:[%s4628_s2] sm:$0xf] }
  0x44   :  { %v3573_v11 = vrot.slane %v80_v43, %v51_v40 }
  0x45   :  { %739 = vmatpush1.bf16.msra.mxu1 %v3264_v19 }
  0x46   :  { %740 = vmatprep.subr.bf16.mxu1 %v3276_v21 }
  0x49   :  { %741 = vmatpush1.bf16.msra.mxu1 %v3290_v23 }
  0x4a   :  { %742 = vmatprep.subr.bf16.mxu1 %v3302_v25  ;;  %v3560_v25 = vrot.slane %v80_v43, %v3526_v63 }
  0x4c   :  { %4802 = vst [vmem:[#allocation37_spill] sm:$0xff] %v3560_v25 }
  0x4d   :  { %743 = vmatpush1.bf16.msra.mxu1 %v3317_v28  ;;  %v47_v28 = vsub.s32 2, %v38_v61 }
  0x4e   :  { %744 = vmatprep.subr.bf16.mxu1 %v3329_v30  ;;  %v3557_v30 = vrot.slane %v2541_v42, %v51_v40 }
  0x4f   :  { %v3569_v19 = vrot.slane %v2541_v42, %v47_v28 }
  0x50   :  { %4801 = vst [vmem:[#allocation36_spill] sm:$0xff] %v3557_v30 }
  0x51   :  { %745 = vmatpush1.bf16.msra.mxu1 %v3342_v33 }
  0x52   :  { %771 = vmatprep.subr.bf16.mxu1 %v3163_v2  ;;  %v35_v2 = vld [vmem:[%s4627_s1] ss:$2 sm:$0xf] }
  0x53   :  { %v3537_v32 = vrot.slane %v35_v2, %v3526_v63  ;;  %v3543_v60 = vrot.slane %v35_v2, %v3528_v27  ;;  %v3555_v33 = vrot.slane %v35_v2, %v51_v40  ;;  %v3567_v21 = vrot.slane %v35_v2, %v47_v28 }
  0x55   :  { %4796 = vst [vmem:[#allocation31_spill] sm:$0xff] %v3537_v32  ;;  %4798 = vst [vmem:[#allocation33_spill] sm:$0xff] %v3543_v60 }
  0x56   :  { %4800 = vst [vmem:[#allocation35_spill] sm:$0xff] %v3555_v33 }
  0x8d   :  { %v118_v62 = vpop.permute.xlu0 %117 }
  0x8e   :  { %v120_v39 = vmul.f32 %v118_v62, %v3537_v32  ;;  %v121_v37 = vmul.f32 %v118_v62, %v3543_v60  ;;  %v3563_v32 = vrot.slane %v80_v43, %v3528_v27  ;;  %v123_v60 = vmul.f32 %v118_v62, %v3555_v33 }
  0x8f   :  { %v122_v2 = vmul.f32 %v118_v62, %v3567_v21 }
  0x90   :  { %4803 = vst [vmem:[#allocation38_spill] sm:$0xff] %v3563_v32 }
  0x92   :  { %v126_v41 = vpop.permute.xlu0 %125 }
  0x93   :  { %v128_v38 = vmul.f32 %v126_v41, %v3540_v59  ;;  %v129_v36 = vmul.f32 %v126_v41, %v3546_v1  ;;  %v131_v1 = vmul.f32 %v126_v41, %v3557_v30  ;;  %v130_v42 = vmul.f32 %v126_v41, %v3569_v19 }
  0x95   :  { %v132_v23 = vadd.f32 %v128_v38, %v120_v39  ;;  %v133_v59 = vadd.f32 %v129_v36, %v121_v37  ;;  %v135_v36 = vadd.f32 %v131_v1, %v123_v60 }
  0x97   :  { %v136_v17 = vadd.f32 %v132_v23, %v3560_v25  ;;  %v137_v63 = vadd.f32 %v133_v59, %v3563_v32 }
  0xf6   :  { %v366_v15 = vpop.f32.mrb[0].mxu0  ;;  %v407_v61 = vpop.f32.mrb[0].mxu1 }
  0xf7   :  { %v414_v13 = vadd.f32 %v366_v15, %v136_v17  ;;  %v368_v38 = vpop.f32.mrb[1].mxu0  ;;  %v409_v39 = vpop.f32.mrb[1].mxu1  ;;  %v139_v15 = vadd.f32 %v135_v36, %v3573_v11  ;;  %v3578_v17 = vrot.slane %v80_v43, %v47_v28 }
  0xf8   :  { %v415_v27 = vadd.f32 %v368_v38, %v137_v63  ;;  %v370_v37 = vpop.f32.mrb[2].mxu0  ;;  %v411_v33 = vpop.f32.mrb[2].mxu1  ;;  %v134_v63 = vadd.f32 %v130_v42, %v122_v2 }
  0xf9   :  { %v2574_v30 = vmul.f32 -1.442695, %v414_v13  ;;  %v371_v9 = vpop.f32.mrb[3].mxu0  ;;  %v412_v23 = vpop.f32.mrb[3].mxu1  ;;  %v417_v40 = vadd.f32 %v409_v39, %v139_v15 }
  0xfa   :  { %v2575_v25 = vmul.f32 -1.442695, %v415_v27  ;;  %v138_v1 = vadd.f32 %v134_v63, %v3578_v17  ;;  %v4804_v63 = vmov 0  }
  0xfb   :  { %2793 = vpow2.f32 %v2574_v30  ;;  %v2576_v59 = vmul.f32 -1.442695, %v417_v40  ;;  %v4805_v40 = vld [vmem:[#allocation8_spill] sm:$0xff] }
  0xfc   :  { %2795 = vpow2.f32 %v2575_v25  ;;  %v416_v33 = vadd.f32 %v407_v61, %v138_v1  ;;  %v4806_v1 = vld [vmem:[#allocation9_spill] sm:$0xff] }
  0xfd   :  { %2797 = vpow2.f32 %v2576_v59  ;;  %v4807_v59 = vld [vmem:[#allocation10_spill] sm:$0xff] }
  0xfe   :  { %2799 = vtanh.f32 %v416_v33  ;;  %v4808_v33 = vld [vmem:[#allocation11_spill] sm:$0xff] }
 0x105   :  { %v2794_v60 = vpop.eup %2793 }
 0x106   :  { %v2796_v62 = vpop.eup %2795  ;;  %v421_v38 = vadd.f32 1.0, %v2794_v60  ;;  %v4809_v60 = vld [vmem:[#allocation12_spill] sm:$0xff] }
 0x107   :  { %v427_v9 = vadd.f32 1.0, %v2796_v62  ;;  %v2798_v13 = vpop.eup %2797  ;;  %v4810_v62 = vld [vmem:[#allocation13_spill] sm:$0xff] }
 0x108   :  { %2801 = vrcp.f32 %v421_v38  ;;  %v2800_v25 = vpop.eup %2799  ;;  %v434_v43 = vadd.f32 1.0, %v2798_v13  ;;  %v4811_v38 = vld [vmem:[#allocation14_spill] sm:$0xff] }
 0x109   :  { %2803 = vrcp.f32 %v427_v9  ;;  %v671_v9 = vpop.f32.mrb[4].mxu1 }
 0x10a   :  { %2805 = vrcp.f32 %v434_v43  ;;  %v673_v13 = vpop.f32.mrb[5].mxu1  ;;  %v4814_v43 = vld [vmem:[#allocation17_spill] sm:$0xff] }
 0x112   :  { %v2802_v30 = vpop.eup %2801 }
 0x113   :  { %v2804_v41 = vpop.eup %2803  ;;  %v438_v28 = vmul.f32 %v2802_v30, %v2800_v25  ;;  %v675_v25 = vpop.f32.mrb[6].mxu1  ;;  %v4812_v30 = vld [vmem:[#allocation15_spill] sm:$0xff] }
 0x114   :  { %v437_v27 = vmul.f32 0.0, %v2804_v41  ;;  %v2806_v61 = vpop.eup %2805  ;;  %v676_v41 = vpop.f32.mrb[7].mxu1  ;;  %v4820_v25 = vld [vmem:[#allocation31_spill] sm:$0xff] }
 0x116   :  { %v3581_v39 = vadd.f32 %v438_v28, %v437_v27  ;;  %v4813_v28 = vld [vmem:[#allocation16_spill] sm:$0xff]  ;;  %v4815_v27 = vld [vmem:[#allocation18_spill] sm:$0xff] }
 0x118   :  { %2807 = vtanh.f32 %v3581_v39 }
 0x122   :  { %v2808_v36 = vpop.eup %2807 }
 0x123   :  { %v441_v37 = vmul.f32 %v2808_v36, %v2806_v61  ;;  %v4816_v61 = vld [vmem:[#allocation19_spill] sm:$0xff]  ;;  %v4817_v36 = vld [vmem:[#allocation28_spill] sm:$0xff] }
 0x125   :  { %v729_v2 = vpack.c.bf16 %v441_v37, %v441_v37  ;;  %vm442_vm0 = vcmp.gt.f32.partialorder %v441_v37, 0.0  ;;  %v443_v42 = vmul.f32 0.01, %v441_v37 }
 0x127   :  { %763 = vmatmul.mubr.bf16.vlgmr.msra.gmra.mrb[8].mxu1 %v729_v2  ;;  %v444_v23 = vsel %vm442_vm0, %v441_v37, %v443_v42  ;;  %v707_v37 = vpop.permute.xlu1 %706  ;;  %v4818_v42 = vld [vmem:[#allocation33_spill] sm:$0xff] }
 0x128   :  { %772 = vmatpush1.bf16.msra.mxu1 %v3176_v4  ;;  %v445_v15 = vpack.c.bf16 %v444_v23, %v444_v23  ;;  %803 = vmatprep.mubr.bf16.mxu1 %v4804_v63  ;;  %v710_v23 = vmul.f32 %v707_v37, %v4818_v42 }
 0x129   :  { %773 = vmatprep.subr.bf16.mxu1 %v3189_v6 }
 0x12a   :  { %575 = vmatmul.mubr.bf16.vlgmr.msra.gmra.mrb[4].mxu0 %v445_v15  ;;  %v4819_v15 = vld [vmem:[#allocation34_spill] sm:$0xff] }
 0x12b   :  { %845 = vmatpush1.bf16.msra.mxu0 %v3418_v44  ;;  %876 = vmatprep.mubr.bf16.mxu0 %v4804_v63 }
 0x12c   :  { %774 = vmatpush1.bf16.msra.mxu1 %v3200_v8  ;;  %846 = vmatprep.subr.bf16.mxu0 %v3426_v45 }
 0x12d   :  { %775 = vmatprep.subr.bf16.mxu1 %v3211_v10 }
 0x12f   :  { %847 = vmatpush1.bf16.msra.mxu0 %v3432_v46 }
 0x130   :  { %776 = vmatpush1.bf16.msra.mxu1 %v3221_v12  ;;  %848 = vmatprep.subr.bf16.mxu0 %v3440_v47 }
 0x131   :  { %777 = vmatprep.subr.bf16.mxu1 %v3235_v14 }
 0x133   :  { %849 = vmatpush1.bf16.msra.mxu0 %v3446_v48 }
 0x134   :  { %778 = vmatpush1.bf16.msra.mxu1 %v3247_v16  ;;  %850 = vmatprep.subr.bf16.mxu0 %v3454_v49 }
 0x135   :  { %779 = vmatprep.subr.bf16.mxu1 %v3259_v18 }
 0x137   :  { %851 = vmatpush1.bf16.msra.mxu0 %v3460_v50 }
 0x138   :  { %780 = vmatpush1.bf16.msra.mxu1 %v3269_v20  ;;  %852 = vmatprep.subr.bf16.mxu0 %v3468_v51 }
 0x139   :  { %781 = vmatprep.subr.bf16.mxu1 %v3283_v22 }
 0x13b   :  { %853 = vmatpush1.bf16.msra.mxu0 %v3473_v52 }
 0x13c   :  { %782 = vmatpush1.bf16.msra.mxu1 %v3295_v24  ;;  %854 = vmatprep.subr.bf16.mxu0 %v3479_v53 }
 0x13d   :  { %783 = vmatprep.subr.bf16.mxu1 %v3307_v26 }
 0x13f   :  { %855 = vmatpush1.bf16.msra.mxu0 %v3487_v54 }
 0x140   :  { %784 = vmatpush1.bf16.msra.mxu1 %v3322_v29  ;;  %856 = vmatprep.subr.bf16.mxu0 %v3493_v55 }
 0x141   :  { %785 = vmatprep.subr.bf16.mxu1 %v3334_v31 }
 0x143   :  { %857 = vmatpush1.bf16.msra.mxu0 %v3501_v56 }
 0x144   :  { %786 = vmatpush1.bf16.msra.mxu1 %v3347_v34  ;;  %858 = vmatprep.subr.bf16.mxu0 %v3508_v57 }
 0x145   :  { %987 = vmatprep.subr.bf16.mxu1 %v3156_v0 }
 0x147   :  { %804 = vmatmul.mubr.bf16.vlgmr.msra.gmra.mrb[12].mxu1 %v729_v2  ;;  %859 = vmatpush1.bf16.msra.mxu0 %v3515_v58  ;;  %v715_v2 = vpop.permute.xlu1 %714 }
 0x148   :  { %988 = vmatpush1.bf16.msra.mxu1 %v3171_v3  ;;  %1019 = vmatprep.mubr.bf16.mxu1 %v4804_v63 }
 0x149   :  { %989 = vmatprep.subr.bf16.mxu1 %v3182_v5  ;;  %894 = vmatprep.subr.bf16.mxu0 %v3360_v35  ;;  %v4824_v5 = vld [vmem:[#allocation37_spill] sm:$0xff] }
 0x14c   :  { %990 = vmatpush1.bf16.msra.mxu1 %v3194_v7 }
 0x14d   :  { %991 = vmatprep.subr.bf16.mxu1 %v4805_v40 }
 0x150   :  { %992 = vmatpush1.bf16.msra.mxu1 %v4806_v1 }
 0x151   :  { %993 = vmatprep.subr.bf16.mxu1 %v4807_v59  ;;  %v4823_v59 = vld [vmem:[#allocation30_spill] sm:$0xff] }
 0x154   :  { %994 = vmatpush1.bf16.msra.mxu1 %v4808_v33 }
 0x155   :  { %995 = vmatprep.subr.bf16.mxu1 %v4809_v60  ;;  %v4822_v60 = vld [vmem:[#allocation29_spill] sm:$0xff] }
 0x158   :  { %996 = vmatpush1.bf16.msra.mxu1 %v4810_v62  ;;  %v709_v62 = vmul.f32 %v707_v37, %v4820_v25 }
 0x159   :  { %997 = vmatprep.subr.bf16.mxu1 %v4811_v38  ;;  %v718_v38 = vmul.f32 %v715_v2, %v4819_v15 }
 0x15c   :  { %998 = vmatpush1.bf16.msra.mxu1 %v4812_v30  ;;  %v4821_v30 = vld [vmem:[#allocation32_spill] sm:$0xff] }
 0x15d   :  { %999 = vmatprep.subr.bf16.mxu1 %v4813_v28  ;;  %v717_v41 = vmul.f32 %v715_v2, %v4821_v30 }
 0x160   :  { %1000 = vmatpush1.bf16.msra.mxu1 %v4814_v43  ;;  %v102_v43 = vld [vmem:[%s4629_s5] sm:$0x3]  ;;  %s3102_s5 = smov 64  }
 0x161   :  { %1001 = vmatprep.subr.bf16.mxu1 %v4815_v27  ;;  %v722_v27 = vadd.f32 %v718_v38, %v710_v23  ;;  %v3646_v1 = vrot.slane %v102_v43, %v4823_v59 }
 0x163   :  { %v726_v25 = vadd.f32 %v722_v27, %v3563_v32 }
 0x164   :  { %1002 = vmatpush1.bf16.msra.mxu1 %v4816_v61  ;;  %v3643_v61 = vrot.slane %v102_v43, %v4822_v60 }
 0x165   :  { %1101 = vmatprep.subr.bf16.mxu1 %v4817_v36  ;;  %v721_v36 = vadd.f32 %v717_v41, %v709_v62 }
 0x167   :  { %v725_v3 = vadd.f32 %v721_v36, %v4824_v5  ;;  %v719_v36 = vmul.f32 %v715_v2, %v3569_v19 }
 0x1fa   :  { %v764_v28 = vpop.f32.mrb[8].mxu1 }
 0x1fb   :  { %v766_v33 = vpop.f32.mrb[9].mxu1  ;;  %v812_v43 = vadd.f32 %v764_v28, %v725_v3 }
 0x1fc   :  { %v768_v42 = vpop.f32.mrb[10].mxu1  ;;  %v813_v41 = vadd.f32 %v766_v33, %v726_v25 }
 0x1fd   :  { %v576_v15 = vpop.f32.mrb[4].mxu0  ;;  %v769_v40 = vpop.f32.mrb[11].mxu1 }
 0x1fe   :  { %v583_v30 = vadd.f32 %v576_v15, %v3643_v61  ;;  %v578_v7 = vpop.f32.mrb[5].mxu0  ;;  %v2605_v42 = vmul.f32 -1.442695, %v813_v41  ;;  %v2604_v40 = vmul.f32 -1.442695, %v812_v43  ;;  %v711_v15 = vmul.f32 %v707_v37, %v3567_v21 }
 0x1ff   :  { %v584_v38 = vadd.f32 %v578_v7, %v3646_v1  ;;  %v580_v23 = vpop.f32.mrb[6].mxu0  ;;  %v4825_v7 = vld [vmem:[#allocation35_spill] sm:$0xff] }
 0x200   :  { %v678_v60 = vadd.f32 %v671_v9, %v583_v30  ;;  %v581_v0 = vpop.f32.mrb[7].mxu0  ;;  %v712_v23 = vmul.f32 %v707_v37, %v4825_v7  ;;  %v4826_v9 = vld [vmem:[#allocation36_spill] sm:$0xff]  ;;  %v723_v33 = vadd.f32 %v719_v36, %v711_v15 }
 0x201   :  { %v3652_v62 = vadd.f32 %v673_v13, %v584_v38  ;;  %v720_v0 = vmul.f32 %v715_v2, %v4826_v9  ;;  %v2610_v36 = vld [vmem:[%s4624_s0 + $0x10] sm:$0xff] }
 0x202   :  { %v2601_v59 = vmul.f32 -1.442695, %v678_v60  ;;  %v727_v25 = vadd.f32 %v723_v33, %v3578_v17 }
 0x203   :  { %v724_v13 = vadd.f32 %v720_v0, %v712_v23 }
 0x204   :  { %2809 = vpow2.f32 %v2601_v59 }
 0x205   :  { %2811 = vpow2.f32 %v2605_v42  ;;  %v728_v60 = vadd.f32 %v724_v13, %v3573_v11 }
 0x206   :  { %2813 = vpow2.f32 %v2604_v40 }
 0x207   :  { %2815 = vtanh.f32 %v3652_v62 }
 0x20e   :  { %v2810_v27 = vpop.eup %2809 }
 0x20f   :  { %v683_v32 = vadd.f32 1.0, %v2810_v27  ;;  %v2812_v3 = vpop.eup %2811 }
 0x210   :  { %v2814_v30 = vpop.eup %2813  ;;  %v825_v28 = vadd.f32 1.0, %v2812_v3 }
 0x211   :  { %2817 = vrcp.f32 %v683_v32  ;;  %v819_v38 = vadd.f32 1.0, %v2814_v30  ;;  %v2816_v41 = vpop.eup %2815 }
 0x212   :  { %2819 = vrcp.f32 %v825_v28 }
 0x213   :  { %2821 = vrcp.f32 %v819_v38 }
 0x21a   :  { %v805_v59 = vpop.f32.mrb[12].mxu1 }
 0x21b   :  { %v3661_v43 = vpop.eup %2817  ;;  %v814_v37 = vadd.f32 %v805_v59, %v727_v25  ;;  %v807_v2 = vpop.f32.mrb[13].mxu1 }
 0x21c   :  { %v815_v42 = vadd.f32 %v807_v2, %v728_v60  ;;  %v809_v32 = vpop.f32.mrb[14].mxu1  ;;  %v694_v40 = vmul.f32 %v3661_v43, %v2816_v41  ;;  %v2820_v23 = vpop.eup %2819 }
 0x21d   :  { %2823 = vtanh.f32 %v814_v37  ;;  %v810_v27 = vpop.f32.mrb[15].mxu1  ;;  %v2822_v0 = vpop.eup %2821  ;;  %v835_v3 = vmul.f32 %v2820_v23, %v3581_v39  ;;  %v4827_v39 = vld [vmem:[#allocation21_spill] sm:$0xff]  ;;  %v4828_v32 = vld [vmem:[#allocation22_spill] sm:$0xff] }
 0x21e   :  { %v2606_v15 = vmul.f32 -1.442695, %v815_v42  ;;  %696 = vrot.lane.b32.xlu1 %v694_v40, %s3102_s5  ;;  %v4829_v40 = vld [vmem:[#allocation23_spill] sm:$0xff]  ;;  %v4830_v27 = vld [vmem:[#allocation24_spill] sm:$0xff]  ;;  %v4832_v23 = vld [vmem:[#allocation26_spill] sm:$0xff] }
 0x220   :  { %2825 = vpow2.f32 %v2606_v15  ;;  %v4831_v15 = vld [vmem:[#allocation25_spill] sm:$0xff] }
 0x222   :  { %963 = vperm.xlu1 %2708, %v2610_v36  }
 0x227   :  { %v2824_v33 = vpop.eup %2823 }
 0x228   :  { %v836_v13 = vmul.f32 %v2824_v33, %v2822_v0  ;;  %v4833_v0 = vld [vmem:[#allocation27_spill] sm:$0xff]  ;;  %v4834_v33 = vld [vmem:[#allocation4_spill] sm:$0xff] }
 0x22a   :  { %v2826_v30 = vpop.eup %2825  ;;  %v3669_v28 = vadd.f32 %v836_v13, %v835_v3  ;;  %v2602_v3 = vmul.f32 -1.442695, %v3652_v62 }
 0x22b   :  { %v832_v25 = vadd.f32 1.0, %v2826_v30 }
 0x22c   :  { %2827 = vtanh.f32 %v3669_v28 }
 0x22d   :  { %2829 = vrcp.f32 %v832_v25  ;;  %v693_v25 = vmul.f32 0.0, %v3661_v43  ;;  %v4851_v43 = vld [vmem:[#allocation28_spill] sm:$0xff] }
 0x22e   :  { %2831 = vpow2.f32 %v2602_v3 }
 0x236   :  { %v2828_v38 = vpop.eup %2827 }
 0x237   :  { %v2830_v60 = vpop.eup %2829 }
 0x238   :  { %v839_v41 = vmul.f32 %v2830_v60, %v2828_v38  ;;  %v2832_v13 = vpop.eup %2831 }
 0x239   :  { %v690_v30 = vadd.f32 1.0, %v2832_v13 }
 0x23a   :  { %v3672_v59 = vpack.c.bf16 %v839_v41, %v839_v41  ;;  %vm840_vm1 = vcmp.gt.f32.partialorder %v839_v41, 0.0  ;;  %v841_v37 = vmul.f32 0.01, %v839_v41 }
 0x23b   :  { %2833 = vrcp.f32 %v690_v30  ;;  %v4852_v30 = vld [vmem:[#allocation32_spill] sm:$0xff] }
 0x23c   :  { %1020 = vmatmul.mubr.bf16.vlgmr.msra.gmra.mrb[16].mxu1 %v3672_v59  ;;  %v842_v2 = vsel %vm840_vm1, %v839_v41, %v841_v37 }
 0x23d   :  { %v843_v42 = vpack.c.bf16 %v842_v2, %v842_v2  ;;  %1102 = vmatpush1.bf16.msra.mxu1 %v3418_v44  ;;  %1133 = vmatprep.mubr.bf16.mxu1 %v4804_v63 }
 0x23e   :  { %1103 = vmatprep.subr.bf16.mxu1 %v3426_v45 }
 0x23f   :  { %877 = vmatmul.mubr.bf16.vlgmr.msra.gmra.mrb[8].mxu0 %v843_v42 }
 0x240   :  { %895 = vmatpush1.bf16.msra.mxu0 %v4827_v39  ;;  %926 = vmatprep.mubr.bf16.mxu0 %v4804_v63 }
 0x241   :  { %896 = vmatprep.subr.bf16.mxu0 %v4828_v32  ;;  %1104 = vmatpush1.bf16.msra.mxu1 %v3432_v46 }
 0x242   :  { %1105 = vmatprep.subr.bf16.mxu1 %v3440_v47 }
 0x244   :  { %897 = vmatpush1.bf16.msra.mxu0 %v4829_v40 }
 0x245   :  { %898 = vmatprep.subr.bf16.mxu0 %v4830_v27  ;;  %1106 = vmatpush1.bf16.msra.mxu1 %v3446_v48  ;;  %v2834_v41 = vpop.eup %2833 }
 0x246   :  { %1107 = vmatprep.subr.bf16.mxu1 %v3454_v49 }
 0x248   :  { %899 = vmatpush1.bf16.msra.mxu0 %v4831_v15 }
 0x249   :  { %900 = vmatprep.subr.bf16.mxu0 %v4832_v23  ;;  %1108 = vmatpush1.bf16.msra.mxu1 %v3460_v50 }
 0x24a   :  { %1109 = vmatprep.subr.bf16.mxu1 %v3468_v51 }
 0x24c   :  { %901 = vmatpush1.bf16.msra.mxu0 %v4833_v0 }
 0x24d   :  { %1028 = vmatprep.subr.bf16.mxu0 %v4834_v33  ;;  %1110 = vmatpush1.bf16.msra.mxu1 %v3473_v52 }
 0x24e   :  { %1111 = vmatprep.subr.bf16.mxu1 %v3479_v53 }
 0x251   :  { %1112 = vmatpush1.bf16.msra.mxu1 %v3487_v54 }
 0x252   :  { %1113 = vmatprep.subr.bf16.mxu1 %v3493_v55 }
 0x255   :  { %1114 = vmatpush1.bf16.msra.mxu1 %v3501_v56 }
 0x256   :  { %1115 = vmatprep.subr.bf16.mxu1 %v3508_v57 }
 0x259   :  { %1116 = vmatpush1.bf16.msra.mxu1 %v3515_v58 }
 0x25a   :  { %1151 = vmatprep.subr.bf16.mxu1 %v3360_v35 }
 0x290   :  { %v697_v38 = vpop.permute.xlu1 %696 }
 0x291   :  { %v3703_v60 = vadd.f32 %v697_v38, %v693_v25  ;;  %v4853_v38 = vld [vmem:[#allocation31_spill] sm:$0xff] }
 0x293   :  { %2835 = vtanh.f32 %v3703_v60 }
 0x29d   :  { %v2836_v37 = vpop.eup %2835 }
 0x29e   :  { %v701_v2 = vmul.f32 %v2836_v37, %v2834_v41  ;;  %v4854_v37 = vld [vmem:[#allocation34_spill] sm:$0xff] }
 0x2a0   :  { %v887_v42 = vpack.c.bf16 %v701_v2, %v701_v2 }
 0x2a2   :  { %889 = vrot.lane.b32.xlu0 %v887_v42, %s3102_s5  ;;  %v4855_v42 = vld [vmem:[#allocation33_spill] sm:$0xff] }
 0x2a6   :  { %971 = vperm.xlu0 %2705, %v2610_v36  }
 0x30f   :  { %v1021_v33 = vpop.f32.mrb[16].mxu1 }
 0x310   :  { %v1023_v62 = vpop.f32.mrb[17].mxu1 }
 0x311   :  { %v1025_v3 = vpop.f32.mrb[18].mxu1 }
 0x312   :  { %v1026_v35 = vpop.f32.mrb[19].mxu1 }
 0x313   :  { %v4850_v35 = vld [vmem:[#allocation19_spill] sm:$0xff] }
 0x314   :  { %v890_v13 = vpop.permute.xlu0 %889 }
 0x315   :  { %2607 = vmatmul.mubr.msk.bf16.vlgmr.msra.gmra.mrb[8].mxu0 %vm633_vm2, %v890_v13 }
 0x316   :  { %1029 = vmatpush1.bf16.msra.mxu0 %v3176_v4  ;;  %1060 = vmatprep.mubr.bf16.mxu0 %v4804_v63  ;;  %v4835_v4 = vld [vmem:[#allocation3_spill] sm:$0xff] }
 0x317   :  { %1030 = vmatprep.subr.bf16.mxu0 %v3189_v6  ;;  %v4836_v6 = vld [vmem:[#allocation5_spill] sm:$0xff] }
 0x31a   :  { %1031 = vmatpush1.bf16.msra.mxu0 %v3200_v8  ;;  %v4837_v8 = vld [vmem:[#allocation6_spill] sm:$0xff] }
 0x31b   :  { %1032 = vmatprep.subr.bf16.mxu0 %v3211_v10  ;;  %v4838_v10 = vld [vmem:[#allocation7_spill] sm:$0xff] }
 0x31e   :  { %1033 = vmatpush1.bf16.msra.mxu0 %v3221_v12  ;;  %v4839_v12 = vld [vmem:[#allocation8_spill] sm:$0xff] }
 0x31f   :  { %1034 = vmatprep.subr.bf16.mxu0 %v3235_v14  ;;  %v4840_v14 = vld [vmem:[#allocation9_spill] sm:$0xff] }
 0x322   :  { %1035 = vmatpush1.bf16.msra.mxu0 %v3247_v16  ;;  %v4841_v16 = vld [vmem:[#allocation10_spill] sm:$0xff] }
 0x323   :  { %1036 = vmatprep.subr.bf16.mxu0 %v3259_v18  ;;  %v4842_v18 = vld [vmem:[#allocation11_spill] sm:$0xff] }
 0x325   :  { %v972_v36 = vpop.permute.xlu0 %971 }
 0x326   :  { %1037 = vmatpush1.bf16.msra.mxu0 %v3269_v20  ;;  %v4843_v20 = vld [vmem:[#allocation12_spill] sm:$0xff]  ;;  %v974_v25 = vmul.f32 %v972_v36, %v4852_v30  ;;  %v975_v2 = vmul.f32 %v972_v36, %v4854_v37 }
 0x327   :  { %1038 = vmatprep.subr.bf16.mxu0 %v3283_v22  ;;  %v4844_v22 = vld [vmem:[#allocation13_spill] sm:$0xff] }
 0x32a   :  { %1039 = vmatpush1.bf16.msra.mxu0 %v3295_v24  ;;  %v4845_v24 = vld [vmem:[#allocation14_spill] sm:$0xff] }
 0x32b   :  { %1040 = vmatprep.subr.bf16.mxu0 %v3307_v26  ;;  %v4846_v26 = vld [vmem:[#allocation15_spill] sm:$0xff] }
 0x32e   :  { %1041 = vmatpush1.bf16.msra.mxu0 %v3322_v29  ;;  %v4847_v29 = vld [vmem:[#allocation16_spill] sm:$0xff] }
 0x32f   :  { %1042 = vmatprep.subr.bf16.mxu0 %v3334_v31  ;;  %v4848_v31 = vld [vmem:[#allocation17_spill] sm:$0xff] }
 0x332   :  { %1043 = vmatpush1.bf16.msra.mxu0 %v3347_v34  ;;  %v4849_v34 = vld [vmem:[#allocation18_spill] sm:$0xff] }
 0x333   :  { %1244 = vmatprep.subr.bf16.mxu0 %v4835_v4 }
 0x335   :  { %1061 = vmatmul.mubr.bf16.vlgmr.msra.gmra.mrb[12].mxu0 %v3672_v59  ;;  %v964_v59 = vpop.permute.xlu1 %963 }
 0x336   :  { %1245 = vmatpush1.bf16.msra.mxu0 %v4836_v6  ;;  %1276 = vmatprep.mubr.bf16.mxu0 %v4804_v63  ;;  %v966_v41 = vmul.f32 %v964_v59, %v4853_v38  ;;  %v967_v3 = vmul.f32 %v964_v59, %v4855_v42 }
 0x337   :  { %1246 = vmatprep.subr.bf16.mxu0 %v4837_v8 }
 0x338   :  { %v978_v13 = vadd.f32 %v974_v25, %v966_v41  ;;  %v979_v4 = vadd.f32 %v975_v2, %v967_v3  ;;  %v976_v25 = vmul.f32 %v972_v36, %v3569_v19  ;;  %v968_v41 = vmul.f32 %v964_v59, %v3567_v21 }
 0x339   :  { %v977_v2 = vmul.f32 %v972_v36, %v4826_v9 }
 0x33a   :  { %1247 = vmatpush1.bf16.msra.mxu0 %v4838_v10 }
 0x33b   :  { %1248 = vmatprep.subr.bf16.mxu0 %v4839_v12 }
 0x33e   :  { %1249 = vmatpush1.bf16.msra.mxu0 %v4840_v14  ;;  %v982_v14 = vadd.f32 %v978_v13, %v4824_v5 }
 0x33f   :  { %1250 = vmatprep.subr.bf16.mxu0 %v4841_v16 }
 0x342   :  { %1251 = vmatpush1.bf16.msra.mxu0 %v4842_v18 }
 0x343   :  { %1252 = vmatprep.subr.bf16.mxu0 %v4843_v20  ;;  %v4856_v20 = vld [vmem:[#allocation38_spill] sm:$0xff] }
 0x346   :  { %1253 = vmatpush1.bf16.msra.mxu0 %v4844_v22  ;;  %v983_v22 = vadd.f32 %v979_v4, %v4856_v20  ;;  %v980_v4 = vadd.f32 %v976_v25, %v968_v41 }
 0x347   :  { %1254 = vmatprep.subr.bf16.mxu0 %v4845_v24  ;;  %v1069_v24 = vadd.f32 %v1021_v33, %v982_v14  ;;  %v969_v33 = vmul.f32 %v964_v59, %v4825_v7  ;;  %v3767_v59 = vld [vmem:[%s4624_s0 + $0x18] sm:$0xff] }
 0x34a   :  { %1255 = vmatpush1.bf16.msra.mxu0 %v4846_v26  ;;  %v1070_v26 = vadd.f32 %v1023_v62, %v983_v22 }
 0x34b   :  { %1256 = vmatprep.subr.bf16.mxu0 %v4847_v29  ;;  %v2611_v29 = vmul.f32 -1.442695, %v1069_v24 }
 0x34e   :  { %1257 = vmatpush1.bf16.msra.mxu0 %v4848_v31  ;;  %v2612_v31 = vmul.f32 -1.442695, %v1070_v26 }
 0x34f   :  { %1258 = vmatprep.subr.bf16.mxu0 %v4849_v34 }
 0x352   :  { %1259 = vmatpush1.bf16.msra.mxu0 %v4850_v35 }
 0x353   :  { %1358 = vmatprep.subr.bf16.mxu0 %v4851_v43 }
 0x3e8   :  { %v928_v6 = vpop.f32.mrb[8].mxu0 }
 0x3e9   :  { %v2659_v8 = vadd.f32 %v928_v6, %v3643_v61  ;;  %v930_v10 = vpop.f32.mrb[9].mxu0 }
 0x3ea   :  { %v932_v12 = vpop.f32.mrb[10].mxu0  ;;  %v3751_v34 = vadd.f32 %v930_v10, %v3646_v1 }
 0x3eb   :  { %v2608_v16 = vmul.f32 -1.442695, %v2659_v8  ;;  %v933_v18 = vpop.f32.mrb[11].mxu0  ;;  %v981_v8 = vadd.f32 %v977_v2, %v969_v33 }
 0x3ed   :  { %2837 = vpow2.f32 %v2608_v16  ;;  %v984_v16 = vadd.f32 %v980_v4, %v3578_v17  ;;  %v985_v36 = vadd.f32 %v981_v8, %v3573_v11 }
 0x3ee   :  { %2839 = vpow2.f32 %v2611_v29 }
 0x3ef   :  { %2841 = vpow2.f32 %v2612_v31 }
 0x3f0   :  { %2843 = vtanh.f32 %v3751_v34 }
 0x3f7   :  { %v2838_v35 = vpop.eup %2837 }
 0x3f8   :  { %v940_v43 = vadd.f32 1.0, %v2838_v35  ;;  %v2840_v62 = vpop.eup %2839 }
 0x3f9   :  { %v2842_v3 = vpop.eup %2841  ;;  %v1076_v14 = vadd.f32 1.0, %v2840_v62 }
 0x3fa   :  { %2845 = vrcp.f32 %v940_v43  ;;  %v2844_v13 = vpop.eup %2843  ;;  %v1082_v10 = vadd.f32 1.0, %v2842_v3 }
 0x3fc   :  { %2847 = vrcp.f32 %v1082_v10 }
 0x3fd   :  { %2849 = vrcp.f32 %v1076_v14 }
 0x404   :  { %v3758_v6 = vpop.eup %2845 }
 0x405   :  { %v951_v12 = vmul.f32 %v3758_v6, %v2844_v13 }
 0x406   :  { %v2848_v43 = vpop.eup %2847 }
 0x407   :  { %953 = vrot.lane.b32.xlu1 %v951_v12, %s3102_s5  ;;  %v2850_v25 = vpop.eup %2849  ;;  %v1092_v2 = vmul.f32 %v2848_v43, %v3669_v28  ;;  %v3929_v43 = vld [vmem:[%s4623_s3 + $0x24] ss:$16 sps:$4 sm:$0xff]  }
 0x408   :  { %v1062_v18 = vpop.f32.mrb[12].mxu0  ;;  %4866 = vst [vmem:[#allocation24_spill] sm:$0xff] %v3929_v43 }
 0x409   :  { %v1071_v22 = vadd.f32 %v1062_v18, %v984_v16  ;;  %v1064_v24 = vpop.f32.mrb[13].mxu0 }
 0x40a   :  { %v1072_v26 = vadd.f32 %v1064_v24, %v985_v36  ;;  %v1066_v29 = vpop.f32.mrb[14].mxu0  ;;  %v3879_v36 = vld [vmem:[%s4623_s3 + $0xac] ss:$16 sps:$4 sm:$0xff]   ;;  %v3897_v24 = vld [vmem:[%s4623_s3 + $0xc8] ss:$16 sps:$4 sm:$0xff]  }
 0x40b   :  { %2851 = vtanh.f32 %v1071_v22  ;;  %v1067_v31 = vpop.f32.mrb[15].mxu0  ;;  %1220 = vperm.xlu1 %2708, %v3767_v59   ;;  %v3891_v22 = vld [vmem:[%s4623_s3 + $0xcc] ss:$16 sps:$4 sm:$0xff]   ;;  %4861 = vst [vmem:[#allocation35_spill] sm:$0xff] %v3897_v24  ;;  %v3909_v29 = vld [vmem:[%s4623_s3 + $0xe8] ss:$16 sps:$4 sm:$0xff]  }
 0x40c   :  { %v2613_v35 = vmul.f32 -1.442695, %v1072_v26  ;;  %4860 = vst [vmem:[#allocation37_spill] sm:$0xff] %v3891_v22  ;;  %v3903_v26 = vld [vmem:[%s4623_s3 + $0xec] ss:$16 sps:$4 sm:$0xff]   ;;  %4863 = vst [vmem:[#allocation21_spill] sm:$0xff] %v3909_v29 }
 0x40d   :  { %4862 = vst [vmem:[#allocation36_spill] sm:$0xff] %v3903_v26  ;;  %v3915_v31 = vld [vmem:[%s4623_s3 + $0x4] ss:$16 sps:$4 sm:$0xff]  }
 0x40e   :  { %2853 = vpow2.f32 %v2613_v35  ;;  %4864 = vst [vmem:[#allocation22_spill] sm:$0xff] %v3915_v31  ;;  %v3922_v35 = vld [vmem:[%s4623_s3] ss:$16 sps:$4 sm:$0xff]  }
 0x40f   :  { %4865 = vst [vmem:[#allocation23_spill] sm:$0xff] %v3922_v35 }
 0x415   :  { %v2852_v41 = vpop.eup %2851 }
 0x416   :  { %v1093_v33 = vmul.f32 %v2852_v41, %v2850_v25  ;;  %v3935_v25 = vld [vmem:[%s4623_s3 + $0x20] ss:$16 sps:$4 sm:$0xff]   ;;  %v3941_v41 = vld [vmem:[%s4623_s3 + $0x44] ss:$16 sps:$4 sm:$0xff]  }
 0x417   :  { %4867 = vst [vmem:[#allocation25_spill] sm:$0xff] %v3935_v25  ;;  %4868 = vst [vmem:[#allocation26_spill] sm:$0xff] %v3941_v41 }
 0x418   :  { %v2854_v62 = vpop.eup %2853  ;;  %v3771_v3 = vadd.f32 %v1093_v33, %v1092_v2  ;;  %v3947_v2 = vld [vmem:[%s4623_s3 + $0x40] ss:$16 sps:$4 sm:$0xff]   ;;  %v3953_v33 = vld [vmem:[%s4623_s3 + $0x64] ss:$16 sps:$4 sm:$0xff]  }
 0x419   :  { %v1089_v13 = vadd.f32 1.0, %v2854_v62  ;;  %4869 = vst [vmem:[#allocation27_spill] sm:$0xff] %v3947_v2  ;;  %4870 = vst [vmem:[#allocation4_spill] sm:$0xff] %v3953_v33  ;;  %v3959_v62 = vld [vmem:[%s4623_s3 + $0x60] ss:$16 sps:$4 sm:$0xff]  }
 0x41a   :  { %2855 = vtanh.f32 %v3771_v3  ;;  %4871 = vst [vmem:[#allocation3_spill] sm:$0xff] %v3959_v62 }
 0x41b   :  { %2857 = vrcp.f32 %v1089_v13  ;;  %v3965_v13 = vld [vmem:[%s4623_s3 + $0x84] ss:$16 sps:$4 sm:$0xff]  }
 0x41c   :  { %4872 = vst [vmem:[#allocation5_spill] sm:$0xff] %v3965_v13 }
 0x424   :  { %v2856_v4 = vpop.eup %2855 }
 0x425   :  { %v2858_v8 = vpop.eup %2857 }
 0x426   :  { %v1096_v10 = vmul.f32 %v2858_v8, %v2856_v4  ;;  %v3971_v4 = vld [vmem:[%s4623_s3 + $0x80] ss:$16 sps:$4 sm:$0xff]   ;;  %v3977_v8 = vld [vmem:[%s4623_s3 + $0xa4] ss:$16 sps:$4 sm:$0xff]  }
 0x427   :  { %4873 = vst [vmem:[#allocation6_spill] sm:$0xff] %v3971_v4  ;;  %4874 = vst [vmem:[#allocation7_spill] sm:$0xff] %v3977_v8 }
 0x428   :  { %v3774_v12 = vpack.c.bf16 %v1096_v10, %v1096_v10  ;;  %vm1097_vm3 = vcmp.gt.f32.partialorder %v1096_v10, 0.0  ;;  %v1098_v14 = vmul.f32 0.01, %v1096_v10 }
 0x42a   :  { %1277 = vmatmul.mubr.bf16.vlgmr.msra.gmra.mrb[16].mxu0 %v3774_v12  ;;  %v1099_v16 = vsel %vm1097_vm3, %v1096_v10, %v1098_v14  ;;  %v3983_v10 = vld [vmem:[%s4623_s3 + $0xa0] ss:$16 sps:$4 sm:$0xff]  }
 0x42b   :  { %v1100_v18 = vpack.c.bf16 %v1099_v16, %v1099_v16  ;;  %1359 = vmatpush1.bf16.msra.mxu0 %v3418_v44  ;;  %1390 = vmatprep.mubr.bf16.mxu0 %v4804_v63  ;;  %v3797_v44 = vld [vmem:[%s4623_s3 + $0xc] ss:$16 sps:$4 sm:$0xff]   ;;  %4875 = vst [vmem:[#allocation8_spill] sm:$0xff] %v3983_v10  ;;  %v3995_v14 = vld [vmem:[%s4623_s3 + $0xc0] ss:$16 sps:$4 sm:$0xff]  }
 0x42c   :  { %1360 = vmatprep.subr.bf16.mxu0 %v3426_v45  ;;  %4857 = vst [vmem:[#allocation29_spill] sm:$0xff] %v3797_v44  ;;  %v4858_v45 = vld [vmem:[#allocation20_spill] sm:$0xff]  ;;  %4877 = vst [vmem:[#allocation10_spill] sm:$0xff] %v3995_v14  ;;  %v4001_v16 = vld [vmem:[%s4623_s3 + $0xe4] ss:$16 sps:$4 sm:$0xff]  }
 0x42d   :  { %1134 = vmatmul.mubr.bf16.vlgmr.msra.gmra.mrb[20].mxu1 %v1100_v18  ;;  %4878 = vst [vmem:[#allocation11_spill] sm:$0xff] %v4001_v16  ;;  %v4007_v18 = vld [vmem:[%s4623_s3 + $0xe0] ss:$16 sps:$4 sm:$0xff]  }
 0x42e   :  { %1152 = vmatpush1.bf16.msra.mxu1 %v4827_v39  ;;  %1183 = vmatprep.mubr.bf16.mxu1 %v4804_v63  ;;  %v3824_v39 = vld [vmem:[%s4623_s3 + $0x8] ss:$16 sps:$4 sm:$0xff]   ;;  %4879 = vst [vmem:[#allocation12_spill] sm:$0xff] %v4007_v18 }
 0x42f   :  { %1153 = vmatprep.subr.bf16.mxu1 %v4828_v32  ;;  %1361 = vmatpush1.bf16.msra.mxu0 %v3432_v46  ;;  %v2609_v46 = vmul.f32 -1.442695, %v3751_v34  ;;  %v3867_v34 = vld [vmem:[%s4623_s3 + $0x8c] ss:$16 sps:$4 sm:$0xff]  }
 0x430   :  { %1362 = vmatprep.subr.bf16.mxu0 %v3440_v47 }
 0x431   :  { %2859 = vpow2.f32 %v2609_v46 }
 0x432   :  { %1154 = vmatpush1.bf16.msra.mxu1 %v4829_v40  ;;  %v3831_v40 = vld [vmem:[%s4623_s3 + $0x2c] ss:$16 sps:$4 sm:$0xff]  }
 0x433   :  { %1155 = vmatprep.subr.bf16.mxu1 %v4830_v27  ;;  %1363 = vmatpush1.bf16.msra.mxu0 %v3446_v48  ;;  %v3837_v27 = vld [vmem:[%s4623_s3 + $0x28] ss:$16 sps:$4 sm:$0xff]  }
 0x434   :  { %1364 = vmatprep.subr.bf16.mxu0 %v3454_v49  ;;  %v950_v49 = vmul.f32 %v3758_v6, %v3703_v60  ;;  %v3861_v60 = vld [vmem:[%s4623_s3 + $0x68] ss:$16 sps:$4 sm:$0xff]  }
 0x435   :  { %v3873_v6 = vld [vmem:[%s4623_s3 + $0x88] ss:$16 sps:$4 sm:$0xff]  }
 0x436   :  { %1156 = vmatpush1.bf16.msra.mxu1 %v4831_v15  ;;  %v3843_v15 = vld [vmem:[%s4623_s3 + $0x4c] ss:$16 sps:$4 sm:$0xff]  }
 0x437   :  { %1157 = vmatprep.subr.bf16.mxu1 %v4832_v23  ;;  %1365 = vmatpush1.bf16.msra.mxu0 %v3460_v50  ;;  %v3849_v23 = vld [vmem:[%s4623_s3 + $0x48] ss:$16 sps:$4 sm:$0xff]  }
 0x438   :  { %1366 = vmatprep.subr.bf16.mxu0 %v3468_v51 }
 0x43a   :  { %1158 = vmatpush1.bf16.msra.mxu1 %v4833_v0  ;;  %v3855_v0 = vld [vmem:[%s4623_s3 + $0x6c] ss:$16 sps:$4 sm:$0xff]  }
 0x43b   :  { %1285 = vmatprep.subr.bf16.mxu1 %v3797_v44  ;;  %1367 = vmatpush1.bf16.msra.mxu0 %v3473_v52  ;;  %v2860_v47 = vpop.eup %2859 }
 0x43c   :  { %1368 = vmatprep.subr.bf16.mxu0 %v3479_v53  ;;  %v947_v48 = vadd.f32 1.0, %v2860_v47 }
 0x43e   :  { %2861 = vrcp.f32 %v947_v48 }
 0x43f   :  { %1369 = vmatpush1.bf16.msra.mxu0 %v3487_v54 }
 0x440   :  { %1370 = vmatprep.subr.bf16.mxu0 %v3493_v55 }
 0x443   :  { %1371 = vmatpush1.bf16.msra.mxu0 %v3501_v56 }
 0x444   :  { %1372 = vmatprep.subr.bf16.mxu0 %v3508_v57 }
 0x447   :  { %1373 = vmatpush1.bf16.msra.mxu0 %v3515_v58 }
 0x448   :  { %1408 = vmatprep.subr.bf16.mxu0 %v4858_v45  ;;  %v2862_v52 = vpop.eup %2861  ;;  %v4013_v45 = vld [vmem:[%s4626_s4 + $0x4] ss:$8 sps:$4 sm:$0xff]  }
 0x449   :  { %4880 = vst [vmem:[#allocation13_spill] sm:$0xff] %v4013_v45 }
 0x479   :  { %v954_v50 = vpop.permute.xlu1 %953 }
 0x47a   :  { %v3811_v51 = vadd.f32 %v954_v50, %v950_v49 }
 0x47c   :  { %2863 = vtanh.f32 %v3811_v51 }
 0x486   :  { %v2864_v53 = vpop.eup %2863 }
 0x487   :  { %v958_v54 = vmul.f32 %v2864_v53, %v2862_v52 }
 0x489   :  { %v1144_v55 = vpack.c.bf16 %v958_v54, %v958_v54 }
 0x48a   :  { %v1221_v47 = vpop.permute.xlu1 %1220 }
 0x48b   :  { %1146 = vrot.lane.b32.xlu0 %v1144_v55, %s3102_s5  ;;  %v1223_v50 = vmul.f32 %v1221_v47, %v4853_v38  ;;  %v1224_v52 = vmul.f32 %v1221_v47, %v4855_v42 }
 0x48f   :  { %1228 = vperm.xlu0 %2705, %v3767_v59   ;;  %v3885_v59 = vld [vmem:[%s4623_s3 + $0xa8] ss:$16 sps:$4 sm:$0xff]  }
 0x490   :  { %4859 = vst [vmem:[#allocation30_spill] sm:$0xff] %v3885_v59 }
 0x4fd   :  { %v3816_v56 = vpop.f32.mrb[16].mxu0  ;;  %v1147_v57 = vpop.permute.xlu0 %1146 }
 0x4fe   :  { %v3818_v58 = vpop.f32.mrb[17].mxu0  ;;  %2614 = vmatmul.mubr.msk.bf16.vlgmr.msra.gmra.mrb[20].mxu1 %vm633_vm2, %v1147_v57 }
 0x4ff   :  { %v1282_v28 = vpop.f32.mrb[18].mxu0  ;;  %1286 = vmatpush1.bf16.msra.mxu1 %v3824_v39  ;;  %1317 = vmatprep.mubr.bf16.mxu1 %v4804_v63 }
 0x500   :  { %v1283_v32 = vpop.f32.mrb[19].mxu0  ;;  %1287 = vmatprep.subr.bf16.mxu1 %v3831_v40 }
 0x503   :  { %1288 = vmatpush1.bf16.msra.mxu1 %v3837_v27 }
 0x504   :  { %1289 = vmatprep.subr.bf16.mxu1 %v3843_v15 }
 0x507   :  { %1290 = vmatpush1.bf16.msra.mxu1 %v3849_v23 }
 0x508   :  { %1291 = vmatprep.subr.bf16.mxu1 %v3855_v0 }
 0x50b   :  { %1292 = vmatpush1.bf16.msra.mxu1 %v3861_v60 }
 0x50c   :  { %1293 = vmatprep.subr.bf16.mxu1 %v3867_v34 }
 0x50e   :  { %v1229_v46 = vpop.permute.xlu0 %1228 }
 0x50f   :  { %1294 = vmatpush1.bf16.msra.mxu1 %v3873_v6  ;;  %v1231_v48 = vmul.f32 %v1229_v46, %v4852_v30  ;;  %v1232_v49 = vmul.f32 %v1229_v46, %v4854_v37 }
 0x510   :  { %1295 = vmatprep.subr.bf16.mxu1 %v3879_v36 }
 0x511   :  { %v1235_v53 = vadd.f32 %v1231_v48, %v1223_v50  ;;  %v1236_v54 = vadd.f32 %v1232_v49, %v1224_v52 }
 0x513   :  { %1296 = vmatpush1.bf16.msra.mxu1 %v3885_v59 }
 0x514   :  { %1297 = vmatprep.subr.bf16.mxu1 %v3891_v22 }
 0x517   :  { %1298 = vmatpush1.bf16.msra.mxu1 %v3897_v24 }
 0x518   :  { %1299 = vmatprep.subr.bf16.mxu1 %v3903_v26 }
 0x51b   :  { %1300 = vmatpush1.bf16.msra.mxu1 %v3909_v29 }
 0x51c   :  { %1501 = vmatprep.subr.bf16.mxu1 %v3915_v31 }
 0x51e   :  { %1318 = vmatmul.mubr.bf16.vlgmr.msra.gmra.mrb[24].mxu1 %v3774_v12  ;;  %v3989_v12 = vld [vmem:[%s4623_s3 + $0xc4] ss:$16 sps:$4 sm:$0xff]  }
 0x51f   :  { %1502 = vmatpush1.bf16.msra.mxu1 %v3922_v35  ;;  %1533 = vmatprep.mubr.bf16.mxu1 %v4804_v63  ;;  %4876 = vst [vmem:[#allocation9_spill] sm:$0xff] %v3989_v12 }
 0x520   :  { %1503 = vmatprep.subr.bf16.mxu1 %v3929_v43 }
 0x523   :  { %1504 = vmatpush1.bf16.msra.mxu1 %v3935_v25 }
 0x524   :  { %1505 = vmatprep.subr.bf16.mxu1 %v3941_v41 }
 0x527   :  { %1506 = vmatpush1.bf16.msra.mxu1 %v3947_v2 }
 0x528   :  { %1507 = vmatprep.subr.bf16.mxu1 %v3953_v33 }
 0x52b   :  { %1508 = vmatpush1.bf16.msra.mxu1 %v3959_v62 }
 0x52c   :  { %1509 = vmatprep.subr.bf16.mxu1 %v3965_v13 }
 0x52f   :  { %1510 = vmatpush1.bf16.msra.mxu1 %v3971_v4 }
 0x530   :  { %1511 = vmatprep.subr.bf16.mxu1 %v3977_v8 }
 0x533   :  { %1512 = vmatpush1.bf16.msra.mxu1 %v3983_v10 }
 0x534   :  { %1513 = vmatprep.subr.bf16.mxu1 %v3989_v12 }
 0x537   :  { %1514 = vmatpush1.bf16.msra.mxu1 %v3995_v14  ;;  %v1240_v14 = vadd.f32 %v1236_v54, %v4856_v20 }
 0x538   :  { %1515 = vmatprep.subr.bf16.mxu1 %v4001_v16 }
 0x539   :  { %v1327_v38 = vadd.f32 %v3818_v58, %v1240_v14 }
 0x53b   :  { %1516 = vmatpush1.bf16.msra.mxu1 %v4007_v18  ;;  %v1239_v18 = vadd.f32 %v1235_v53, %v4824_v5  ;;  %v2619_v42 = vmul.f32 -1.442695, %v1327_v38  ;;  %v1226_v38 = vmul.f32 %v1221_v47, %v4825_v7 }
 0x53c   :  { %1615 = vmatprep.subr.bf16.mxu1 %v4013_v45 }
 0x53d   :  { %v1326_v37 = vadd.f32 %v3816_v56, %v1239_v18  ;;  %v1225_v56 = vmul.f32 %v1221_v47, %v3567_v21  ;;  %v4042_v47 = vld [vmem:[%s4624_s0 + $0x20] sm:$0xff] }
 0x53f   :  { %v2618_v30 = vmul.f32 -1.442695, %v1326_v37 }
 0x5d1   :  { %v1185_v55 = vpop.f32.mrb[20].mxu1 }
 0x5d2   :  { %v2661_v57 = vadd.f32 %v1185_v55, %v3643_v61  ;;  %v1187_v28 = vpop.f32.mrb[21].mxu1 }
 0x5d3   :  { %v1189_v32 = vpop.f32.mrb[22].mxu1  ;;  %v4026_v48 = vadd.f32 %v1187_v28, %v3646_v1 }
 0x5d4   :  { %v2615_v45 = vmul.f32 -1.442695, %v2661_v57  ;;  %v1190_v16 = vpop.f32.mrb[23].mxu1 }
 0x5d5   :  { %v1233_v16 = vmul.f32 %v1229_v46, %v3569_v19 }
 0x5d6   :  { %2865 = vpow2.f32 %v2615_v45  ;;  %v1234_v45 = vmul.f32 %v1229_v46, %v4826_v9 }
 0x5d7   :  { %2867 = vpow2.f32 %v2618_v30  ;;  %v1237_v14 = vadd.f32 %v1233_v16, %v1225_v56 }
 0x5d8   :  { %2869 = vpow2.f32 %v2619_v42  ;;  %v1238_v30 = vadd.f32 %v1234_v45, %v1226_v38 }
 0x5d9   :  { %2871 = vtanh.f32 %v4026_v48  ;;  %v1241_v55 = vadd.f32 %v1237_v14, %v3578_v17 }
 0x5da   :  { %v1242_v57 = vadd.f32 %v1238_v30, %v3573_v11 }
 0x5e0   :  { %v2866_v49 = vpop.eup %2865 }
 0x5e1   :  { %v1197_v50 = vadd.f32 1.0, %v2866_v49  ;;  %v2868_v52 = vpop.eup %2867 }
 0x5e2   :  { %v2870_v58 = vpop.eup %2869  ;;  %v1333_v54 = vadd.f32 1.0, %v2868_v52 }
 0x5e3   :  { %2873 = vrcp.f32 %v1197_v50  ;;  %v2872_v37 = vpop.eup %2871  ;;  %v1339_v42 = vadd.f32 1.0, %v2870_v58 }
 0x5e5   :  { %2875 = vrcp.f32 %v1339_v42 }
 0x5e6   :  { %2877 = vrcp.f32 %v1333_v54 }
 0x5ed   :  { %v4033_v18 = vpop.eup %2873 }
 0x5ee   :  { %v1208_v53 = vmul.f32 %v4033_v18, %v2872_v37 }
 0x5ef   :  { %v2876_v52 = vpop.eup %2875 }
 0x5f0   :  { %1210 = vrot.lane.b32.xlu1 %v1208_v53, %s3102_s5  ;;  %v2878_v56 = vpop.eup %2877  ;;  %v1349_v38 = vmul.f32 %v2876_v52, %v3771_v3  ;;  %v4055_v3 = vld [vmem:[%s4626_s4] ss:$8 sps:$4 sm:$0xff]   ;;  %v4087_v52 = vld [vmem:[%s4626_s4 + $0x24] ss:$8 sps:$4 sm:$0xff]  }
 0x5f1   :  { %v1319_v46 = vpop.f32.mrb[24].mxu1 }
 0x5f2   :  { %v1328_v28 = vadd.f32 %v1319_v46, %v1241_v55  ;;  %v1321_v32 = vpop.f32.mrb[25].mxu1 }
 0x5f3   :  { %v1329_v49 = vadd.f32 %v1321_v32, %v1242_v57  ;;  %v1323_v50 = vpop.f32.mrb[26].mxu1 }
 0x5f4   :  { %2879 = vtanh.f32 %v1328_v28  ;;  %v1324_v16 = vpop.f32.mrb[27].mxu1  ;;  %1477 = vperm.xlu1 %2708, %v4042_v47   ;;  %v4068_v50 = vld [vmem:[%s4625_s6] ss:$8 sps:$4 sm:$0xff]  }
 0x5f5   :  { %v2620_v45 = vmul.f32 -1.442695, %v1329_v49  ;;  %v4062_v49 = vld [vmem:[%s4626_s4 + $0x14] ss:$8 sps:$4 sm:$0xff]  }
 0x5f6   :  { %v4075_v16 = vld [vmem:[%s4625_s6 + $0x14] ss:$8 sps:$4 sm:$0xff]  }
 0x5f7   :  { %2881 = vpow2.f32 %v2620_v45  ;;  %v4081_v45 = vld [vmem:[%s4626_s4 + $0x10] ss:$8 sps:$4 sm:$0xff]  }
 0x5fe   :  { %v2880_v58 = vpop.eup %2879 }
 0x5ff   :  { %v1350_v37 = vmul.f32 %v2880_v58, %v2878_v56  ;;  %v4093_v56 = vld [vmem:[%s4625_s6 + $0x10] ss:$8 sps:$4 sm:$0xff]   ;;  %v4099_v58 = vld [vmem:[%s4625_s6 + $0x24] ss:$8 sps:$4 sm:$0xff]  }
 0x601   :  { %v2882_v14 = vpop.eup %2881  ;;  %v4046_v30 = vadd.f32 %v1350_v37, %v1349_v38  ;;  %v4105_v38 = vld [vmem:[%s4626_s4 + $0x20] ss:$8 sps:$4 sm:$0xff]   ;;  %v4111_v37 = vld [vmem:[%s4626_s4 + $0x34] ss:$8 sps:$4 sm:$0xff]  }
 0x602   :  { %v1346_v42 = vadd.f32 1.0, %v2882_v14  ;;  %4881 = vst [vmem:[#allocation14_spill] sm:$0xff] %v4105_v38  ;;  %4882 = vst [vmem:[#allocation15_spill] sm:$0xff] %v4111_v37  ;;  %v4117_v14 = vld [vmem:[%s4625_s6 + $0x20] ss:$8 sps:$4 sm:$0xff]  }
 0x603   :  { %2883 = vtanh.f32 %v4046_v30  ;;  %4883 = vst [vmem:[#allocation16_spill] sm:$0xff] %v4117_v14 }
 0x604   :  { %2885 = vrcp.f32 %v1346_v42  ;;  %v4123_v42 = vld [vmem:[%s4625_s6 + $0x34] ss:$8 sps:$4 sm:$0xff]  }
 0x605   :  { %4884 = vst [vmem:[#allocation17_spill] sm:$0xff] %v4123_v42 }
 0x60d   :  { %v2884_v53 = vpop.eup %2883 }
 0x60e   :  { %v2886_v54 = vpop.eup %2885 }
 0x60f   :  { %v1353_v55 = vmul.f32 %v2886_v54, %v2884_v53  ;;  %v4129_v53 = vld [vmem:[%s4626_s4 + $0x30] ss:$8 sps:$4 sm:$0xff]   ;;  %v4135_v54 = vld [vmem:[%s4626_s4 + $0x44] ss:$8 sps:$4 sm:$0xff]  }
 0x610   :  { %4885 = vst [vmem:[#allocation18_spill] sm:$0xff] %v4129_v53  ;;  %4886 = vst [vmem:[#allocation19_spill] sm:$0xff] %v4135_v54 }
 0x611   :  { %v4049_v46 = vpack.c.bf16 %v1353_v55, %v1353_v55  ;;  %vm1354_vm4 = vcmp.gt.f32.partialorder %v1353_v55, 0.0  ;;  %v1355_v57 = vmul.f32 0.01, %v1353_v55 }
 0x613   :  { %1534 = vmatmul.mubr.bf16.vlgmr.msra.gmra.mrb[28].mxu1 %v4049_v46  ;;  %v1356_v28 = vsel %vm1354_vm4, %v1353_v55, %v1355_v57  ;;  %v4141_v55 = vld [vmem:[%s4625_s6 + $0x30] ss:$8 sps:$4 sm:$0xff]   ;;  %v4148_v57 = vld [vmem:[%s4626_s4 + $0x40] ss:$8 sps:$4 sm:$0xff]  }
 0x614   :  { %v1357_v32 = vpack.c.bf16 %v1356_v28, %v1356_v28  ;;  %1616 = vmatpush1.bf16.msra.mxu1 %v4055_v3  ;;  %1647 = vmatprep.mubr.bf16.mxu1 %v4804_v63  ;;  %4887 = vst [vmem:[#allocation28_spill] sm:$0xff] %v4141_v55  ;;  %4888 = vst [vmem:[#allocation38_spill] sm:$0xff] %v4148_v57  ;;  %v4154_v28 = vld [vmem:[%s4626_s4 + $0x54] ss:$8 sps:$4 sm:$0xff]  }
 0x615   :  { %1617 = vmatprep.subr.bf16.mxu1 %v4062_v49  ;;  %4889 = vst [vmem:[#allocation20_spill] sm:$0xff] %v4154_v28 }
 0x616   :  { %1391 = vmatmul.mubr.bf16.vlgmr.msra.gmra.mrb[20].mxu0 %v1357_v32  ;;  %v4160_v32 = vld [vmem:[%s4626_s4 + $0x50] ss:$8 sps:$4 sm:$0xff]  }
 0x617   :  { %1409 = vmatpush1.bf16.msra.mxu0 %v4068_v50  ;;  %1440 = vmatprep.mubr.bf16.mxu0 %v4804_v63  ;;  %4890 = vst [vmem:[#allocation39_spill] sm:$0xff] %v4160_v32 }
 0x618   :  { %1410 = vmatprep.subr.bf16.mxu0 %v4075_v16  ;;  %1618 = vmatpush1.bf16.msra.mxu1 %v4081_v45 }
 0x619   :  { %1619 = vmatprep.subr.bf16.mxu1 %v4087_v52 }
 0x61b   :  { %1411 = vmatpush1.bf16.msra.mxu0 %v4093_v56 }
 0x61c   :  { %1412 = vmatprep.subr.bf16.mxu0 %v4099_v58  ;;  %1620 = vmatpush1.bf16.msra.mxu1 %v4105_v38 }
 0x61d   :  { %1621 = vmatprep.subr.bf16.mxu1 %v4111_v37 }
 0x61f   :  { %1413 = vmatpush1.bf16.msra.mxu0 %v4117_v14 }
 0x620   :  { %1414 = vmatprep.subr.bf16.mxu0 %v4123_v42  ;;  %1622 = vmatpush1.bf16.msra.mxu1 %v4129_v53 }
 0x621   :  { %1623 = vmatprep.subr.bf16.mxu1 %v4135_v54 }
 0x623   :  { %1415 = vmatpush1.bf16.msra.mxu0 %v4141_v55 }
 0x624   :  { %1542 = vmatprep.subr.bf16.mxu0 %v3797_v44  ;;  %1624 = vmatpush1.bf16.msra.mxu1 %v4148_v57  ;;  %v4166_v44 = vld [vmem:[%s4626_s4 + $0x64] ss:$8 sps:$4 sm:$0xff]   ;;  %v4172_v57 = vld [vmem:[%s4626_s4 + $0x60] ss:$8 sps:$4 sm:$0xff]  }
 0x625   :  { %1625 = vmatprep.subr.bf16.mxu1 %v4154_v28  ;;  %4891 = vst [vmem:[#allocation40_spill] sm:$0xff] %v4166_v44  ;;  %4892 = vst [vmem:[#allocation41_spill] sm:$0xff] %v4172_v57  ;;  %v4178_v28 = vld [vmem:[%s4626_s4 + $0x74] ss:$8 sps:$4 sm:$0xff]  }
 0x626   :  { %4893 = vst [vmem:[#allocation42_spill] sm:$0xff] %v4178_v28 }
 0x628   :  { %1626 = vmatpush1.bf16.msra.mxu1 %v4160_v32  ;;  %v4184_v32 = vld [vmem:[%s4626_s4 + $0x70] ss:$8 sps:$4 sm:$0xff]  }
 0x629   :  { %1627 = vmatprep.subr.bf16.mxu1 %v4166_v44  ;;  %4894 = vst [vmem:[#allocation43_spill] sm:$0xff] %v4184_v32  ;;  %v4190_v44 = vld [vmem:[%s4625_s6 + $0x4] ss:$8 sps:$4 sm:$0xff]  }
 0x62c   :  { %1628 = vmatpush1.bf16.msra.mxu1 %v4172_v57  ;;  %v2616_v57 = vmul.f32 -1.442695, %v4026_v48 }
 0x62d   :  { %1629 = vmatprep.subr.bf16.mxu1 %v4178_v28  ;;  %v1207_v28 = vmul.f32 %v4033_v18, %v3811_v51 }
 0x62e   :  { %2887 = vpow2.f32 %v2616_v57 }
 0x630   :  { %1630 = vmatpush1.bf16.msra.mxu1 %v4184_v32 }
 0x631   :  { %1665 = vmatprep.subr.bf16.mxu1 %v4190_v44 }
 0x638   :  { %v2888_v55 = vpop.eup %2887 }
 0x639   :  { %v1204_v54 = vadd.f32 1.0, %v2888_v55 }
 0x63b   :  { %2889 = vrcp.f32 %v1204_v54  ;;  %v4899_v54 = vld [vmem:[#allocation32_spill] sm:$0xff] }
 0x645   :  { %v2890_v32 = vpop.eup %2889 }
 0x662   :  { %v1211_v53 = vpop.permute.xlu1 %1210 }
 0x663   :  { %v4196_v42 = vadd.f32 %v1211_v53, %v1207_v28 }
 0x665   :  { %2891 = vtanh.f32 %v4196_v42 }
 0x66f   :  { %v2892_v14 = vpop.eup %2891 }
 0x670   :  { %v1215_v37 = vmul.f32 %v2892_v14, %v2890_v32  ;;  %v4900_v32 = vld [vmem:[#allocation34_spill] sm:$0xff] }
 0x672   :  { %v1401_v38 = vpack.c.bf16 %v1215_v37, %v1215_v37  ;;  %v4898_v37 = vld [vmem:[#allocation13_spill] sm:$0xff] }
 0x673   :  { %v1478_v53 = vpop.permute.xlu1 %1477 }
 0x674   :  { %1403 = vrot.lane.b32.xlu0 %v1401_v38, %s3102_s5  ;;  %v4897_v38 = vld [vmem:[#allocation12_spill] sm:$0xff] }
 0x678   :  { %1485 = vperm.xlu0 %2705, %v4042_v47   ;;  %v4895_v47 = vld [vmem:[#allocation10_spill] sm:$0xff] }
 0x6e6   :  { %v1535_v48 = vpop.f32.mrb[28].mxu1  ;;  %v1404_v57 = vpop.permute.xlu0 %1403 }
 0x6e7   :  { %v1537_v55 = vpop.f32.mrb[29].mxu1  ;;  %2621 = vmatmul.mubr.msk.bf16.vlgmr.msra.gmra.mrb[20].mxu0 %vm633_vm2, %v1404_v57 }
 0x6e8   :  { %v1539_v51 = vpop.f32.mrb[30].mxu1  ;;  %1543 = vmatpush1.bf16.msra.mxu0 %v3824_v39  ;;  %1574 = vmatprep.mubr.bf16.mxu0 %v4804_v63 }
 0x6e9   :  { %v1540_v18 = vpop.f32.mrb[31].mxu1  ;;  %1544 = vmatprep.subr.bf16.mxu0 %v3831_v40  ;;  %v4901_v51 = vld [vmem:[#allocation31_spill] sm:$0xff] }
 0x6ea   :  { %v1480_v18 = vmul.f32 %v1478_v53, %v4901_v51 }
 0x6ec   :  { %1545 = vmatpush1.bf16.msra.mxu0 %v3837_v27 }
 0x6ed   :  { %1546 = vmatprep.subr.bf16.mxu0 %v3843_v15 }
 0x6f0   :  { %1547 = vmatpush1.bf16.msra.mxu0 %v3849_v23 }
 0x6f1   :  { %1548 = vmatprep.subr.bf16.mxu0 %v3855_v0 }
 0x6f4   :  { %1549 = vmatpush1.bf16.msra.mxu0 %v3861_v60 }
 0x6f5   :  { %1550 = vmatprep.subr.bf16.mxu0 %v3867_v34 }
 0x6f7   :  { %v1486_v14 = vpop.permute.xlu0 %1485 }
 0x6f8   :  { %1551 = vmatpush1.bf16.msra.mxu0 %v3873_v6  ;;  %v1488_v28 = vmul.f32 %v1486_v14, %v4899_v54  ;;  %v1489_v57 = vmul.f32 %v1486_v14, %v4900_v32 }
 0x6f9   :  { %1552 = vmatprep.subr.bf16.mxu0 %v3879_v36 }
 0x6fc   :  { %1553 = vmatpush1.bf16.msra.mxu0 %v3885_v59 }
 0x6fd   :  { %1554 = vmatprep.subr.bf16.mxu0 %v3891_v22 }
 0x700   :  { %1555 = vmatpush1.bf16.msra.mxu0 %v3897_v24 }
 0x701   :  { %1556 = vmatprep.subr.bf16.mxu0 %v3903_v26 }
 0x704   :  { %1557 = vmatpush1.bf16.msra.mxu0 %v3909_v29 }
 0x705   :  { %1758 = vmatprep.subr.bf16.mxu0 %v3915_v31 }
 0x707   :  { %1575 = vmatmul.mubr.bf16.vlgmr.msra.gmra.mrb[24].mxu0 %v4049_v46  ;;  %v4896_v46 = vld [vmem:[#allocation11_spill] sm:$0xff] }
 0x708   :  { %1759 = vmatpush1.bf16.msra.mxu0 %v3922_v35  ;;  %1790 = vmatprep.mubr.bf16.mxu0 %v4804_v63 }
 0x709   :  { %1760 = vmatprep.subr.bf16.mxu0 %v3929_v43 }
 0x70c   :  { %1761 = vmatpush1.bf16.msra.mxu0 %v3935_v25 }
 0x70d   :  { %1762 = vmatprep.subr.bf16.mxu0 %v3941_v41 }
 0x710   :  { %1763 = vmatpush1.bf16.msra.mxu0 %v3947_v2 }
 0x711   :  { %1764 = vmatprep.subr.bf16.mxu0 %v3953_v33 }
 0x714   :  { %1765 = vmatpush1.bf16.msra.mxu0 %v3959_v62 }
 0x715   :  { %1766 = vmatprep.subr.bf16.mxu0 %v3965_v13 }
 0x718   :  { %1767 = vmatpush1.bf16.msra.mxu0 %v3971_v4  ;;  %v1492_v4 = vadd.f32 %v1488_v28, %v1480_v18 }
 0x719   :  { %1768 = vmatprep.subr.bf16.mxu0 %v3977_v8  ;;  %v4902_v8 = vld [vmem:[#allocation33_spill] sm:$0xff] }
 0x71c   :  { %1769 = vmatpush1.bf16.msra.mxu0 %v3983_v10  ;;  %v1481_v10 = vmul.f32 %v1478_v53, %v4902_v8 }
 0x71d   :  { %1770 = vmatprep.subr.bf16.mxu0 %v3989_v12 }
 0x71e   :  { %v1493_v12 = vadd.f32 %v1489_v57, %v1481_v10 }
 0x720   :  { %1771 = vmatpush1.bf16.msra.mxu0 %v4895_v47  ;;  %v1497_v2 = vadd.f32 %v1493_v12, %v4856_v20  ;;  %v1482_v12 = vmul.f32 %v1478_v53, %v3567_v21 }
 0x721   :  { %1772 = vmatprep.subr.bf16.mxu0 %v4896_v46 }
 0x722   :  { %v1584_v32 = vadd.f32 %v1537_v55, %v1497_v2 }
 0x724   :  { %1773 = vmatpush1.bf16.msra.mxu0 %v4897_v38  ;;  %v1496_v38 = vadd.f32 %v1492_v4, %v4824_v5  ;;  %v2626_v51 = vmul.f32 -1.442695, %v1584_v32 }
 0x725   :  { %1872 = vmatprep.subr.bf16.mxu0 %v4898_v37 }
 0x726   :  { %v1583_v54 = vadd.f32 %v1535_v48, %v1496_v38  ;;  %v1483_v48 = vmul.f32 %v1478_v53, %v4825_v7  ;;  %v4261_v53 = vld [vmem:[%s4624_s0 + $0x28] sm:$0xff] }
 0x728   :  { %v2625_v41 = vmul.f32 -1.442695, %v1583_v54 }
 0x7ba   :  { %v1442_v13 = vpop.f32.mrb[20].mxu0 }
 0x7bb   :  { %v2663_v47 = vadd.f32 %v1442_v13, %v3643_v61  ;;  %v1444_v46 = vpop.f32.mrb[21].mxu0 }
 0x7bc   :  { %v1446_v62 = vpop.f32.mrb[22].mxu0  ;;  %v4245_v8 = vadd.f32 %v1444_v46, %v3646_v1 }
 0x7bd   :  { %v2622_v37 = vmul.f32 -1.442695, %v2663_v47  ;;  %v1447_v33 = vpop.f32.mrb[23].mxu0  ;;  %v1490_v62 = vmul.f32 %v1486_v14, %v3569_v19 }
 0x7be   :  { %v1491_v33 = vmul.f32 %v1486_v14, %v4826_v9 }
 0x7bf   :  { %2893 = vpow2.f32 %v2622_v37  ;;  %v1494_v47 = vadd.f32 %v1490_v62, %v1482_v12 }
 0x7c0   :  { %2895 = vpow2.f32 %v2625_v41  ;;  %v1495_v41 = vadd.f32 %v1491_v33, %v1483_v48 }
 0x7c1   :  { %2897 = vpow2.f32 %v2626_v51  ;;  %v1498_v28 = vadd.f32 %v1494_v47, %v3578_v17 }
 0x7c2   :  { %2899 = vtanh.f32 %v4245_v8  ;;  %v1499_v32 = vadd.f32 %v1495_v41, %v3573_v11 }
 0x7c9   :  { %v2894_v10 = vpop.eup %2893 }
 0x7ca   :  { %v1454_v13 = vadd.f32 1.0, %v2894_v10  ;;  %v2896_v4 = vpop.eup %2895 }
 0x7cb   :  { %v2898_v2 = vpop.eup %2897  ;;  %v1590_v54 = vadd.f32 1.0, %v2896_v4 }
 0x7cc   :  { %2901 = vrcp.f32 %v1454_v13  ;;  %v2900_v55 = vpop.eup %2899  ;;  %v1596_v38 = vadd.f32 1.0, %v2898_v2 }
 0x7ce   :  { %2903 = vrcp.f32 %v1596_v38 }
 0x7cf   :  { %2905 = vrcp.f32 %v1590_v54 }
 0x7d6   :  { %v4252_v46 = vpop.eup %2901 }
 0x7d7   :  { %v1465_v37 = vmul.f32 %v4252_v46, %v2900_v55 }
 0x7d8   :  { %v2904_v33 = vpop.eup %2903 }
 0x7d9   :  { %1467 = vrot.lane.b32.xlu1 %v1465_v37, %s3102_s5  ;;  %v2906_v4 = vpop.eup %2905  ;;  %v1606_v2 = vmul.f32 %v2904_v33, %v4046_v30  ;;  %v4903_v30 = vld [vmem:[#allocation14_spill] sm:$0xff]  ;;  %v4909_v33 = vld [vmem:[#allocation28_spill] sm:$0xff] }
 0x7da   :  { %v1576_v14 = vpop.f32.mrb[24].mxu0 }
 0x7db   :  { %v1585_v57 = vadd.f32 %v1576_v14, %v1498_v28  ;;  %v1578_v51 = vpop.f32.mrb[25].mxu0 }
 0x7dc   :  { %v1586_v18 = vadd.f32 %v1578_v51, %v1499_v32  ;;  %v1580_v10 = vpop.f32.mrb[26].mxu0  ;;  %v4904_v51 = vld [vmem:[#allocation15_spill] sm:$0xff] }
 0x7dd   :  { %2907 = vtanh.f32 %v1585_v57  ;;  %v1581_v13 = vpop.f32.mrb[27].mxu0  ;;  %1734 = vperm.xlu1 %2708, %v4261_v53   ;;  %v4906_v10 = vld [vmem:[#allocation17_spill] sm:$0xff] }
 0x7de   :  { %v2627_v62 = vmul.f32 -1.442695, %v1586_v18  ;;  %v4905_v18 = vld [vmem:[#allocation16_spill] sm:$0xff]  ;;  %v4907_v13 = vld [vmem:[#allocation18_spill] sm:$0xff] }
 0x7e0   :  { %2909 = vpow2.f32 %v2627_v62  ;;  %v4908_v62 = vld [vmem:[#allocation19_spill] sm:$0xff] }
 0x7e7   :  { %v2908_v12 = vpop.eup %2907 }
 0x7e8   :  { %v1607_v48 = vmul.f32 %v2908_v12, %v2906_v4  ;;  %v4910_v4 = vld [vmem:[#allocation29_spill] sm:$0xff]  ;;  %v4911_v12 = vld [vmem:[#allocation38_spill] sm:$0xff] }
 0x7ea   :  { %v2910_v55 = vpop.eup %2909  ;;  %v4265_v47 = vadd.f32 %v1607_v48, %v1606_v2  ;;  %v4912_v2 = vld [vmem:[#allocation20_spill] sm:$0xff]  ;;  %v4913_v48 = vld [vmem:[#allocation39_spill] sm:$0xff] }
 0x7eb   :  { %v1603_v41 = vadd.f32 1.0, %v2910_v55  ;;  %v4914_v55 = vld [vmem:[#allocation40_spill] sm:$0xff] }
 0x7ec   :  { %2911 = vtanh.f32 %v4265_v47 }
 0x7ed   :  { %2913 = vrcp.f32 %v1603_v41  ;;  %v4915_v41 = vld [vmem:[#allocation41_spill] sm:$0xff] }
 0x7f6   :  { %v2912_v38 = vpop.eup %2911 }
 0x7f7   :  { %v2914_v37 = vpop.eup %2913 }
 0x7f8   :  { %v1610_v54 = vmul.f32 %v2914_v37, %v2912_v38  ;;  %v4916_v38 = vld [vmem:[#allocation42_spill] sm:$0xff]  ;;  %v4917_v37 = vld [vmem:[#allocation43_spill] sm:$0xff] }
 0x7fa   :  { %v4268_v28 = vpack.c.bf16 %v1610_v54, %v1610_v54  ;;  %vm1611_vm5 = vcmp.gt.f32.partialorder %v1610_v54, 0.0  ;;  %v1612_v14 = vmul.f32 0.01, %v1610_v54 }
 0x7fc   :  { %1791 = vmatmul.mubr.bf16.vlgmr.msra.gmra.mrb[28].mxu0 %v4268_v28  ;;  %v1613_v32 = vsel %vm1611_vm5, %v1610_v54, %v1612_v14  ;;  %v2623_v54 = vmul.f32 -1.442695, %v4245_v8 }
 0x7fd   :  { %v1614_v57 = vpack.c.bf16 %v1613_v32, %v1613_v32  ;;  %1873 = vmatpush1.bf16.msra.mxu0 %v4055_v3  ;;  %1904 = vmatprep.mubr.bf16.mxu0 %v4804_v63 }
 0x7fe   :  { %1874 = vmatprep.subr.bf16.mxu0 %v4062_v49  ;;  %2915 = vpow2.f32 %v2623_v54 }
 0x7ff   :  { %1648 = vmatmul.mubr.bf16.vlgmr.msra.gmra.mrb[32].mxu1 %v1614_v57  ;;  %v1464_v57 = vmul.f32 %v4252_v46, %v4196_v42 }
 0x800   :  { %1666 = vmatpush1.bf16.msra.mxu1 %v4068_v50  ;;  %1697 = vmatprep.mubr.bf16.mxu1 %v4804_v63 }
 0x801   :  { %1667 = vmatprep.subr.bf16.mxu1 %v4075_v16  ;;  %1875 = vmatpush1.bf16.msra.mxu0 %v4081_v45 }
 0x802   :  { %1876 = vmatprep.subr.bf16.mxu0 %v4087_v52 }
 0x804   :  { %1668 = vmatpush1.bf16.msra.mxu1 %v4093_v56 }
 0x805   :  { %1669 = vmatprep.subr.bf16.mxu1 %v4099_v58  ;;  %1877 = vmatpush1.bf16.msra.mxu0 %v4903_v30 }
 0x806   :  { %1878 = vmatprep.subr.bf16.mxu0 %v4904_v51 }
 0x808   :  { %1670 = vmatpush1.bf16.msra.mxu1 %v4905_v18  ;;  %v2916_v14 = vpop.eup %2915 }
 0x809   :  { %1671 = vmatprep.subr.bf16.mxu1 %v4906_v10  ;;  %1879 = vmatpush1.bf16.msra.mxu0 %v4907_v13  ;;  %v1461_v32 = vadd.f32 1.0, %v2916_v14 }
 0x80a   :  { %1880 = vmatprep.subr.bf16.mxu0 %v4908_v62 }
 0x80b   :  { %2917 = vrcp.f32 %v1461_v32  ;;  %v4925_v32 = vld [vmem:[#allocation8_spill] sm:$0xff] }
 0x80c   :  { %1672 = vmatpush1.bf16.msra.mxu1 %v4909_v33 }
 0x80d   :  { %1799 = vmatprep.subr.bf16.mxu1 %v4910_v4  ;;  %1881 = vmatpush1.bf16.msra.mxu0 %v4911_v12 }
 0x80e   :  { %1882 = vmatprep.subr.bf16.mxu0 %v4912_v2 }
 0x811   :  { %1883 = vmatpush1.bf16.msra.mxu0 %v4913_v48 }
 0x812   :  { %1884 = vmatprep.subr.bf16.mxu0 %v4914_v55 }
 0x815   :  { %1885 = vmatpush1.bf16.msra.mxu0 %v4915_v41  ;;  %v2918_v41 = vpop.eup %2917 }
 0x816   :  { %1886 = vmatprep.subr.bf16.mxu0 %v4916_v38 }
 0x819   :  { %1887 = vmatpush1.bf16.msra.mxu0 %v4917_v37 }
 0x81a   :  { %1922 = vmatprep.subr.bf16.mxu0 %v4190_v44 }
 0x84b   :  { %v1468_v2 = vpop.permute.xlu1 %1467 }
 0x84c   :  { %v4300_v48 = vadd.f32 %v1468_v2, %v1464_v57  ;;  %v4919_v2 = vld [vmem:[#allocation27_spill] sm:$0xff]  ;;  %v4926_v57 = vld [vmem:[#allocation9_spill] sm:$0xff] }
 0x84e   :  { %2919 = vtanh.f32 %v4300_v48 }
 0x858   :  { %v2920_v38 = vpop.eup %2919 }
 0x859   :  { %v1472_v55 = vmul.f32 %v2920_v38, %v2918_v41  ;;  %v4921_v41 = vld [vmem:[#allocation3_spill] sm:$0xff]  ;;  %v4922_v38 = vld [vmem:[#allocation5_spill] sm:$0xff] }
 0x85b   :  { %v1658_v37 = vpack.c.bf16 %v1472_v55, %v1472_v55  ;;  %v4920_v55 = vld [vmem:[#allocation4_spill] sm:$0xff] }
 0x85d   :  { %1660 = vrot.lane.b32.xlu0 %v1658_v37, %s3102_s5  ;;  %v4923_v37 = vld [vmem:[#allocation6_spill] sm:$0xff] }
 0x861   :  { %1742 = vperm.xlu0 %2705, %v4261_v53   ;;  %v4918_v53 = vld [vmem:[#allocation26_spill] sm:$0xff] }
 0x8cf   :  { %v1792_v8 = vpop.f32.mrb[28].mxu0  ;;  %v1661_v54 = vpop.permute.xlu0 %1660 }
 0x8d0   :  { %v1794_v14 = vpop.f32.mrb[29].mxu0  ;;  %2628 = vmatmul.mubr.msk.bf16.vlgmr.msra.gmra.mrb[32].mxu1 %vm633_vm2, %v1661_v54  ;;  %v4927_v54 = vld [vmem:[#allocation10_spill] sm:$0xff] }
 0x8d1   :  { %v1796_v42 = vpop.f32.mrb[30].mxu0  ;;  %1800 = vmatpush1.bf16.msra.mxu1 %v3824_v39  ;;  %1831 = vmatprep.mubr.bf16.mxu1 %v4804_v63 }
 0x8d2   :  { %v1797_v46 = vpop.f32.mrb[31].mxu0  ;;  %1801 = vmatprep.subr.bf16.mxu1 %v3831_v40  ;;  %v4928_v42 = vld [vmem:[#allocation11_spill] sm:$0xff] }
 0x8d3   :  { %v4929_v46 = vld [vmem:[#allocation12_spill] sm:$0xff] }
 0x8d5   :  { %1802 = vmatpush1.bf16.msra.mxu1 %v3837_v27 }
 0x8d6   :  { %1803 = vmatprep.subr.bf16.mxu1 %v3843_v15 }
 0x8d9   :  { %1804 = vmatpush1.bf16.msra.mxu1 %v3849_v23 }
 0x8da   :  { %1805 = vmatprep.subr.bf16.mxu1 %v3855_v0 }
 0x8dd   :  { %1806 = vmatpush1.bf16.msra.mxu1 %v3861_v60 }
 0x8de   :  { %1807 = vmatprep.subr.bf16.mxu1 %v3867_v34 }
 0x8e1   :  { %1808 = vmatpush1.bf16.msra.mxu1 %v3873_v6 }
 0x8e2   :  { %1809 = vmatprep.subr.bf16.mxu1 %v3879_v36 }
 0x8e5   :  { %1810 = vmatpush1.bf16.msra.mxu1 %v3885_v59 }
 0x8e6   :  { %1811 = vmatprep.subr.bf16.mxu1 %v3891_v22 }
 0x8e9   :  { %1812 = vmatpush1.bf16.msra.mxu1 %v3897_v24 }
 0x8ea   :  { %1813 = vmatprep.subr.bf16.mxu1 %v3903_v26 }
 0x8ed   :  { %1814 = vmatpush1.bf16.msra.mxu1 %v3909_v29 }
 0x8ee   :  { %2015 = vmatprep.subr.bf16.mxu1 %v3915_v31 }
 0x8f0   :  { %1832 = vmatmul.mubr.bf16.vlgmr.msra.gmra.mrb[36].mxu1 %v4268_v28  ;;  %v4924_v28 = vld [vmem:[#allocation7_spill] sm:$0xff] }
 0x8f1   :  { %2016 = vmatpush1.bf16.msra.mxu1 %v3922_v35  ;;  %2047 = vmatprep.mubr.bf16.mxu1 %v4804_v63  ;;  %v4934_v35 = vld [vmem:[#allocation33_spill] sm:$0xff] }
 0x8f2   :  { %2017 = vmatprep.subr.bf16.mxu1 %v3929_v43  ;;  %v4933_v43 = vld [vmem:[#allocation31_spill] sm:$0xff] }
 0x8f5   :  { %2018 = vmatpush1.bf16.msra.mxu1 %v3935_v25  ;;  %v4932_v25 = vld [vmem:[#allocation34_spill] sm:$0xff] }
 0x8f6   :  { %2019 = vmatprep.subr.bf16.mxu1 %v4918_v53  ;;  %v4931_v53 = vld [vmem:[#allocation32_spill] sm:$0xff] }
 0x8f9   :  { %2020 = vmatpush1.bf16.msra.mxu1 %v4919_v2  ;;  %v4930_v2 = vld [vmem:[#allocation13_spill] sm:$0xff] }
 0x8fa   :  { %2021 = vmatprep.subr.bf16.mxu1 %v4920_v55  ;;  %v1743_v55 = vpop.permute.xlu0 %1742 }
 0x8fd   :  { %2022 = vmatpush1.bf16.msra.mxu1 %v4921_v41  ;;  %v1735_v41 = vpop.permute.xlu1 %1734 }
 0x8fe   :  { %2023 = vmatprep.subr.bf16.mxu1 %v4922_v38  ;;  %v1745_v38 = vmul.f32 %v1743_v55, %v4931_v53 }
 0x901   :  { %2024 = vmatpush1.bf16.msra.mxu1 %v4923_v37  ;;  %v1746_v37 = vmul.f32 %v1743_v55, %v4932_v25 }
 0x902   :  { %2025 = vmatprep.subr.bf16.mxu1 %v4924_v28  ;;  %v1737_v28 = vmul.f32 %v1735_v41, %v4933_v43 }
 0x904   :  { %v1749_v31 = vadd.f32 %v1745_v38, %v1737_v28 }
 0x905   :  { %2026 = vmatpush1.bf16.msra.mxu1 %v4925_v32  ;;  %v1738_v32 = vmul.f32 %v1735_v41, %v4934_v35 }
 0x906   :  { %2027 = vmatprep.subr.bf16.mxu1 %v4926_v57 }
 0x907   :  { %v1750_v57 = vadd.f32 %v1746_v37, %v1738_v32 }
 0x909   :  { %2028 = vmatpush1.bf16.msra.mxu1 %v4927_v54  ;;  %v1754_v22 = vadd.f32 %v1750_v57, %v4856_v20 }
 0x90a   :  { %2029 = vmatprep.subr.bf16.mxu1 %v4928_v42 }
 0x90b   :  { %v1841_v25 = vadd.f32 %v1794_v14, %v1754_v22 }
 0x90d   :  { %2030 = vmatpush1.bf16.msra.mxu1 %v4929_v46  ;;  %v1753_v46 = vadd.f32 %v1749_v31, %v4824_v5  ;;  %v2633_v43 = vmul.f32 -1.442695, %v1841_v25  ;;  %v1740_v25 = vmul.f32 %v1735_v41, %v4825_v7 }
 0x90e   :  { %2129 = vmatprep.subr.bf16.mxu1 %v4930_v2 }
 0x90f   :  { %v1840_v53 = vadd.f32 %v1792_v8, %v1753_v46  ;;  %v1739_v8 = vmul.f32 %v1735_v41, %v3567_v21  ;;  %v4365_v41 = vld [vmem:[%s4624_s0 + $0x30] sm:$0xff] }
 0x911   :  { %v2632_v59 = vmul.f32 -1.442695, %v1840_v53 }
 0x9a3   :  { %v1699_v29 = vpop.f32.mrb[32].mxu1 }
 0x9a4   :  { %v2665_v54 = vadd.f32 %v1699_v29, %v3643_v61  ;;  %v1701_v42 = vpop.f32.mrb[33].mxu1 }
 0x9a5   :  { %v1703_v26 = vpop.f32.mrb[34].mxu1  ;;  %v4349_v35 = vadd.f32 %v1701_v42, %v3646_v1 }
 0x9a6   :  { %v2629_v2 = vmul.f32 -1.442695, %v2665_v54  ;;  %v1704_v24 = vpop.f32.mrb[35].mxu1  ;;  %v1747_v26 = vmul.f32 %v1743_v55, %v3569_v19 }
 0x9a7   :  { %v1748_v24 = vmul.f32 %v1743_v55, %v4826_v9 }
 0x9a8   :  { %2921 = vpow2.f32 %v2629_v2  ;;  %v1751_v53 = vadd.f32 %v1747_v26, %v1739_v8 }
 0x9a9   :  { %2923 = vpow2.f32 %v2632_v59  ;;  %v1752_v59 = vadd.f32 %v1748_v24, %v1740_v25 }
 0x9aa   :  { %2925 = vpow2.f32 %v2633_v43  ;;  %v1755_v32 = vadd.f32 %v1751_v53, %v3578_v17 }
 0x9ab   :  { %2927 = vtanh.f32 %v4349_v35  ;;  %v1756_v57 = vadd.f32 %v1752_v59, %v3573_v11 }
 0x9b2   :  { %v2922_v38 = vpop.eup %2921 }
 0x9b3   :  { %v1711_v29 = vadd.f32 1.0, %v2922_v38  ;;  %v2924_v31 = vpop.eup %2923 }
 0x9b4   :  { %v2926_v22 = vpop.eup %2925  ;;  %v1847_v28 = vadd.f32 1.0, %v2924_v31 }
 0x9b5   :  { %2929 = vrcp.f32 %v1711_v29  ;;  %v2928_v14 = vpop.eup %2927  ;;  %v1853_v43 = vadd.f32 1.0, %v2926_v22 }
 0x9b7   :  { %2931 = vrcp.f32 %v1853_v43 }
 0x9b8   :  { %2933 = vrcp.f32 %v1847_v28 }
 0x9bf   :  { %v4356_v2 = vpop.eup %2929 }
 0x9c0   :  { %v1722_v37 = vmul.f32 %v4356_v2, %v2928_v14 }
 0x9c1   :  { %v2932_v24 = vpop.eup %2931 }
 0x9c2   :  { %1724 = vrot.lane.b32.xlu1 %v1722_v37, %s3102_s5  ;;  %v2934_v31 = vpop.eup %2933  ;;  %v1863_v22 = vmul.f32 %v2932_v24, %v4265_v47  ;;  %v4935_v47 = vld [vmem:[#allocation20_spill] sm:$0xff]  ;;  %v2630_v24 = vmul.f32 -1.442695, %v4349_v35 }
 0x9c3   :  { %v1833_v55 = vpop.f32.mrb[36].mxu1 }
 0x9c4   :  { %v1842_v54 = vadd.f32 %v1833_v55, %v1755_v32  ;;  %v1835_v42 = vpop.f32.mrb[37].mxu1 }
 0x9c5   :  { %v1843_v46 = vadd.f32 %v1835_v42, %v1756_v57  ;;  %v1837_v38 = vpop.f32.mrb[38].mxu1  ;;  %v4936_v42 = vld [vmem:[#allocation39_spill] sm:$0xff] }
 0x9c6   :  { %2935 = vtanh.f32 %v1842_v54  ;;  %v1838_v29 = vpop.f32.mrb[39].mxu1  ;;  %1991 = vperm.xlu1 %2708, %v4365_v41   ;;  %v4938_v38 = vld [vmem:[#allocation41_spill] sm:$0xff] }
 0x9c7   :  { %v2634_v26 = vmul.f32 -1.442695, %v1843_v46  ;;  %v4937_v46 = vld [vmem:[#allocation40_spill] sm:$0xff]  ;;  %v4939_v29 = vld [vmem:[#allocation42_spill] sm:$0xff] }
 0x9c9   :  { %2937 = vpow2.f32 %v2634_v26  ;;  %v4940_v26 = vld [vmem:[#allocation43_spill] sm:$0xff] }
 0x9d0   :  { %v2936_v8 = vpop.eup %2935 }
 0x9d1   :  { %v1864_v25 = vmul.f32 %v2936_v8, %v2934_v31  ;;  %v1721_v8 = vmul.f32 %v4356_v2, %v4300_v48 }
 0x9d3   :  { %v2938_v14 = vpop.eup %2937  ;;  %v4369_v53 = vadd.f32 %v1864_v25, %v1863_v22 }
 0x9d4   :  { %v1860_v59 = vadd.f32 1.0, %v2938_v14 }
 0x9d5   :  { %2939 = vtanh.f32 %v4369_v53 }
 0x9d6   :  { %2941 = vrcp.f32 %v1860_v59 }
 0x9d7   :  { %2943 = vpow2.f32 %v2630_v24  ;;  %v4954_v24 = vld [vmem:[#allocation5_spill] sm:$0xff] }
 0x9df   :  { %v2940_v43 = vpop.eup %2939 }
 0x9e0   :  { %v2942_v37 = vpop.eup %2941 }
 0x9e1   :  { %v1867_v28 = vmul.f32 %v2942_v37, %v2940_v43 }
 0x9e3   :  { %v4372_v32 = vpack.c.bf16 %v1867_v28, %v1867_v28  ;;  %vm1868_vm6 = vcmp.gt.f32.partialorder %v1867_v28, 0.0  ;;  %v1869_v55 = vmul.f32 0.01, %v1867_v28 }
 0x9e5   :  { %2048 = vmatmul.mubr.bf16.vlgmr.msra.gmra.mrb[40].mxu1 %v4372_v32  ;;  %v1870_v57 = vsel %vm1868_vm6, %v1867_v28, %v1869_v55 }
 0x9e6   :  { %v1871_v54 = vpack.c.bf16 %v1870_v57, %v1870_v57  ;;  %2130 = vmatpush1.bf16.msra.mxu1 %v4055_v3  ;;  %2161 = vmatprep.mubr.bf16.mxu1 %v4804_v63  ;;  %v4952_v57 = vld [vmem:[#allocation4_spill] sm:$0xff] }
 0x9e7   :  { %2131 = vmatprep.subr.bf16.mxu1 %v4062_v49 }
 0x9e8   :  { %1905 = vmatmul.mubr.bf16.vlgmr.msra.gmra.mrb[32].mxu0 %v1871_v54  ;;  %v4953_v54 = vld [vmem:[#allocation3_spill] sm:$0xff] }
 0x9e9   :  { %1923 = vmatpush1.bf16.msra.mxu0 %v4068_v50  ;;  %1954 = vmatprep.mubr.bf16.mxu0 %v4804_v63 }
 0x9ea   :  { %1924 = vmatprep.subr.bf16.mxu0 %v4075_v16  ;;  %2132 = vmatpush1.bf16.msra.mxu1 %v4081_v45 }
 0x9eb   :  { %2133 = vmatprep.subr.bf16.mxu1 %v4087_v52 }
 0x9ed   :  { %1925 = vmatpush1.bf16.msra.mxu0 %v4093_v56 }
 0x9ee   :  { %1926 = vmatprep.subr.bf16.mxu0 %v4099_v58  ;;  %2134 = vmatpush1.bf16.msra.mxu1 %v4903_v30 }
 0x9ef   :  { %2135 = vmatprep.subr.bf16.mxu1 %v4904_v51 }
 0x9f1   :  { %1927 = vmatpush1.bf16.msra.mxu0 %v4905_v18 }
 0x9f2   :  { %1928 = vmatprep.subr.bf16.mxu0 %v4906_v10  ;;  %2136 = vmatpush1.bf16.msra.mxu1 %v4907_v13 }
 0x9f3   :  { %2137 = vmatprep.subr.bf16.mxu1 %v4908_v62 }
 0x9f5   :  { %1929 = vmatpush1.bf16.msra.mxu0 %v4909_v33 }
 0x9f6   :  { %2056 = vmatprep.subr.bf16.mxu0 %v4910_v4  ;;  %2138 = vmatpush1.bf16.msra.mxu1 %v4911_v12  ;;  %v2944_v4 = vpop.eup %2943 }
 0x9f7   :  { %2139 = vmatprep.subr.bf16.mxu1 %v4935_v47  ;;  %v1718_v31 = vadd.f32 1.0, %v2944_v4  ;;  %v4955_v4 = vld [vmem:[#allocation6_spill] sm:$0xff] }
 0x9f9   :  { %2945 = vrcp.f32 %v1718_v31  ;;  %v4957_v31 = vld [vmem:[#allocation8_spill] sm:$0xff] }
 0x9fa   :  { %2140 = vmatpush1.bf16.msra.mxu1 %v4936_v42 }
 0x9fb   :  { %2141 = vmatprep.subr.bf16.mxu1 %v4937_v46 }
 0x9fe   :  { %2142 = vmatpush1.bf16.msra.mxu1 %v4938_v38 }
 0x9ff   :  { %2143 = vmatprep.subr.bf16.mxu1 %v4939_v29 }
 0xa02   :  { %2144 = vmatpush1.bf16.msra.mxu1 %v4940_v26 }
 0xa03   :  { %2179 = vmatprep.subr.bf16.mxu1 %v4190_v44  ;;  %v2946_v14 = vpop.eup %2945 }
 0xa34   :  { %v1725_v22 = vpop.permute.xlu1 %1724 }
 0xa35   :  { %v4404_v25 = vadd.f32 %v1725_v22, %v1721_v8  ;;  %v4958_v8 = vld [vmem:[#allocation9_spill] sm:$0xff]  ;;  %v4959_v22 = vld [vmem:[#allocation10_spill] sm:$0xff] }
 0xa37   :  { %2947 = vtanh.f32 %v4404_v25 }
 0xa41   :  { %v2948_v59 = vpop.eup %2947 }
 0xa42   :  { %v1729_v43 = vmul.f32 %v2948_v59, %v2946_v14  ;;  %v4960_v14 = vld [vmem:[#allocation11_spill] sm:$0xff]  ;;  %v4961_v59 = vld [vmem:[#allocation12_spill] sm:$0xff] }
 0xa44   :  { %v1915_v37 = vpack.c.bf16 %v1729_v43, %v1729_v43  ;;  %v4962_v43 = vld [vmem:[#allocation13_spill] sm:$0xff] }
 0xa46   :  { %1917 = vrot.lane.b32.xlu0 %v1915_v37, %s3102_s5 }
 0xa4a   :  { %1999 = vperm.xlu0 %2705, %v4365_v41   ;;  %v4942_v41 = vld [vmem:[#allocation37_spill] sm:$0xff] }
 0xab8   :  { %v2049_v35 = vpop.f32.mrb[40].mxu1  ;;  %v1918_v28 = vpop.permute.xlu0 %1917 }
 0xab9   :  { %v2051_v55 = vpop.f32.mrb[41].mxu1  ;;  %2635 = vmatmul.mubr.msk.bf16.vlgmr.msra.gmra.mrb[32].mxu0 %vm633_vm2, %v1918_v28  ;;  %v1992_v28 = vpop.permute.xlu1 %1991 }
 0xaba   :  { %v2053_v48 = vpop.f32.mrb[42].mxu1  ;;  %2057 = vmatpush1.bf16.msra.mxu0 %v3824_v39  ;;  %2088 = vmatprep.mubr.bf16.mxu0 %v4804_v63  ;;  %v4941_v39 = vld [vmem:[#allocation30_spill] sm:$0xff] }
 0xabb   :  { %v2054_v2 = vpop.f32.mrb[43].mxu1  ;;  %2058 = vmatprep.subr.bf16.mxu0 %v3831_v40  ;;  %v4943_v40 = vld [vmem:[#allocation35_spill] sm:$0xff]  ;;  %v4963_v48 = vld [vmem:[#allocation32_spill] sm:$0xff] }
 0xabe   :  { %2059 = vmatpush1.bf16.msra.mxu0 %v3837_v27  ;;  %v4944_v27 = vld [vmem:[#allocation36_spill] sm:$0xff] }
 0xabf   :  { %2060 = vmatprep.subr.bf16.mxu0 %v3843_v15  ;;  %v4945_v15 = vld [vmem:[#allocation21_spill] sm:$0xff] }
 0xac2   :  { %2061 = vmatpush1.bf16.msra.mxu0 %v3849_v23  ;;  %v4946_v23 = vld [vmem:[#allocation22_spill] sm:$0xff] }
 0xac3   :  { %2062 = vmatprep.subr.bf16.mxu0 %v3855_v0  ;;  %v4947_v0 = vld [vmem:[#allocation23_spill] sm:$0xff] }
 0xac6   :  { %2063 = vmatpush1.bf16.msra.mxu0 %v3861_v60  ;;  %v4948_v60 = vld [vmem:[#allocation24_spill] sm:$0xff] }
 0xac7   :  { %2064 = vmatprep.subr.bf16.mxu0 %v3867_v34  ;;  %v4949_v34 = vld [vmem:[#allocation25_spill] sm:$0xff] }
 0xac9   :  { %v2000_v37 = vpop.permute.xlu0 %1999 }
 0xaca   :  { %2065 = vmatpush1.bf16.msra.mxu0 %v3873_v6  ;;  %v4950_v6 = vld [vmem:[#allocation26_spill] sm:$0xff]  ;;  %v2002_v2 = vmul.f32 %v2000_v37, %v4963_v48 }
 0xacb   :  { %2066 = vmatprep.subr.bf16.mxu0 %v3879_v36  ;;  %v4951_v36 = vld [vmem:[#allocation27_spill] sm:$0xff] }
 0xace   :  { %2067 = vmatpush1.bf16.msra.mxu0 %v4941_v39  ;;  %v4964_v39 = vld [vmem:[#allocation34_spill] sm:$0xff] }
 0xacf   :  { %2068 = vmatprep.subr.bf16.mxu0 %v4942_v41  ;;  %v2003_v41 = vmul.f32 %v2000_v37, %v4964_v39 }
 0xad2   :  { %2069 = vmatpush1.bf16.msra.mxu0 %v4943_v40  ;;  %v4965_v40 = vld [vmem:[#allocation31_spill] sm:$0xff] }
 0xad3   :  { %2070 = vmatprep.subr.bf16.mxu0 %v4944_v27  ;;  %v1994_v27 = vmul.f32 %v1992_v28, %v4965_v40 }
 0xad6   :  { %2071 = vmatpush1.bf16.msra.mxu0 %v4945_v15  ;;  %v4966_v15 = vld [vmem:[#allocation33_spill] sm:$0xff] }
 0xad7   :  { %2272 = vmatprep.subr.bf16.mxu0 %v4946_v23  ;;  %v1995_v23 = vmul.f32 %v1992_v28, %v4966_v15 }
 0xad9   :  { %2089 = vmatmul.mubr.bf16.vlgmr.msra.gmra.mrb[36].mxu0 %v4372_v32  ;;  %v4956_v32 = vld [vmem:[#allocation7_spill] sm:$0xff] }
 0xada   :  { %2273 = vmatpush1.bf16.msra.mxu0 %v4947_v0  ;;  %2304 = vmatprep.mubr.bf16.mxu0 %v4804_v63  ;;  %v2006_v0 = vadd.f32 %v2002_v2, %v1994_v27  ;;  %v2005_v27 = vmul.f32 %v2000_v37, %v4826_v9 }
 0xadb   :  { %2274 = vmatprep.subr.bf16.mxu0 %v4948_v60  ;;  %v2007_v60 = vadd.f32 %v2003_v41, %v1995_v23  ;;  %v2004_v41 = vmul.f32 %v2000_v37, %v3569_v19 }
 0xade   :  { %2275 = vmatpush1.bf16.msra.mxu0 %v4949_v34 }
 0xadf   :  { %2276 = vmatprep.subr.bf16.mxu0 %v4950_v6 }
 0xae2   :  { %2277 = vmatpush1.bf16.msra.mxu0 %v4951_v36 }
 0xae3   :  { %2278 = vmatprep.subr.bf16.mxu0 %v4952_v57 }
 0xae6   :  { %2279 = vmatpush1.bf16.msra.mxu0 %v4953_v54  ;;  %v2010_v54 = vadd.f32 %v2006_v0, %v4824_v5  ;;  %v1997_v0 = vmul.f32 %v1992_v28, %v4825_v7 }
 0xae7   :  { %2280 = vmatprep.subr.bf16.mxu0 %v4954_v24 }
 0xaea   :  { %2281 = vmatpush1.bf16.msra.mxu0 %v4955_v4 }
 0xaeb   :  { %2282 = vmatprep.subr.bf16.mxu0 %v4956_v32  ;;  %v2011_v32 = vadd.f32 %v2007_v60, %v4856_v20 }
 0xaee   :  { %2283 = vmatpush1.bf16.msra.mxu0 %v4957_v31  ;;  %v2097_v31 = vadd.f32 %v2049_v35, %v2010_v54  ;;  %v1996_v35 = vmul.f32 %v1992_v28, %v3567_v21  ;;  %v4469_v28 = vld [vmem:[%s4624_s0 + $0x38] sm:$0xff] }
 0xaef   :  { %2284 = vmatprep.subr.bf16.mxu0 %v4958_v8  ;;  %v2098_v8 = vadd.f32 %v2051_v55, %v2011_v32 }
 0xaf2   :  { %2285 = vmatpush1.bf16.msra.mxu0 %v4959_v22  ;;  %v2639_v22 = vmul.f32 -1.442695, %v2097_v31 }
 0xaf3   :  { %2286 = vmatprep.subr.bf16.mxu0 %v4960_v14  ;;  %v2640_v14 = vmul.f32 -1.442695, %v2098_v8 }
 0xaf6   :  { %2287 = vmatpush1.bf16.msra.mxu0 %v4961_v59 }
 0xaf7   :  { %2386 = vmatprep.subr.bf16.mxu0 %v4962_v43 }
 0xb8c   :  { %v1956_v34 = vpop.f32.mrb[32].mxu0 }
 0xb8d   :  { %v2667_v6 = vadd.f32 %v1956_v34, %v3643_v61  ;;  %v1958_v36 = vpop.f32.mrb[33].mxu0  ;;  %v2008_v34 = vadd.f32 %v2004_v41, %v1996_v35 }
 0xb8e   :  { %v1960_v57 = vpop.f32.mrb[34].mxu0  ;;  %v4453_v59 = vadd.f32 %v1958_v36, %v3646_v1  ;;  %v2009_v36 = vadd.f32 %v2005_v27, %v1997_v0 }
 0xb8f   :  { %v2636_v24 = vmul.f32 -1.442695, %v2667_v6  ;;  %v1961_v4 = vpop.f32.mrb[35].mxu0 }
 0xb90   :  { %v2012_v4 = vadd.f32 %v2008_v34, %v3578_v17  ;;  %v2013_v32 = vadd.f32 %v2009_v36, %v3573_v11 }
 0xb91   :  { %2949 = vpow2.f32 %v2636_v24 }
 0xb92   :  { %2951 = vpow2.f32 %v2639_v22 }
 0xb93   :  { %2953 = vpow2.f32 %v2640_v14 }
 0xb94   :  { %2955 = vtanh.f32 %v4453_v59 }
 0xb9b   :  { %v2950_v43 = vpop.eup %2949 }
 0xb9c   :  { %v1968_v2 = vadd.f32 1.0, %v2950_v43  ;;  %v2952_v23 = vpop.eup %2951 }
 0xb9d   :  { %v2954_v55 = vpop.eup %2953  ;;  %v2104_v24 = vadd.f32 1.0, %v2952_v23 }
 0xb9e   :  { %2957 = vrcp.f32 %v1968_v2  ;;  %v2956_v60 = vpop.eup %2955  ;;  %v2110_v57 = vadd.f32 1.0, %v2954_v55 }
 0xba0   :  { %2959 = vrcp.f32 %v2110_v57 }
 0xba1   :  { %2961 = vrcp.f32 %v2104_v24 }
 0xba8   :  { %v4460_v6 = vpop.eup %2957 }
 0xba9   :  { %v1979_v54 = vmul.f32 %v4460_v6, %v2956_v60 }
 0xbaa   :  { %v2960_v41 = vpop.eup %2959 }
 0xbab   :  { %1981 = vrot.lane.b32.xlu1 %v1979_v54, %s3102_s5  ;;  %v2962_v27 = vpop.eup %2961  ;;  %v2120_v35 = vmul.f32 %v2960_v41, %v4369_v53  ;;  %v3079_v53 = vld [vmem:[%s4623_s3 + $0x2c] ss:$16 sps:$4 sm:$0xff]  }
 0xbac   :  { %v2090_v37 = vpop.f32.mrb[36].mxu0 }
 0xbad   :  { %v2099_v31 = vadd.f32 %v2090_v37, %v2012_v4  ;;  %v2092_v8 = vpop.f32.mrb[37].mxu0 }
 0xbae   :  { %v2100_v22 = vadd.f32 %v2092_v8, %v2013_v32  ;;  %v2094_v14 = vpop.f32.mrb[38].mxu0  ;;  %v3091_v8 = vld [vmem:[%s4623_s3 + $0xec] ss:$16 sps:$4 sm:$0xff]  }
 0xbaf   :  { %2963 = vtanh.f32 %v2099_v31  ;;  %v2095_v43 = vpop.f32.mrb[39].mxu0  ;;  %2248 = vperm.xlu1 %2708, %v4469_v28   ;;  %v3090_v31 = vld [vmem:[%s4623_s3 + $0xc8] ss:$16 sps:$4 sm:$0xff]  }
 0xbb0   :  { %v2641_v2 = vmul.f32 -1.442695, %v2100_v22  ;;  %v3092_v22 = vld [vmem:[%s4623_s3 + $0xe8] ss:$16 sps:$4 sm:$0xff]  }
 0xbb2   :  { %2965 = vpow2.f32 %v2641_v2 }
 0xbb9   :  { %v2964_v23 = vpop.eup %2963 }
 0xbba   :  { %v2121_v55 = vmul.f32 %v2964_v23, %v2962_v27 }
 0xbbc   :  { %v2966_v0 = vpop.eup %2965  ;;  %v4473_v60 = vadd.f32 %v2121_v55, %v2120_v35 }
 0xbbd   :  { %v2117_v34 = vadd.f32 1.0, %v2966_v0 }
 0xbbe   :  { %2967 = vtanh.f32 %v4473_v60 }
 0xbbf   :  { %2969 = vrcp.f32 %v2117_v34 }
 0xbc8   :  { %v2968_v36 = vpop.eup %2967 }
 0xbc9   :  { %v2970_v57 = vpop.eup %2969 }
 0xbca   :  { %v2124_v54 = vmul.f32 %v2970_v57, %v2968_v36 }
 0xbcc   :  { %v4476_v24 = vpack.c.bf16 %v2124_v54, %v2124_v54  ;;  %vm2125_vm7 = vcmp.gt.f32.partialorder %v2124_v54, 0.0  ;;  %v2126_v4 = vmul.f32 0.01, %v2124_v54 }
 0xbce   :  { %2305 = vmatmul.mubr.bf16.vlgmr.msra.gmra.mrb[40].mxu0 %v4476_v24  ;;  %v2127_v37 = vsel %vm2125_vm7, %v2124_v54, %v2126_v4 }
 0xbcf   :  { %v2128_v32 = vpack.c.bf16 %v2127_v37, %v2127_v37  ;;  %2387 = vmatpush1.bf16.msra.mxu0 %v4055_v3  ;;  %2418 = vmatprep.mubr.bf16.mxu0 %v4804_v63  ;;  %v3077_v3 = vld [vmem:[%s4623_s3 + $0xc] ss:$16 sps:$4 sm:$0xff]  }
 0xbd0   :  { %2388 = vmatprep.subr.bf16.mxu0 %v4062_v49  ;;  %v2637_v49 = vmul.f32 -1.442695, %v4453_v59  ;;  %v3087_v59 = vld [vmem:[%s4623_s3 + $0xac] ss:$16 sps:$4 sm:$0xff]  }
 0xbd1   :  { %2162 = vmatmul.mubr.bf16.vlgmr.msra.gmra.mrb[44].mxu1 %v2128_v32 }
 0xbd2   :  { %2180 = vmatpush1.bf16.msra.mxu1 %v4068_v50  ;;  %2211 = vmatprep.mubr.bf16.mxu1 %v4804_v63  ;;  %2971 = vpow2.f32 %v2637_v49 }
 0xbd3   :  { %2181 = vmatprep.subr.bf16.mxu1 %v4075_v16  ;;  %2389 = vmatpush1.bf16.msra.mxu0 %v4081_v45  ;;  %v1978_v45 = vmul.f32 %v4460_v6, %v4404_v25  ;;  %v3086_v25 = vld [vmem:[%s4623_s3 + $0x88] ss:$16 sps:$4 sm:$0xff]  }
 0xbd4   :  { %2390 = vmatprep.subr.bf16.mxu0 %v4087_v52  ;;  %v3088_v6 = vld [vmem:[%s4623_s3 + $0xa8] ss:$16 sps:$4 sm:$0xff]  }
 0xbd6   :  { %2182 = vmatpush1.bf16.msra.mxu1 %v4093_v56 }
 0xbd7   :  { %2183 = vmatprep.subr.bf16.mxu1 %v4099_v58  ;;  %2391 = vmatpush1.bf16.msra.mxu0 %v4903_v30 }
 0xbd8   :  { %2392 = vmatprep.subr.bf16.mxu0 %v4904_v51 }
 0xbda   :  { %2184 = vmatpush1.bf16.msra.mxu1 %v4905_v18 }
 0xbdb   :  { %2185 = vmatprep.subr.bf16.mxu1 %v4906_v10  ;;  %2393 = vmatpush1.bf16.msra.mxu0 %v4907_v13 }
 0xbdc   :  { %2394 = vmatprep.subr.bf16.mxu0 %v4908_v62  ;;  %v2972_v50 = vpop.eup %2971 }
 0xbdd   :  { %v1975_v16 = vadd.f32 1.0, %v2972_v50 }
 0xbde   :  { %2186 = vmatpush1.bf16.msra.mxu1 %v4909_v33  ;;  %v3078_v33 = vld [vmem:[%s4623_s3 + $0x8] ss:$16 sps:$4 sm:$0xff]  }
 0xbdf   :  { %2313 = vmatprep.subr.bf16.mxu1 %v3077_v3  ;;  %2395 = vmatpush1.bf16.msra.mxu0 %v4911_v12  ;;  %2973 = vrcp.f32 %v1975_v16 }
 0xbe0   :  { %2396 = vmatprep.subr.bf16.mxu0 %v4935_v47  ;;  %v3080_v47 = vld [vmem:[%s4623_s3 + $0x28] ss:$16 sps:$4 sm:$0xff]  }
 0xbe3   :  { %2397 = vmatpush1.bf16.msra.mxu0 %v4936_v42  ;;  %v3081_v42 = vld [vmem:[%s4623_s3 + $0x4c] ss:$16 sps:$4 sm:$0xff]  }
 0xbe4   :  { %2398 = vmatprep.subr.bf16.mxu0 %v4937_v46  ;;  %v3082_v46 = vld [vmem:[%s4623_s3 + $0x48] ss:$16 sps:$4 sm:$0xff]  }
 0xbe7   :  { %2399 = vmatpush1.bf16.msra.mxu0 %v4938_v38  ;;  %v3083_v38 = vld [vmem:[%s4623_s3 + $0x6c] ss:$16 sps:$4 sm:$0xff]  }
 0xbe8   :  { %2400 = vmatprep.subr.bf16.mxu0 %v4939_v29  ;;  %v3084_v29 = vld [vmem:[%s4623_s3 + $0x68] ss:$16 sps:$4 sm:$0xff]  }
 0xbe9   :  { %v2974_v58 = vpop.eup %2973 }
 0xbeb   :  { %2401 = vmatpush1.bf16.msra.mxu0 %v4940_v26  ;;  %v3085_v26 = vld [vmem:[%s4623_s3 + $0x8c] ss:$16 sps:$4 sm:$0xff]  }
 0xbec   :  { %2436 = vmatprep.subr.bf16.mxu0 %v4190_v44 }
 0xc1d   :  { %v1982_v52 = vpop.permute.xlu1 %1981 }
 0xc1e   :  { %v4510_v56 = vadd.f32 %v1982_v52, %v1978_v45 }
 0xc20   :  { %2975 = vtanh.f32 %v4510_v56 }
 0xc2a   :  { %v2976_v30 = vpop.eup %2975 }
 0xc2b   :  { %v1986_v51 = vmul.f32 %v2976_v30, %v2974_v58 }
 0xc2d   :  { %v2172_v18 = vpack.c.bf16 %v1986_v51, %v1986_v51 }
 0xc2e   :  { %v2249_v43 = vpop.permute.xlu1 %2248 }
 0xc2f   :  { %2174 = vrot.lane.b32.xlu0 %v2172_v18, %s3102_s5  ;;  %v2251_v27 = vmul.f32 %v2249_v43, %v4965_v40  ;;  %v2252_v23 = vmul.f32 %v2249_v43, %v4966_v15  ;;  %v2253_v16 = vmul.f32 %v2249_v43, %v3567_v21  ;;  %v2254_v52 = vmul.f32 %v2249_v43, %v4825_v7  ;;  %v3095_v43 = vld [vmem:[%s4625_s6 + $0x10] ss:$8 sps:$4 sm:$0xff]  }
 0xc33   :  { %2256 = vperm.xlu0 %2705, %v4469_v28   ;;  %v3089_v28 = vld [vmem:[%s4623_s3 + $0xcc] ss:$16 sps:$4 sm:$0xff]  }
 0xca1   :  { %v2306_v44 = vpop.f32.mrb[40].mxu0  ;;  %v2175_v10 = vpop.permute.xlu0 %2174 }
 0xca2   :  { %v2308_v13 = vpop.f32.mrb[41].mxu0  ;;  %2642 = vmatmul.mubr.msk.bf16.vlgmr.msra.gmra.mrb[44].mxu1 %vm633_vm2, %v2175_v10 }
 0xca3   :  { %v2310_v62 = vpop.f32.mrb[42].mxu0  ;;  %2314 = vmatpush1.bf16.msra.mxu1 %v3078_v33  ;;  %2345 = vmatprep.mubr.bf16.mxu1 %v4804_v63 }
 0xca4   :  { %v2311_v12 = vpop.f32.mrb[43].mxu0  ;;  %2315 = vmatprep.subr.bf16.mxu1 %v3079_v53 }
 0xca7   :  { %2316 = vmatpush1.bf16.msra.mxu1 %v3080_v47 }
 0xca8   :  { %2317 = vmatprep.subr.bf16.mxu1 %v3081_v42 }
 0xcab   :  { %2318 = vmatpush1.bf16.msra.mxu1 %v3082_v46 }
 0xcac   :  { %2319 = vmatprep.subr.bf16.mxu1 %v3083_v38 }
 0xcaf   :  { %2320 = vmatpush1.bf16.msra.mxu1 %v3084_v29 }
 0xcb0   :  { %2321 = vmatprep.subr.bf16.mxu1 %v3085_v26 }
 0xcb2   :  { %v2257_v14 = vpop.permute.xlu0 %2256 }
 0xcb3   :  { %2322 = vmatpush1.bf16.msra.mxu1 %v3086_v25  ;;  %v2259_v2 = vmul.f32 %v2257_v14, %v4963_v48  ;;  %v2260_v41 = vmul.f32 %v2257_v14, %v4964_v39  ;;  %v2262_v50 = vmul.f32 %v2257_v14, %v4826_v9 }
 0xcb4   :  { %2323 = vmatprep.subr.bf16.mxu1 %v3087_v59 }
 0xcb5   :  { %v2263_v35 = vadd.f32 %v2259_v2, %v2251_v27  ;;  %v2264_v55 = vadd.f32 %v2260_v41, %v2252_v23  ;;  %v2266_v18 = vadd.f32 %v2262_v50, %v2254_v52  ;;  %v3096_v2 = vld [vmem:[%s4625_s6 + $0x24] ss:$8 sps:$4 sm:$0xff]   ;;  %v3097_v41 = vld [vmem:[%s4625_s6 + $0x20] ss:$8 sps:$4 sm:$0xff]   ;;  %v3099_v27 = vld [vmem:[%s4625_s6 + $0x30] ss:$8 sps:$4 sm:$0xff]  }
 0xcb7   :  { %2324 = vmatpush1.bf16.msra.mxu1 %v3088_v6  ;;  %v2267_v54 = vadd.f32 %v2263_v35, %v4824_v5  ;;  %v2268_v37 = vadd.f32 %v2264_v55, %v4856_v20  ;;  %v2261_v5 = vmul.f32 %v2257_v14, %v3569_v19  ;;  %v2270_v9 = vadd.f32 %v2266_v18, %v3573_v11  ;;  %v3093_v14 = vld [vmem:[%s4625_s6] ss:$8 sps:$4 sm:$0xff]  }
 0xcb8   :  { %2325 = vmatprep.subr.bf16.mxu1 %v3089_v28 }
 0xcb9   :  { %v2354_v48 = vadd.f32 %v2306_v44, %v2267_v54  ;;  %v2355_v39 = vadd.f32 %v2308_v13, %v2268_v37  ;;  %v2265_v30 = vadd.f32 %v2261_v5, %v2253_v16 }
 0xcbb   :  { %2326 = vmatpush1.bf16.msra.mxu1 %v3090_v31  ;;  %v2646_v32 = vmul.f32 -1.442695, %v2354_v48  ;;  %v2647_v40 = vmul.f32 -1.442695, %v2355_v39  ;;  %v2269_v62 = vadd.f32 %v2265_v30, %v3578_v17  ;;  %v2652_v48 = vld [vmem:[%s4630_s7] ss:$0 sm:$0xff] }
 0xcbc   :  { %2327 = vmatprep.subr.bf16.mxu1 %v3091_v8 }
 0xcbf   :  { %2328 = vmatpush1.bf16.msra.mxu1 %v3092_v22 }
 0xcc2   :  { %2346 = vmatmul.mubr.bf16.vlgmr.msra.gmra.mrb[48].mxu1 %v4476_v24 }
 0xd75   :  { %v2213_v0 = vpop.f32.mrb[44].mxu1 }
 0xd76   :  { %v2669_v34 = vadd.f32 %v2213_v0, %v3643_v61  ;;  %v2215_v36 = vpop.f32.mrb[45].mxu1 }
 0xd77   :  { %v2217_v57 = vpop.f32.mrb[46].mxu1  ;;  %v4571_v15 = vadd.f32 %v2215_v36, %v3646_v1 }
 0xd78   :  { %v2643_v24 = vmul.f32 -1.442695, %v2669_v34  ;;  %v2218_v4 = vpop.f32.mrb[47].mxu1 }
 0xd79   :  { %v2644_v23 = vmul.f32 -1.442695, %v4571_v15 }
 0xd7a   :  { %2977 = vpow2.f32 %v2643_v24 }
 0xd7b   :  { %2979 = vpow2.f32 %v2646_v32 }
 0xd7c   :  { %2981 = vpow2.f32 %v2647_v40 }
 0xd7d   :  { %2983 = vtanh.f32 %v4571_v15 }
 0xd84   :  { %v2978_v3 = vpop.eup %2977 }
 0xd85   :  { %v2225_v49 = vadd.f32 1.0, %v2978_v3  ;;  %v2980_v20 = vpop.eup %2979 }
 0xd86   :  { %v2982_v45 = vpop.eup %2981  ;;  %v2361_v13 = vadd.f32 1.0, %v2980_v20 }
 0xd87   :  { %2985 = vrcp.f32 %v2225_v49  ;;  %v2984_v58 = vpop.eup %2983  ;;  %v2367_v44 = vadd.f32 1.0, %v2982_v45 }
 0xd89   :  { %2987 = vrcp.f32 %v2367_v44 }
 0xd8a   :  { %2989 = vrcp.f32 %v2361_v13 }
 0xd91   :  { %v2986_v51 = vpop.eup %2985 }
 0xd92   :  { %v2236_v10 = vmul.f32 %v2986_v51, %v2984_v58  ;;  %v2235_v0 = vmul.f32 %v2986_v51, %v4510_v56 }
 0xd93   :  { %v2988_v42 = vpop.eup %2987 }
 0xd94   :  { %2238 = vrot.lane.b32.xlu1 %v2236_v10, %s3102_s5  ;;  %v2990_v46 = vpop.eup %2989  ;;  %v2377_v29 = vmul.f32 %v2988_v42, %v4473_v60  ;;  %v3094_v60 = vld [vmem:[%s4625_s6 + $0x14] ss:$8 sps:$4 sm:$0xff]  }
 0xd95   :  { %v2347_v19 = vpop.f32.mrb[48].mxu1 }
 0xd96   :  { %v2356_v33 = vadd.f32 %v2347_v19, %v2269_v62  ;;  %v2349_v21 = vpop.f32.mrb[49].mxu1 }
 0xd97   :  { %v2357_v12 = vadd.f32 %v2349_v21, %v2270_v9  ;;  %v2351_v7 = vpop.f32.mrb[50].mxu1 }
 0xd98   :  { %2991 = vtanh.f32 %v2356_v33  ;;  %v2352_v53 = vpop.f32.mrb[51].mxu1 }
 0xd99   :  { %v2648_v47 = vmul.f32 -1.442695, %v2357_v12 }
 0xd9b   :  { %2993 = vpow2.f32 %v2648_v47 }
 0xda2   :  { %v2992_v38 = vpop.eup %2991 }
 0xda3   :  { %v2378_v26 = vmul.f32 %v2992_v38, %v2990_v46 }
 0xda5   :  { %v2994_v17 = vpop.eup %2993  ;;  %v2379_v25 = vadd.f32 %v2378_v26, %v2377_v29 }
 0xda6   :  { %v2374_v59 = vadd.f32 1.0, %v2994_v17 }
 0xda7   :  { %2995 = vtanh.f32 %v2379_v25 }
 0xda8   :  { %2997 = vrcp.f32 %v2374_v59 }
 0xda9   :  { %2999 = vpow2.f32 %v2644_v23 }
 0xdb1   :  { %v2996_v11 = vpop.eup %2995 }
 0xdb2   :  { %v2998_v6 = vpop.eup %2997 }
 0xdb3   :  { %v2381_v28 = vmul.f32 %v2998_v6, %v2996_v11  ;;  %v3000_v35 = vpop.eup %2999 }
 0xdb4   :  { %v2232_v55 = vadd.f32 1.0, %v3000_v35 }
 0xdb5   :  { %vm2382_vm8 = vcmp.gt.f32.partialorder %v2381_v28, 0.0  ;;  %v2383_v31 = vmul.f32 0.01, %v2381_v28 }
 0xdb6   :  { %3001 = vrcp.f32 %v2232_v55 }
 0xdb7   :  { %v2384_v8 = vsel %vm2382_vm8, %v2381_v28, %v2383_v31 }
 0xdb8   :  { %v2385_v22 = vpack.c.bf16 %v2384_v8, %v2384_v8 }
 0xdba   :  { %2419 = vmatmul.mubr.bf16.vlgmr.msra.gmra.mrb[44].mxu0 %v2385_v22 }
 0xdbb   :  { %2437 = vmatpush1.bf16.msra.mxu0 %v3093_v14  ;;  %2468 = vmatprep.mubr.bf16.mxu0 %v4804_v63  ;;  %v3098_v63 = vld [vmem:[%s4625_s6 + $0x34] ss:$8 sps:$4 sm:$0xff]  }
 0xdbc   :  { %2438 = vmatprep.subr.bf16.mxu0 %v3094_v60 }
 0xdbf   :  { %2439 = vmatpush1.bf16.msra.mxu0 %v3095_v43 }
 0xdc0   :  { %2440 = vmatprep.subr.bf16.mxu0 %v3096_v2  ;;  %v3002_v57 = vpop.eup %3001 }
 0xdc3   :  { %2441 = vmatpush1.bf16.msra.mxu0 %v3097_v41 }
 0xdc4   :  { %2442 = vmatprep.subr.bf16.mxu0 %v3098_v63 }
 0xdc7   :  { %2443 = vmatpush1.bf16.msra.mxu0 %v3099_v27 }
 0xe06   :  { %v2239_v34 = vpop.permute.xlu1 %2238 }
 0xe07   :  { %v2241_v36 = vadd.f32 %v2239_v34, %v2235_v0 }
 0xe09   :  { %3003 = vtanh.f32 %v2241_v36 }
 0xe13   :  { %v3004_v54 = vpop.eup %3003 }
 0xe14   :  { %v2243_v24 = vmul.f32 %v3004_v54, %v3002_v57 }
 0xe16   :  { %v2429_v4 = vpack.c.bf16 %v2243_v24, %v2243_v24 }
 0xe18   :  { %2431 = vrot.lane.b32.xlu0 %v2429_v4, %s3102_s5 }
 0xe1c   :  { %2510 = vrot.lane.b32.xlu0 %v2652_v48, %s3102_s5 }
 0xe8a   :  { %v2432_v37 = vpop.permute.xlu0 %2431 }
 0xe8b   :  { %2649 = vmatmul.mubr.msk.bf16.vlgmr.msra.gmra.mrb[44].mxu0 %vm633_vm2, %v2432_v37 }
 0xe8e   :  { %v2511_v62 = vpop.permute.xlu0 %2510 }
 0xf5e   :  { %v2470_v56 = vpop.f32.mrb[44].mxu0 }
 0xf5f   :  { %v2671_v39 = vadd.f32 %v2470_v56, %v3643_v61  ;;  %v2472_v32 = vpop.f32.mrb[45].mxu0 }
 0xf60   :  { %v2474_v40 = vpop.f32.mrb[46].mxu0  ;;  %v2672_v49 = vadd.f32 %v2472_v32, %v3646_v1  ;;  %v14_v1 = vstv %s4631_s8 }
 0xf61   :  { %v2650_v15 = vmul.f32 -1.442695, %v2671_v39  ;;  %v2475_v3 = vpop.f32.mrb[47].mxu0  ;;  %15 = vst [vmem:[#allocation2] sm:$0x1] %v14_v1 }
 0xf62   :  { %v2651_v52 = vmul.f32 -1.442695, %v2672_v49 }
 0xf63   :  { %3005 = vpow2.f32 %v2650_v15 }
 0xf64   :  { %3007 = vtanh.f32 %v2672_v49 }
 0xf68   :  { %v2653_v7 = vld [vmem:[#allocation2] ss:$0 sm:$0xff] }
 0xf6d   :  { %v3006_v5 = vpop.eup %3005 }
 0xf6e   :  { %v2482_v50 = vadd.f32 1.0, %v3006_v5  ;;  %v3008_v20 = vpop.eup %3007 }
 0xf70   :  { %3009 = vrcp.f32 %v2482_v50 }
 0xf71   :  { %3011 = vpow2.f32 %v2651_v52 }
 0xf7a   :  { %v3010_v16 = vpop.eup %3009 }
 0xf7b   :  { %v2493_v45 = vmul.f32 %v3010_v16, %v3008_v20  ;;  %v3012_v58 = vpop.eup %3011  ;;  %v2492_v30 = vmul.f32 %v3010_v16, %v2241_v36 }
 0xf7c   :  { %v2489_v61 = vadd.f32 1.0, %v3012_v58 }
 0xf7d   :  { %2495 = vrot.lane.b32.xlu1 %v2493_v45, %s3102_s5 }
 0xf7e   :  { %3013 = vrcp.f32 %v2489_v61 }
 0xf88   :  { %v3014_v44 = vpop.eup %3013 }
 0xfef   :  { %v2496_v51 = vpop.permute.xlu1 %2495 }
 0xff0   :  { %v2498_v18 = vadd.f32 %v2496_v51, %v2492_v30 }
 0xff2   :  { %3015 = vtanh.f32 %v2498_v18 }
 0xffc   :  { %v3016_v10 = vpop.eup %3015 }
 0xffd   :  { %v2500_v13 = vmul.f32 %v3016_v10, %v3014_v44 }
 0xfff   :  { %vm2501_vm9 = vcmp.gt.f32.partialorder %v2500_v13, 0.0  ;;  %v2502_v19 = vmul.f32 0.01, %v2500_v13 }
0x1001   :  { %v2503_v9 = vsel %vm2501_vm9, %v2500_v13, %v2502_v19 }
0x1002   :  { %v2513_v33 = vmul.f32 %v2511_v62, %v2503_v9 }
0x1004   :  { %2515 = vrot.lane.b32.xlu1 %v2513_v33, %s3102_s5 }
0x1076   :  { %v2516_v21 = vpop.permute.xlu1 %2515 }
0x1077   :  { %v2518_v12 = vsel %vm633_vm2, %v2516_v21, 0.0 }
0x1078   :  { %2519 = vadd.xlane.f32.xlu0 %v2518_v12 }
0x1105   :  { %v2520_v53 = vpop.xlane.xlu0 %2519 }
0x1106   :  { %v2528_v47 = vadd.f32 %v2653_v7, %v2520_v53 }
0x1108   :  { %v2654_v42 = vmul.f32 -1.442695, %v2528_v47 }
0x110a   :  { %3017 = vpow2.f32 %v2654_v42 }
0x1114   :  { %v3018_v46 = vpop.eup %3017 }
0x1115   :  { %v2532_v38 = vadd.f32 1.0, %v3018_v46 }
0x1117   :  { %3019 = vrcp.f32 %v2532_v38 }
0x1121   :  { %v3020_v29 = vpop.eup %3019 }
0x1122   :  { %2536 = vst.msk [vmem:[%s4632_s9] sm:$0xff] %vm2535_vm10, %v3020_v29 }

</bundles_post_ra>
